<compile_context>
chip_gen: v6e
topology: v6e:2x2x1
jax: 0.10.0
libtpu: 0.0.40
codegen_flags: <defaults>
</compile_context>

<pallas_src>
import numpy as np
import jax
import jax.numpy as jnp
from jax.experimental import pallas as pl
from jax.experimental.pallas import tpu as pltpu

# ---------------- small synthetic HiFiGAN config ----------------
SR = 16000
N_FFT = 64
HOP = 4
N_FREQ = N_FFT // 2 + 1            # 33
N_MEL = 16
UPSAMPLE_RATES = (2, 2)            # product == HOP so out_len == in_len
UPSAMPLE_KERNELS = (4, 4)
UPSAMPLE_INITIAL_CH = 32
RESBLOCK_KERNEL = 3
RESBLOCK_DILATIONS = (1, 3)
LRELU_SLOPE = 0.1

TB = 64                            # per-phase time length (== n_frames) in-kernel
BAND = 128                         # lane columns reserved per phase band in scratch
HALO = 32                          # zero halo on each side of a band
SLAB_W = 128                       # weight slab lane width


# ---------------- deterministic constants / parameters ----------------
def _hann(n):
    k = np.arange(n)
    return 0.5 - 0.5 * np.cos(2.0 * np.pi * k / n)   # periodic hann (torch default)


def _mel_filterbank(n_mel, n_freq, sr, n_fft):
    def hz2mel(f): return 2595.0 * np.log10(1.0 + f / 700.0)
    def mel2hz(m): return 700.0 * (10.0 ** (m / 2595.0) - 1.0)
    mels = np.linspace(hz2mel(0.0), hz2mel(sr / 2.0), n_mel + 2)
    bins = np.floor((n_fft + 1) * mel2hz(mels) / sr).astype(np.int64)
    fb = np.zeros((n_mel, n_freq), np.float32)
    for m in range(1, n_mel + 1):
        lo, c, hi = bins[m - 1], bins[m], bins[m + 1]
        for k in range(lo, c):
            if c > lo:
                fb[m - 1, k] = (k - lo) / (c - lo)
        for k in range(c, hi):
            if hi > c:
                fb[m - 1, k] = (hi - k) / (hi - c)
    return fb


def make_consts():
    n = np.arange(N_FFT)
    win = _hann(N_FFT)
    ang = 2.0 * np.pi * np.outer(n, np.arange(N_FREQ)) / N_FFT
    dft_real = (win[:, None] * np.cos(ang)).astype(np.float32)   # [n_fft, n_freq]
    dft_imag = (-win[:, None] * np.sin(ang)).astype(np.float32)
    mel_fb = _mel_filterbank(N_MEL, N_FREQ, SR, N_FFT)           # [n_mel, n_freq]
    return {"dft_real": dft_real, "dft_imag": dft_imag, "mel_fb": mel_fb}


def init_raw_params(key):
    """Synthetic parameters in their natural PyTorch layouts."""
    keys = iter(jax.random.split(key, 64))

    def w(shape, scale=0.1):
        return scale * jax.random.normal(next(keys), shape, jnp.float32)

    params = {
        "conv_pre_w": w((UPSAMPLE_INITIAL_CH, N_MEL, 7)),
        "conv_pre_b": w((UPSAMPLE_INITIAL_CH,), 0.01),
        "ups": [],
        "resblocks": [],
    }
    ch = UPSAMPLE_INITIAL_CH
    for r, k in zip(UPSAMPLE_RATES, UPSAMPLE_KERNELS):
        cout = ch // 2
        params["ups"].append({"w": w((ch, cout, k)),              # ConvTranspose1d [Cin,Cout,K]
                              "b": w((cout,), 0.01)})
        rb = []
        for _d in RESBLOCK_DILATIONS:
            rb.append({"w1": w((cout, cout, RESBLOCK_KERNEL)), "b1": w((cout,), 0.01),
                       "w2": w((cout, cout, RESBLOCK_KERNEL)), "b2": w((cout,), 0.01)})
        params["resblocks"].append([rb])                          # one MRF kernel size
        ch = cout
    params["conv_post_w"] = w((1, ch, 7))
    params["conv_post_b"] = w((1,), 0.01)
    return params


# ---------------- host-side polyphase tap derivation ----------------
def _conv_phase_taps(S, K, d):
    """'same' Conv1d over a stride-S phase decomposition.
    Output phase s, tap k reads input phase (s+k*d-p) % S at offset (s+k*d-p)//S."""
    p = d * (K - 1) // 2
    return tuple(tuple(((s + k * d - p) % S, (s + k * d - p) // S) for k in range(K))
                 for s in range(S))


def _convT_phase_struct(S_in, r, K, pad):
    """ConvTranspose1d (stride r) consuming a stride-S_in decomposition and
    producing a stride-(S_in*r) decomposition; per output phase j the taps are
    (kernel tap k, input phase, input offset), all static."""
    P = K - 1 - pad
    S_out = S_in * r
    taps, sources = [], []
    for j in range(S_out):
        row = []
        for k in range(K):
            if (j + k - P) % r == 0:
                c = (j + k - P) // r
                src = (c % S_in, c // S_in)
                if src not in sources:
                    sources.append(src)
                row.append((k, src))
        taps.append(tuple(row))
    return tuple(taps), tuple(sources), S_out


def _flatten_conv_w(w):
    # np [Cout, Cin, K] -> [Cout, K*Cin], tap-major rows (matches operand layout).
    cout, cin, k = w.shape
    return np.transpose(w, (0, 2, 1)).reshape(cout, k * cin)


def prepare_slab_and_plans(raw, consts, n_frames):
    """Pack every weight (with its bias as an extra column) into one (rows,128)
    f32 slab and record static slicing/tap plans for the kernel."""
    assert n_frames == TB
    blocks, row, max_op_rows, max_cin = [], [0], [0], [0]

    def add(mat):
        mat = np.asarray(mat, np.float32)
        assert mat.ndim == 2 and mat.shape[1] <= SLAB_W, mat.shape
        r0 = row[0]
        blocks.append((r0, mat))
        row[0] = r0 + ((mat.shape[0] + 7) // 8) * 8
        return r0

    def add_conv(w, b, S, d):
        w = np.asarray(w, np.float32)
        b = np.asarray(b, np.float32)
        cout, cin, K = w.shape
        blk = np.concatenate([_flatten_conv_w(w), b[:, None]], axis=1)
        max_op_rows[0] = max(max_op_rows[0], K * cin)
        max_cin[0] = max(max_cin[0], cin)
        return {"row0": add(blk), "cin": cin, "cout": cout, "K": K, "S": S,
                "taps": _conv_phase_taps(S, K, d)}

    def add_convT(w_t, b, S_in, r, K):
        w_t = np.asarray(w_t, np.float32)
        b = np.asarray(b, np.float32)
        cin, cout, _ = w_t.shape
        pad = (K - r) // 2
        assert K - r == 2 * pad, "HiFiGAN upsample padding assumption"
        taps, sources, S_out = _convT_phase_struct(S_in, r, K, pad)
        w_conv = np.flip(np.transpose(w_t, (1, 0, 2)), axis=-1)   # (Cout, Cin, K)
        nU = len(sources)
        W = np.zeros((S_out * cout, nU * cin + 1), np.float32)
        for j, trow in enumerate(taps):
            for (k, src) in trow:
                iu = sources.index(src)
                W[j * cout:(j + 1) * cout, iu * cin:(iu + 1) * cin] = w_conv[:, :, k]
            W[j * cout:(j + 1) * cout, nU * cin] = b
        max_op_rows[0] = max(max_op_rows[0], nU * cin)
        max_cin[0] = max(max_cin[0], cin)
        return {"row0": add(W), "cin": cin, "cout": cout,
                "S_in": S_in, "S_out": S_out, "sources": sources}

    plans = {}

    # front-end: stacked [DFT_real ; DFT_imag] LHS (one matmul) and mel filterbank
    dft = np.zeros((80, N_FFT), np.float32)
    dft[0:N_FREQ] = consts["dft_real"].T
    dft[40:40 + N_FREQ] = consts["dft_imag"].T
    plans["dft_row0"] = add(dft)
    plans["mel_row0"] = add(consts["mel_fb"])

    plans["pre"] = add_conv(raw["conv_pre_w"], raw["conv_pre_b"], S=1, d=1)

    plans["stages"] = []
    S = 1
    for i, (r, k) in enumerate(zip(UPSAMPLE_RATES, UPSAMPLE_KERNELS)):
        st = {"up": add_convT(raw["ups"][i]["w"], raw["ups"][i]["b"], S_in=S, r=r, K=k)}
        S *= r
        st["rb"] = []
        for j, d in enumerate(RESBLOCK_DILATIONS):
            br = raw["resblocks"][i][0][j]
            st["rb"].append({
                "c1": add_conv(br["w1"], br["b1"], S=S, d=d),
                "c2": add_conv(br["w2"], br["b2"], S=S, d=1),
            })
        plans["stages"].append(st)
    plans["post"] = add_conv(raw["conv_post_w"], raw["conv_post_b"], S=S, d=1)
    plans["S_total"] = S
    plans["op_rows"] = ((max_op_rows[0] + 7) // 8) * 8
    plans["act_rows"] = ((max_cin[0] + 7) // 8) * 8

    total_rows = ((row[0] + 7) // 8) * 8
    slab = np.zeros((total_rows, SLAB_W), np.float32)
    for r0, m in blocks:
        slab[r0:r0 + m.shape[0], :m.shape[1]] = m
    return jnp.asarray(slab), plans


# ---------------- fused kernel ----------------
def _lrelu(x):
    return jnp.where(x >= 0, x, LRELU_SLOPE * x)


def build_kernel(plans):
    S_total = plans["S_total"]

    def kernel(frames_ref, slab_ref, o_ref, act_ref, op_ref):
        # Halos of the activation bands must read as zero padding; zero once per step.
        act_ref[...] = jnp.zeros_like(act_ref)

        def write_bands(x, cin, S):
            for p in range(S):
                c0 = p * BAND + HALO
                act_ref[0:cin, c0:c0 + TB] = x[:, p * TB:(p + 1) * TB]

        def window(cin, p, off):
            c0 = p * BAND + HALO + off
            return act_ref[0:cin, c0:c0 + TB]

        def conv(x, pln):
            """'same' Conv1d in phase form: one matmul for all S output phases."""
            cin, cout, K, S = pln["cin"], pln["cout"], pln["K"], pln["S"]
            write_bands(x, cin, S)
            for s in range(S):
                for k in range(K):
                    p, off = pln["taps"][s][k]
                    op_ref[k * cin:(k + 1) * cin, s * TB:(s + 1) * TB] = window(cin, p, off)
            r0 = pln["row0"]
            w = slab_ref[r0:r0 + cout, 0:K * cin]
            b = slab_ref[r0:r0 + cout, K * cin:K * cin + 1]
            return jnp.dot(w, op_ref[0:K * cin, 0:S * TB],
                           preferred_element_type=jnp.float32) + b

        def convT(x, pln):
            """ConvTranspose1d in phase form: one matmul, output phases row-stacked,
            operand = union of (input phase, offset) sources (no interleave matmul)."""
            cin, cout = pln["cin"], pln["cout"]
            S_in, S_out = pln["S_in"], pln["S_out"]
            srcs = pln["sources"]
            write_bands(x, cin, S_in)
            for iu, (p, off) in enumerate(srcs):
                op_ref[iu * cin:(iu + 1) * cin, 0:TB] = window(cin, p, off)
            nW = len(srcs) * cin
            r0 = pln["row0"]
            w = slab_ref[r0:r0 + S_out * cout, 0:nW]
            b = slab_ref[r0:r0 + S_out * cout, nW:nW + 1]
            y = jnp.dot(w, op_ref[0:nW, 0:TB], preferred_element_type=jnp.float32) + b
            # row-stacked phases (S_out*Cout, TB) -> phase-major compact (Cout, S_out*TB)
            return jnp.concatenate(
                [y[j * cout:(j + 1) * cout, :] for j in range(S_out)], axis=1)

        # ---- mel front-end (time on the lane axis, real+imag stacked in one LHS) ----
        fr = frames_ref[...]                                        # (N_FFT, TB)
        d0 = plans["dft_row0"]
        ri = jnp.dot(slab_ref[d0:d0 + 80, 0:N_FFT], fr,
                     preferred_element_type=jnp.float32)            # (80, TB)
        re = ri[0:N_FREQ, :]
        im = ri[40:40 + N_FREQ, :]
        mag = jnp.sqrt(re * re + im * im + 1e-9)
        m0 = plans["mel_row0"]
        mel = jnp.dot(slab_ref[m0:m0 + N_MEL, 0:N_FREQ], mag,
                      preferred_element_type=jnp.float32)
        x = jnp.log(jnp.maximum(mel, 1e-5))                         # (N_MEL, TB), S=1

        # ---- HiFiGAN generator (fully phase-decomposed, no interleave) ----
        x = conv(x, plans["pre"])
        for st in plans["stages"]:
            x = convT(_lrelu(x), st["up"])
            for blk in st["rb"]:
                xt = conv(_lrelu(x), blk["c1"])
                xt = conv(_lrelu(xt), blk["c2"])
                x = x + xt
            # TODO(synk): average over MRF branches if more resblock kernel sizes are added.
        x = conv(_lrelu(x), plans["post"])                          # (1, S_total*TB)
        o_ref[...] = jnp.tanh(x)                                    # phase-major output

    return kernel


def make_forward(slab, plans, n_frames):
    kernel = build_kernel(plans)
    S_total = plans["S_total"]
    t_out = S_total * n_frames
    slab_shape = tuple(slab.shape)
    act_shape = (plans["act_rows"], S_total * BAND)
    op_shape = (plans["op_rows"], S_total * TB)

    def forward(audio, slab_arr):
        B = audio.shape[0]
        pad = (N_FFT - HOP) // 2
        xpad = jnp.pad(audio, ((0, 0), (pad, pad)), mode="reflect")
        # framesT[b, n, f] = xpad[b, n + HOP*f]  (XLA gather; stays outside kernel)
        idx = np.arange(N_FFT)[:, None] + HOP * np.arange(n_frames)[None, :]
        frames_t = xpad[:, idx]                                     # (B, N_FFT, n_frames)
        out = pl.pallas_call(
            kernel,
            out_shape=jax.ShapeDtypeStruct((B, 1, t_out), jnp.float32),
            grid=(B,),
            in_specs=[
                pl.BlockSpec((None, N_FFT, n_frames), lambda i: (i, 0, 0)),
                pl.BlockSpec(slab_shape, lambda i: (0, 0)),         # one weight slab, one DMA
            ],
            out_specs=pl.BlockSpec((None, 1, t_out), lambda i: (i, 0, 0)),
            scratch_shapes=[
                pltpu.VMEM(act_shape, jnp.float32),                 # halo-padded phase bands
                pltpu.VMEM(op_shape, jnp.float32),                  # im2col operand staging
            ],
            compiler_params=pltpu.CompilerParams(
                dimension_semantics=("parallel",)),                 # v7x: one batch item / TC
        )(frames_t, slab_arr)
        # kernel output is phase-major: out[b, 0, j*n_frames + v] == wave[b, S_total*v + j]
        wave = jnp.transpose(out.reshape(B, S_total, n_frames), (0, 2, 1))
        return wave.reshape(B, 1, t_out)

    return jax.jit(forward)


# ---------------- plain-XLA reference (for correctness cross-check) ----------------
def reference_forward(audio, raw, consts):
    P = jax.lax.Precision.HIGHEST
    pad = (N_FFT - HOP) // 2
    xpad = jnp.pad(audio, ((0, 0), (pad, pad)), mode="reflect")
    n_frames = (xpad.shape[1] - N_FFT) // HOP + 1
    idx = np.arange(n_frames)[:, None] * HOP + np.arange(N_FFT)[None, :]
    frames = xpad[:, idx]                                        # (B, F, N_FFT)
    re = jnp.einsum("bfn,nk->bfk", frames, consts["dft_real"], precision=P)
    im = jnp.einsum("bfn,nk->bfk", frames, consts["dft_imag"], precision=P)
    mag = jnp.sqrt(re * re + im * im + 1e-9)
    mel = jnp.einsum("bfk,mk->bmf", mag, consts["mel_fb"], precision=P)
    x = jnp.log(jnp.maximum(mel, 1e-5))                          # (B, N_MEL, F)

    def conv(v, w, b, dilation=1):
        K = w.shape[-1]
        p = dilation * (K - 1) // 2
        y = jax.lax.conv_general_dilated(
            v, w, window_strides=(1,), padding=[(p, p)], rhs_dilation=(dilation,),
            dimension_numbers=("NCH", "OIH", "NCH"), precision=P)
        return y + b[None, :, None]

    def convT(v, w_t, b, stride, padding):
        Bb, cin, T = v.shape
        K = w_t.shape[-1]
        xu = jnp.zeros((Bb, cin, (T - 1) * stride + 1), v.dtype).at[:, :, ::stride].set(v)
        w_conv = jnp.flip(jnp.transpose(w_t, (1, 0, 2)), axis=-1)
        p = K - 1 - padding
        y = jax.lax.conv_general_dilated(
            xu, w_conv, (1,), [(p, p)],
            dimension_numbers=("NCH", "OIH", "NCH"), precision=P)
        return y + b[None, :, None]

    def lrelu(v):
        return jnp.where(v >= 0, v, LRELU_SLOPE * v)

    x = conv(x, raw["conv_pre_w"], raw["conv_pre_b"])
    for i, (r, k) in enumerate(zip(UPSAMPLE_RATES, UPSAMPLE_KERNELS)):
        up = raw["ups"][i]
        x = convT(lrelu(x), up["w"], up["b"], r, (k - r) // 2)
        xs = None
        for rb in raw["resblocks"][i]:
            xr = x
            for d, pbr in zip(RESBLOCK_DILATIONS, rb):
                xt = conv(lrelu(xr), pbr["w1"], pbr["b1"], dilation=d)
                xt = conv(lrelu(xt), pbr["w2"], pbr["b2"], dilation=1)
                xr = xr + xt
            xs = xr if xs is None else xs + xr
        x = xs / float(len(raw["resblocks"][i]))
    x = conv(lrelu(x), raw["conv_post_w"], raw["conv_post_b"])
    return jnp.tanh(x)


# ---------------- main ----------------
if __name__ == "__main__":
    key = jax.random.PRNGKey(0)
    pkey, xkey = jax.random.split(key)
    raw_params = init_raw_params(pkey)
    consts = make_consts()

    B, T = 2, 256
    audio = 0.5 * jax.random.normal(xkey, (B, T), jnp.float32)   # [B, T] mono audio

    pad = (N_FFT - HOP) // 2
    n_frames = (T + 2 * pad - N_FFT) // HOP + 1                  # 64
    t_out = n_frames * int(np.prod(UPSAMPLE_RATES))              # 256 == T
    assert t_out == T and n_frames == TB

    slab, plans = prepare_slab_and_plans(raw_params, consts, n_frames)
    fwd = make_forward(slab, plans, n_frames)

    y = fwd(audio, slab)
    jax.block_until_ready(y)

    assert y.shape == (B, 1, T), y.shape
    assert bool(jnp.all(jnp.isfinite(y)))

    # semantics check against the straight XLA implementation of the same forward
    y_ref = reference_forward(audio, raw_params, consts)
    err = float(jnp.max(jnp.abs(y - y_ref)))
    assert err < 5e-2, f"max abs err vs reference: {err}"

    print("KERNEL_OK")
</pallas_src>

<mosaic_0001>
module attributes {stable_mosaic.version = 11 : i64} {
  func.func @kernel(%arg0: i32, %arg1: memref<1x64x64xf32, #tpu.memory_space<vmem>>, %arg2: memref<296x128xf32, #tpu.memory_space<vmem>>, %arg3: memref<1x1x256xf32, #tpu.memory_space<vmem>>, %arg4: memref<32x512xf32, #tpu.memory_space<vmem>>, %arg5: memref<112x256xf32, #tpu.memory_space<vmem>>) attributes {dimension_semantics = [#tpu.dimension_semantics<parallel>], iteration_bounds = array<i64: 2>, scalar_prefetch = 0 : i64, scratch_operands = 2 : i64, tpu.core_type = #tpu.core_type<tc>, window_params = [{transform_indices = @transform_0, window_bounds = array<i64: 1, 64, 64>}, {pipeline_mode = #tpu.pipeline_mode<synchronous>, transform_indices = @transform_1, window_bounds = array<i64: 296, 128>}, {transform_indices = @transform_2, window_bounds = array<i64: 1, 1, 256>}]} {
    %cst = arith.constant 0.000000e+00 : f32
    %0 = vector.broadcast %cst : f32 to vector<32x512xf32>
    %c0 = arith.constant 0 : index
    %c0_0 = arith.constant 0 : index
    %1 = vector.load %arg4[%c0, %c0_0] : memref<32x512xf32, #tpu.memory_space<vmem>>, vector<32x512xf32>
    tpu.vector_store %arg4[%c0, %c0_0], %0 {strides = array<i32>} : memref<32x512xf32, #tpu.memory_space<vmem>>, vector<32x512xf32>,
    %c0_1 = arith.constant 0 : index
    %c0_2 = arith.constant 0 : index
    %c0_3 = arith.constant 0 : index
    %2 = vector.load %arg1[%c0_1, %c0_2, %c0_3] : memref<1x64x64xf32, #tpu.memory_space<vmem>>, vector<1x64x64xf32>
    %3 = vector.shape_cast %2 : vector<1x64x64xf32> to vector<64x64xf32>
    %c0_4 = arith.constant 0 : index
    %c0_5 = arith.constant 0 : index
    %4 = vector.load %arg2[%c0_4, %c0_5] : memref<296x128xf32, #tpu.memory_space<vmem>>, vector<80x64xf32>
    %cst_6 = arith.constant dense<0.000000e+00> : vector<80x64xf32>
    %5 = tpu.matmul %4, %3, %cst_6 {dimension_numbers = #tpu.dot_dimension_numbers<[1], [0], [0], [1], [0, 0, 1, 1], [], []>} : vector<80x64xf32>, vector<64x64xf32>, vector<80x64xf32> -> vector<80x64xf32>
    %6 = vector.extract_strided_slice %5 {offsets = [0, 0], sizes = [33, 64], strides = [1, 1]} : vector<80x64xf32> to vector<33x64xf32>
    %7 = vector.extract_strided_slice %5 {offsets = [40, 0], sizes = [33, 64], strides = [1, 1]} : vector<80x64xf32> to vector<33x64xf32>
    %8 = arith.mulf %6, %6 : vector<33x64xf32>
    %9 = arith.mulf %7, %7 : vector<33x64xf32>
    %10 = arith.addf %8, %9 : vector<33x64xf32>
    %cst_7 = arith.constant 9.99999971E-10 : f32
    %11 = vector.broadcast %cst_7 : f32 to vector<33x64xf32>
    %12 = arith.addf %10, %11 : vector<33x64xf32>
    %13 = math.sqrt %12 : vector<33x64xf32>
    %c80 = arith.constant 80 : index
    %c0_8 = arith.constant 0 : index
    %14 = vector.load %arg2[%c80, %c0_8] : memref<296x128xf32, #tpu.memory_space<vmem>>, vector<16x33xf32>
    %cst_9 = arith.constant dense<0.000000e+00> : vector<16x64xf32>
    %15 = tpu.matmul %14, %13, %cst_9 {dimension_numbers = #tpu.dot_dimension_numbers<[1], [0], [0], [1], [0, 0, 1, 1], [], []>} : vector<16x33xf32>, vector<33x64xf32>, vector<16x64xf32> -> vector<16x64xf32>
    %cst_10 = arith.constant 9.99999974E-6 : f32
    %16 = vector.broadcast %cst_10 : f32 to vector<16x64xf32>
    %17 = arith.maximumf %15, %16 : vector<16x64xf32>
    %18 = math.log %17 : vector<16x64xf32>
    %c0_11 = arith.constant 0 : index
    %c32 = arith.constant 32 : index
    %19 = vector.load %arg4[%c0_11, %c32] : memref<32x512xf32, #tpu.memory_space<vmem>>, vector<16x64xf32>
    tpu.vector_store %arg4[%c0_11, %c32], %18 {strides = array<i32>} : memref<32x512xf32, #tpu.memory_space<vmem>>, vector<16x64xf32>,
    %c0_12 = arith.constant 0 : index
    %c29 = arith.constant 29 : index
    %20 = vector.load %arg4[%c0_12, %c29] : memref<32x512xf32, #tpu.memory_space<vmem>>, vector<16x64xf32>
    %c0_13 = arith.constant 0 : index
    %c0_14 = arith.constant 0 : index
    %21 = vector.load %arg5[%c0_13, %c0_14] : memref<112x256xf32, #tpu.memory_space<vmem>>, vector<16x64xf32>
    tpu.vector_store %arg5[%c0_13, %c0_14], %20 {strides = array<i32>} : memref<112x256xf32, #tpu.memory_space<vmem>>, vector<16x64xf32>,
    %c0_15 = arith.constant 0 : index
    %c30 = arith.constant 30 : index
    %22 = vector.load %arg4[%c0_15, %c30] : memref<32x512xf32, #tpu.memory_space<vmem>>, vector<16x64xf32>
    %c16 = arith.constant 16 : index
    %c0_16 = arith.constant 0 : index
    %23 = vector.load %arg5[%c16, %c0_16] : memref<112x256xf32, #tpu.memory_space<vmem>>, vector<16x64xf32>
    tpu.vector_store %arg5[%c16, %c0_16], %22 {strides = array<i32>} : memref<112x256xf32, #tpu.memory_space<vmem>>, vector<16x64xf32>,
    %c0_17 = arith.constant 0 : index
    %c31 = arith.constant 31 : index
    %24 = vector.load %arg4[%c0_17, %c31] : memref<32x512xf32, #tpu.memory_space<vmem>>, vector<16x64xf32>
    %c32_18 = arith.constant 32 : index
    %c0_19 = arith.constant 0 : index
    %25 = vector.load %arg5[%c32_18, %c0_19] : memref<112x256xf32, #tpu.memory_space<vmem>>, vector<16x64xf32>
    tpu.vector_store %arg5[%c32_18, %c0_19], %24 {strides = array<i32>} : memref<112x256xf32, #tpu.memory_space<vmem>>, vector<16x64xf32>,
    %c0_20 = arith.constant 0 : index
    %c32_21 = arith.constant 32 : index
    %26 = vector.load %arg4[%c0_20, %c32_21] : memref<32x512xf32, #tpu.memory_space<vmem>>, vector<16x64xf32>
    %c48 = arith.constant 48 : index
    %c0_22 = arith.constant 0 : index
    %27 = vector.load %arg5[%c48, %c0_22] : memref<112x256xf32, #tpu.memory_space<vmem>>, vector<16x64xf32>
    tpu.vector_store %arg5[%c48, %c0_22], %26 {strides = array<i32>} : memref<112x256xf32, #tpu.memory_space<vmem>>, vector<16x64xf32>,
    %c0_23 = arith.constant 0 : index
    %c33 = arith.constant 33 : index
    %28 = vector.load %arg4[%c0_23, %c33] : memref<32x512xf32, #tpu.memory_space<vmem>>, vector<16x64xf32>
    %c64 = arith.constant 64 : index
    %c0_24 = arith.constant 0 : index
    %29 = vector.load %arg5[%c64, %c0_24] : memref<112x256xf32, #tpu.memory_space<vmem>>, vector<16x64xf32>
    tpu.vector_store %arg5[%c64, %c0_24], %28 {strides = array<i32>} : memref<112x256xf32, #tpu.memory_space<vmem>>, vector<16x64xf32>,
    %c0_25 = arith.constant 0 : index
    %c34 = arith.constant 34 : index
    %30 = vector.load %arg4[%c0_25, %c34] : memref<32x512xf32, #tpu.memory_space<vmem>>, vector<16x64xf32>
    %c80_26 = arith.constant 80 : index
    %c0_27 = arith.constant 0 : index
    %31 = vector.load %arg5[%c80_26, %c0_27] : memref<112x256xf32, #tpu.memory_space<vmem>>, vector<16x64xf32>
    tpu.vector_store %arg5[%c80_26, %c0_27], %30 {strides = array<i32>} : memref<112x256xf32, #tpu.memory_space<vmem>>, vector<16x64xf32>,
    %c0_28 = arith.constant 0 : index
    %c35 = arith.constant 35 : index
    %32 = vector.load %arg4[%c0_28, %c35] : memref<32x512xf32, #tpu.memory_space<vmem>>, vector<16x64xf32>
    %c96 = arith.constant 96 : index
    %c0_29 = arith.constant 0 : index
    %33 = vector.load %arg5[%c96, %c0_29] : memref<112x256xf32, #tpu.memory_space<vmem>>, vector<16x64xf32>
    tpu.vector_store %arg5[%c96, %c0_29], %32 {strides = array<i32>} : memref<112x256xf32, #tpu.memory_space<vmem>>, vector<16x64xf32>,
    %c96_30 = arith.constant 96 : index
    %c0_31 = arith.constant 0 : index
    %34 = vector.load %arg2[%c96_30, %c0_31] : memref<296x128xf32, #tpu.memory_space<vmem>>, vector<32x112xf32>
    %c96_32 = arith.constant 96 : index
    %c112 = arith.constant 112 : index
    %35 = vector.load %arg2[%c96_32, %c112] : memref<296x128xf32, #tpu.memory_space<vmem>>, vector<32x1xf32>
    %c0_33 = arith.constant 0 : index
    %c0_34 = arith.constant 0 : index
    %36 = vector.load %arg5[%c0_33, %c0_34] : memref<112x256xf32, #tpu.memory_space<vmem>>, vector<112x64xf32>
    %cst_35 = arith.constant dense<0.000000e+00> : vector<32x64xf32>
    %37 = tpu.matmul %34, %36, %cst_35 {dimension_numbers = #tpu.dot_dimension_numbers<[1], [0], [0], [1], [0, 0, 1, 1], [], []>} : vector<32x112xf32>, vector<112x64xf32>, vector<32x64xf32> -> vector<32x64xf32>
    %38 = vector.broadcast %35 : vector<32x1xf32> to vector<32x64xf32>
    %39 = arith.addf %37, %38 : vector<32x64xf32>
    %cst_36 = arith.constant 0.000000e+00 : f32
    %40 = vector.broadcast %cst_36 : f32 to vector<32x64xf32>
    %41 = arith.cmpf oge, %39, %40 : vector<32x64xf32>
    %cst_37 = arith.constant 1.000000e-01 : f32
    %42 = vector.broadcast %cst_37 : f32 to vector<32x64xf32>
    %43 = arith.mulf %42, %39 : vector<32x64xf32>
    %44 = arith.select %41, %39, %43 : vector<32x64xi1>, vector<32x64xf32>
    %c0_38 = arith.constant 0 : index
    %c32_39 = arith.constant 32 : index
    %45 = vector.load %arg4[%c0_38, %c32_39] : memref<32x512xf32, #tpu.memory_space<vmem>>, vector<32x64xf32>
    tpu.vector_store %arg4[%c0_38, %c32_39], %44 {strides = array<i32>} : memref<32x512xf32, #tpu.memory_space<vmem>>, vector<32x64xf32>,
    %c0_40 = arith.constant 0 : index
    %c31_41 = arith.constant 31 : index
    %46 = vector.load %arg4[%c0_40, %c31_41] : memref<32x512xf32, #tpu.memory_space<vmem>>, vector<32x64xf32>
    %c0_42 = arith.constant 0 : index
    %c0_43 = arith.constant 0 : index
    %47 = vector.load %arg5[%c0_42, %c0_43] : memref<112x256xf32, #tpu.memory_space<vmem>>, vector<32x64xf32>
    tpu.vector_store %arg5[%c0_42, %c0_43], %46 {strides = array<i32>} : memref<112x256xf32, #tpu.memory_space<vmem>>, vector<32x64xf32>,
    %c0_44 = arith.constant 0 : index
    %c32_45 = arith.constant 32 : index
    %48 = vector.load %arg4[%c0_44, %c32_45] : memref<32x512xf32, #tpu.memory_space<vmem>>, vector<32x64xf32>
    %c32_46 = arith.constant 32 : index
    %c0_47 = arith.constant 0 : index
    %49 = vector.load %arg5[%c32_46, %c0_47] : memref<112x256xf32, #tpu.memory_space<vmem>>, vector<32x64xf32>
    tpu.vector_store %arg5[%c32_46, %c0_47], %48 {strides = array<i32>} : memref<112x256xf32, #tpu.memory_space<vmem>>, vector<32x64xf32>,
    %c0_48 = arith.constant 0 : index
    %c33_49 = arith.constant 33 : index
    %50 = vector.load %arg4[%c0_48, %c33_49] : memref<32x512xf32, #tpu.memory_space<vmem>>, vector<32x64xf32>
    %c64_50 = arith.constant 64 : index
    %c0_51 = arith.constant 0 : index
    %51 = vector.load %arg5[%c64_50, %c0_51] : memref<112x256xf32, #tpu.memory_space<vmem>>, vector<32x64xf32>
    tpu.vector_store %arg5[%c64_50, %c0_51], %50 {strides = array<i32>} : memref<112x256xf32, #tpu.memory_space<vmem>>, vector<32x64xf32>,
    %c128 = arith.constant 128 : index
    %c0_52 = arith.constant 0 : index
    %52 = vector.load %arg2[%c128, %c0_52] : memref<296x128xf32, #tpu.memory_space<vmem>>, vector<32x96xf32>
    %c128_53 = arith.constant 128 : index
    %c96_54 = arith.constant 96 : index
    %53 = vector.load %arg2[%c128_53, %c96_54] : memref<296x128xf32, #tpu.memory_space<vmem>>, vector<32x1xf32>
    %c0_55 = arith.constant 0 : index
    %c0_56 = arith.constant 0 : index
    %54 = vector.load %arg5[%c0_55, %c0_56] : memref<112x256xf32, #tpu.memory_space<vmem>>, vector<96x64xf32>
    %cst_57 = arith.constant dense<0.000000e+00> : vector<32x64xf32>
    %55 = tpu.matmul %52, %54, %cst_57 {dimension_numbers = #tpu.dot_dimension_numbers<[1], [0], [0], [1], [0, 0, 1, 1], [], []>} : vector<32x96xf32>, vector<96x64xf32>, vector<32x64xf32> -> vector<32x64xf32>
    %56 = vector.broadcast %53 : vector<32x1xf32> to vector<32x64xf32>
    %57 = arith.addf %55, %56 : vector<32x64xf32>
    %58 = vector.extract_strided_slice %57 {offsets = [0, 0], sizes = [16, 64], strides = [1, 1]} : vector<32x64xf32> to vector<16x64xf32>
    %59 = vector.extract_strided_slice %57 {offsets = [16, 0], sizes = [16, 64], strides = [1, 1]} : vector<32x64xf32> to vector<16x64xf32>
    %60 = tpu.concatenate %58, %59 in 1 : vector<16x64xf32>, vector<16x64xf32> -> vector<16x128xf32>
    %cst_58 = arith.constant 0.000000e+00 : f32
    %61 = vector.broadcast %cst_58 : f32 to vector<16x128xf32>
    %62 = arith.cmpf oge, %60, %61 : vector<16x128xf32>
    %cst_59 = arith.constant 1.000000e-01 : f32
    %63 = vector.broadcast %cst_59 : f32 to vector<16x128xf32>
    %64 = arith.mulf %63, %60 : vector<16x128xf32>
    %65 = arith.select %62, %60, %64 : vector<16x128xi1>, vector<16x128xf32>
    %66 = vector.extract_strided_slice %65 {offsets = [0, 0], sizes = [16, 64], strides = [1, 1]} : vector<16x128xf32> to vector<16x64xf32>
    %c0_60 = arith.constant 0 : index
    %c32_61 = arith.constant 32 : index
    %67 = vector.load %arg4[%c0_60, %c32_61] : memref<32x512xf32, #tpu.memory_space<vmem>>, vector<16x64xf32>
    tpu.vector_store %arg4[%c0_60, %c32_61], %66 {strides = array<i32>} : memref<32x512xf32, #tpu.memory_space<vmem>>, vector<16x64xf32>,
    %68 = vector.extract_strided_slice %65 {offsets = [0, 64], sizes = [16, 64], strides = [1, 1]} : vector<16x128xf32> to vector<16x64xf32>
    %c0_62 = arith.constant 0 : index
    %c160 = arith.constant 160 : index
    %69 = vector.load %arg4[%c0_62, %c160] : memref<32x512xf32, #tpu.memory_space<vmem>>, vector<16x64xf32>
    tpu.vector_store %arg4[%c0_62, %c160], %68 {strides = array<i32>} : memref<32x512xf32, #tpu.memory_space<vmem>>, vector<16x64xf32>,
    %c0_63 = arith.constant 0 : index
    %c159 = arith.constant 159 : index
    %70 = vector.load %arg4[%c0_63, %c159] : memref<32x512xf32, #tpu.memory_space<vmem>>, vector<16x64xf32>
    %c0_64 = arith.constant 0 : index
    %c0_65 = arith.constant 0 : index
    %71 = vector.load %arg5[%c0_64, %c0_65] : memref<112x256xf32, #tpu.memory_space<vmem>>, vector<16x64xf32>
    tpu.vector_store %arg5[%c0_64, %c0_65], %70 {strides = array<i32>} : memref<112x256xf32, #tpu.memory_space<vmem>>, vector<16x64xf32>,
    %c0_66 = arith.constant 0 : index
    %c32_67 = arith.constant 32 : index
    %72 = vector.load %arg4[%c0_66, %c32_67] : memref<32x512xf32, #tpu.memory_space<vmem>>, vector<16x64xf32>
    %c16_68 = arith.constant 16 : index
    %c0_69 = arith.constant 0 : index
    %73 = vector.load %arg5[%c16_68, %c0_69] : memref<112x256xf32, #tpu.memory_space<vmem>>, vector<16x64xf32>
    tpu.vector_store %arg5[%c16_68, %c0_69], %72 {strides = array<i32>} : memref<112x256xf32, #tpu.memory_space<vmem>>, vector<16x64xf32>,
    %c0_70 = arith.constant 0 : index
    %c160_71 = arith.constant 160 : index
    %74 = vector.load %arg4[%c0_70, %c160_71] : memref<32x512xf32, #tpu.memory_space<vmem>>, vector<16x64xf32>
    %c32_72 = arith.constant 32 : index
    %c0_73 = arith.constant 0 : index
    %75 = vector.load %arg5[%c32_72, %c0_73] : memref<112x256xf32, #tpu.memory_space<vmem>>, vector<16x64xf32>
    tpu.vector_store %arg5[%c32_72, %c0_73], %74 {strides = array<i32>} : memref<112x256xf32, #tpu.memory_space<vmem>>, vector<16x64xf32>,
    %c0_74 = arith.constant 0 : index
    %c32_75 = arith.constant 32 : index
    %76 = vector.load %arg4[%c0_74, %c32_75] : memref<32x512xf32, #tpu.memory_space<vmem>>, vector<16x64xf32>
    %c0_76 = arith.constant 0 : index
    %c64_77 = arith.constant 64 : index
    %77 = vector.load %arg5[%c0_76, %c64_77] : memref<112x256xf32, #tpu.memory_space<vmem>>, vector<16x64xf32>
    tpu.vector_store %arg5[%c0_76, %c64_77], %76 {strides = array<i32>} : memref<112x256xf32, #tpu.memory_space<vmem>>, vector<16x64xf32>,
    %c0_78 = arith.constant 0 : index
    %c160_79 = arith.constant 160 : index
    %78 = vector.load %arg4[%c0_78, %c160_79] : memref<32x512xf32, #tpu.memory_space<vmem>>, vector<16x64xf32>
    %c16_80 = arith.constant 16 : index
    %c64_81 = arith.constant 64 : index
    %79 = vector.load %arg5[%c16_80, %c64_81] : memref<112x256xf32, #tpu.memory_space<vmem>>, vector<16x64xf32>
    tpu.vector_store %arg5[%c16_80, %c64_81], %78 {strides = array<i32>} : memref<112x256xf32, #tpu.memory_space<vmem>>, vector<16x64xf32>,
    %c0_82 = arith.constant 0 : index
    %c33_83 = arith.constant 33 : index
    %80 = vector.load %arg4[%c0_82, %c33_83] : memref<32x512xf32, #tpu.memory_space<vmem>>, vector<16x64xf32>
    %c32_84 = arith.constant 32 : index
    %c64_85 = arith.constant 64 : index
    %81 = vector.load %arg5[%c32_84, %c64_85] : memref<112x256xf32, #tpu.memory_space<vmem>>, vector<16x64xf32>
    tpu.vector_store %arg5[%c32_84, %c64_85], %80 {strides = array<i32>} : memref<112x256xf32, #tpu.memory_space<vmem>>, vector<16x64xf32>,
    %c160_86 = arith.constant 160 : index
    %c0_87 = arith.constant 0 : index
    %82 = vector.load %arg2[%c160_86, %c0_87] : memref<296x128xf32, #tpu.memory_space<vmem>>, vector<16x48xf32>
    %c160_88 = arith.constant 160 : index
    %c48_89 = arith.constant 48 : index
    %83 = vector.load %arg2[%c160_88, %c48_89] : memref<296x128xf32, #tpu.memory_space<vmem>>, vector<16x1xf32>
    %c0_90 = arith.constant 0 : index
    %c0_91 = arith.constant 0 : index
    %84 = vector.load %arg5[%c0_90, %c0_91] : memref<112x256xf32, #tpu.memory_space<vmem>>, vector<48x128xf32>
    %cst_92 = arith.constant dense<0.000000e+00> : vector<16x128xf32>
    %85 = tpu.matmul %82, %84, %cst_92 {dimension_numbers = #tpu.dot_dimension_numbers<[1], [0], [0], [1], [0, 0, 1, 1], [], []>} : vector<16x48xf32>, vector<48x128xf32>, vector<16x128xf32> -> vector<16x128xf32>
    %86 = vector.broadcast %83 : vector<16x1xf32> to vector<16x128xf32>
    %87 = arith.addf %85, %86 : vector<16x128xf32>
    %cst_93 = arith.constant 0.000000e+00 : f32
    %88 = vector.broadcast %cst_93 : f32 to vector<16x128xf32>
    %89 = arith.cmpf oge, %87, %88 : vector<16x128xf32>
    %cst_94 = arith.constant 1.000000e-01 : f32
    %90 = vector.broadcast %cst_94 : f32 to vector<16x128xf32>
    %91 = arith.mulf %90, %87 : vector<16x128xf32>
    %92 = arith.select %89, %87, %91 : vector<16x128xi1>, vector<16x128xf32>
    %93 = vector.extract_strided_slice %92 {offsets = [0, 0], sizes = [16, 64], strides = [1, 1]} : vector<16x128xf32> to vector<16x64xf32>
    %c0_95 = arith.constant 0 : index
    %c32_96 = arith.constant 32 : index
    %94 = vector.load %arg4[%c0_95, %c32_96] : memref<32x512xf32, #tpu.memory_space<vmem>>, vector<16x64xf32>
    tpu.vector_store %arg4[%c0_95, %c32_96], %93 {strides = array<i32>} : memref<32x512xf32, #tpu.memory_space<vmem>>, vector<16x64xf32>,
    %95 = vector.extract_strided_slice %92 {offsets = [0, 64], sizes = [16, 64], strides = [1, 1]} : vector<16x128xf32> to vector<16x64xf32>
    %c0_97 = arith.constant 0 : index
    %c160_98 = arith.constant 160 : index
    %96 = vector.load %arg4[%c0_97, %c160_98] : memref<32x512xf32, #tpu.memory_space<vmem>>, vector<16x64xf32>
    tpu.vector_store %arg4[%c0_97, %c160_98], %95 {strides = array<i32>} : memref<32x512xf32, #tpu.memory_space<vmem>>, vector<16x64xf32>,
    %c0_99 = arith.constant 0 : index
    %c159_100 = arith.constant 159 : index
    %97 = vector.load %arg4[%c0_99, %c159_100] : memref<32x512xf32, #tpu.memory_space<vmem>>, vector<16x64xf32>
    %c0_101 = arith.constant 0 : index
    %c0_102 = arith.constant 0 : index
    %98 = vector.load %arg5[%c0_101, %c0_102] : memref<112x256xf32, #tpu.memory_space<vmem>>, vector<16x64xf32>
    tpu.vector_store %arg5[%c0_101, %c0_102], %97 {strides = array<i32>} : memref<112x256xf32, #tpu.memory_space<vmem>>, vector<16x64xf32>,
    %c0_103 = arith.constant 0 : index
    %c32_104 = arith.constant 32 : index
    %99 = vector.load %arg4[%c0_103, %c32_104] : memref<32x512xf32, #tpu.memory_space<vmem>>, vector<16x64xf32>
    %c16_105 = arith.constant 16 : index
    %c0_106 = arith.constant 0 : index
    %100 = vector.load %arg5[%c16_105, %c0_106] : memref<112x256xf32, #tpu.memory_space<vmem>>, vector<16x64xf32>
    tpu.vector_store %arg5[%c16_105, %c0_106], %99 {strides = array<i32>} : memref<112x256xf32, #tpu.memory_space<vmem>>, vector<16x64xf32>,
    %c0_107 = arith.constant 0 : index
    %c160_108 = arith.constant 160 : index
    %101 = vector.load %arg4[%c0_107, %c160_108] : memref<32x512xf32, #tpu.memory_space<vmem>>, vector<16x64xf32>
    %c32_109 = arith.constant 32 : index
    %c0_110 = arith.constant 0 : index
    %102 = vector.load %arg5[%c32_109, %c0_110] : memref<112x256xf32, #tpu.memory_space<vmem>>, vector<16x64xf32>
    tpu.vector_store %arg5[%c32_109, %c0_110], %101 {strides = array<i32>} : memref<112x256xf32, #tpu.memory_space<vmem>>, vector<16x64xf32>,
    %c0_111 = arith.constant 0 : index
    %c32_112 = arith.constant 32 : index
    %103 = vector.load %arg4[%c0_111, %c32_112] : memref<32x512xf32, #tpu.memory_space<vmem>>, vector<16x64xf32>
    %c0_113 = arith.constant 0 : index
    %c64_114 = arith.constant 64 : index
    %104 = vector.load %arg5[%c0_113, %c64_114] : memref<112x256xf32, #tpu.memory_space<vmem>>, vector<16x64xf32>
    tpu.vector_store %arg5[%c0_113, %c64_114], %103 {strides = array<i32>} : memref<112x256xf32, #tpu.memory_space<vmem>>, vector<16x64xf32>,
    %c0_115 = arith.constant 0 : index
    %c160_116 = arith.constant 160 : index
    %105 = vector.load %arg4[%c0_115, %c160_116] : memref<32x512xf32, #tpu.memory_space<vmem>>, vector<16x64xf32>
    %c16_117 = arith.constant 16 : index
    %c64_118 = arith.constant 64 : index
    %106 = vector.load %arg5[%c16_117, %c64_118] : memref<112x256xf32, #tpu.memory_space<vmem>>, vector<16x64xf32>
    tpu.vector_store %arg5[%c16_117, %c64_118], %105 {strides = array<i32>} : memref<112x256xf32, #tpu.memory_space<vmem>>, vector<16x64xf32>,
    %c0_119 = arith.constant 0 : index
    %c33_120 = arith.constant 33 : index
    %107 = vector.load %arg4[%c0_119, %c33_120] : memref<32x512xf32, #tpu.memory_space<vmem>>, vector<16x64xf32>
    %c32_121 = arith.constant 32 : index
    %c64_122 = arith.constant 64 : index
    %108 = vector.load %arg5[%c32_121, %c64_122] : memref<112x256xf32, #tpu.memory_space<vmem>>, vector<16x64xf32>
    tpu.vector_store %arg5[%c32_121, %c64_122], %107 {strides = array<i32>} : memref<112x256xf32, #tpu.memory_space<vmem>>, vector<16x64xf32>,
    %c176 = arith.constant 176 : index
    %c0_123 = arith.constant 0 : index
    %109 = vector.load %arg2[%c176, %c0_123] : memref<296x128xf32, #tpu.memory_space<vmem>>, vector<16x48xf32>
    %c176_124 = arith.constant 176 : index
    %c48_125 = arith.constant 48 : index
    %110 = vector.load %arg2[%c176_124, %c48_125] : memref<296x128xf32, #tpu.memory_space<vmem>>, vector<16x1xf32>
    %c0_126 = arith.constant 0 : index
    %c0_127 = arith.constant 0 : index
    %111 = vector.load %arg5[%c0_126, %c0_127] : memref<112x256xf32, #tpu.memory_space<vmem>>, vector<48x128xf32>
    %cst_128 = arith.constant dense<0.000000e+00> : vector<16x128xf32>
    %112 = tpu.matmul %109, %111, %cst_128 {dimension_numbers = #tpu.dot_dimension_numbers<[1], [0], [0], [1], [0, 0, 1, 1], [], []>} : vector<16x48xf32>, vector<48x128xf32>, vector<16x128xf32> -> vector<16x128xf32>
    %113 = vector.broadcast %110 : vector<16x1xf32> to vector<16x128xf32>
    %114 = arith.addf %112, %113 : vector<16x128xf32>
    %115 = arith.addf %60, %114 : vector<16x128xf32>
    %cst_129 = arith.constant 0.000000e+00 : f32
    %116 = vector.broadcast %cst_129 : f32 to vector<16x128xf32>
    %117 = arith.cmpf oge, %115, %116 : vector<16x128xf32>
    %cst_130 = arith.constant 1.000000e-01 : f32
    %118 = vector.broadcast %cst_130 : f32 to vector<16x128xf32>
    %119 = arith.mulf %118, %115 : vector<16x128xf32>
    %120 = arith.select %117, %115, %119 : vector<16x128xi1>, vector<16x128xf32>
    %121 = vector.extract_strided_slice %120 {offsets = [0, 0], sizes = [16, 64], strides = [1, 1]} : vector<16x128xf32> to vector<16x64xf32>
    %c0_131 = arith.constant 0 : index
    %c32_132 = arith.constant 32 : index
    %122 = vector.load %arg4[%c0_131, %c32_132] : memref<32x512xf32, #tpu.memory_space<vmem>>, vector<16x64xf32>
    tpu.vector_store %arg4[%c0_131, %c32_132], %121 {strides = array<i32>} : memref<32x512xf32, #tpu.memory_space<vmem>>, vector<16x64xf32>,
    %123 = vector.extract_strided_slice %120 {offsets = [0, 64], sizes = [16, 64], strides = [1, 1]} : vector<16x128xf32> to vector<16x64xf32>
    %c0_133 = arith.constant 0 : index
    %c160_134 = arith.constant 160 : index
    %124 = vector.load %arg4[%c0_133, %c160_134] : memref<32x512xf32, #tpu.memory_space<vmem>>, vector<16x64xf32>
    tpu.vector_store %arg4[%c0_133, %c160_134], %123 {strides = array<i32>} : memref<32x512xf32, #tpu.memory_space<vmem>>, vector<16x64xf32>,
    %c0_135 = arith.constant 0 : index
    %c158 = arith.constant 158 : index
    %125 = vector.load %arg4[%c0_135, %c158] : memref<32x512xf32, #tpu.memory_space<vmem>>, vector<16x64xf32>
    %c0_136 = arith.constant 0 : index
    %c0_137 = arith.constant 0 : index
    %126 = vector.load %arg5[%c0_136, %c0_137] : memref<112x256xf32, #tpu.memory_space<vmem>>, vector<16x64xf32>
    tpu.vector_store %arg5[%c0_136, %c0_137], %125 {strides = array<i32>} : memref<112x256xf32, #tpu.memory_space<vmem>>, vector<16x64xf32>,
    %c0_138 = arith.constant 0 : index
    %c32_139 = arith.constant 32 : index
    %127 = vector.load %arg4[%c0_138, %c32_139] : memref<32x512xf32, #tpu.memory_space<vmem>>, vector<16x64xf32>
    %c16_140 = arith.constant 16 : index
    %c0_141 = arith.constant 0 : index
    %128 = vector.load %arg5[%c16_140, %c0_141] : memref<112x256xf32, #tpu.memory_space<vmem>>, vector<16x64xf32>
    tpu.vector_store %arg5[%c16_140, %c0_141], %127 {strides = array<i32>} : memref<112x256xf32, #tpu.memory_space<vmem>>, vector<16x64xf32>,
    %c0_142 = arith.constant 0 : index
    %c161 = arith.constant 161 : index
    %129 = vector.load %arg4[%c0_142, %c161] : memref<32x512xf32, #tpu.memory_space<vmem>>, vector<16x64xf32>
    %c32_143 = arith.constant 32 : index
    %c0_144 = arith.constant 0 : index
    %130 = vector.load %arg5[%c32_143, %c0_144] : memref<112x256xf32, #tpu.memory_space<vmem>>, vector<16x64xf32>
    tpu.vector_store %arg5[%c32_143, %c0_144], %129 {strides = array<i32>} : memref<112x256xf32, #tpu.memory_space<vmem>>, vector<16x64xf32>,
    %c0_145 = arith.constant 0 : index
    %c31_146 = arith.constant 31 : index
    %131 = vector.load %arg4[%c0_145, %c31_146] : memref<32x512xf32, #tpu.memory_space<vmem>>, vector<16x64xf32>
    %c0_147 = arith.constant 0 : index
    %c64_148 = arith.constant 64 : index
    %132 = vector.load %arg5[%c0_147, %c64_148] : memref<112x256xf32, #tpu.memory_space<vmem>>, vector<16x64xf32>
    tpu.vector_store %arg5[%c0_147, %c64_148], %131 {strides = array<i32>} : memref<112x256xf32, #tpu.memory_space<vmem>>, vector<16x64xf32>,
    %c0_149 = arith.constant 0 : index
    %c160_150 = arith.constant 160 : index
    %133 = vector.load %arg4[%c0_149, %c160_150] : memref<32x512xf32, #tpu.memory_space<vmem>>, vector<16x64xf32>
    %c16_151 = arith.constant 16 : index
    %c64_152 = arith.constant 64 : index
    %134 = vector.load %arg5[%c16_151, %c64_152] : memref<112x256xf32, #tpu.memory_space<vmem>>, vector<16x64xf32>
    tpu.vector_store %arg5[%c16_151, %c64_152], %133 {strides = array<i32>} : memref<112x256xf32, #tpu.memory_space<vmem>>, vector<16x64xf32>,
    %c0_153 = arith.constant 0 : index
    %c34_154 = arith.constant 34 : index
    %135 = vector.load %arg4[%c0_153, %c34_154] : memref<32x512xf32, #tpu.memory_space<vmem>>, vector<16x64xf32>
    %c32_155 = arith.constant 32 : index
    %c64_156 = arith.constant 64 : index
    %136 = vector.load %arg5[%c32_155, %c64_156] : memref<112x256xf32, #tpu.memory_space<vmem>>, vector<16x64xf32>
    tpu.vector_store %arg5[%c32_155, %c64_156], %135 {strides = array<i32>} : memref<112x256xf32, #tpu.memory_space<vmem>>, vector<16x64xf32>,
    %c192 = arith.constant 192 : index
    %c0_157 = arith.constant 0 : index
    %137 = vector.load %arg2[%c192, %c0_157] : memref<296x128xf32, #tpu.memory_space<vmem>>, vector<16x48xf32>
    %c192_158 = arith.constant 192 : index
    %c48_159 = arith.constant 48 : index
    %138 = vector.load %arg2[%c192_158, %c48_159] : memref<296x128xf32, #tpu.memory_space<vmem>>, vector<16x1xf32>
    %c0_160 = arith.constant 0 : index
    %c0_161 = arith.constant 0 : index
    %139 = vector.load %arg5[%c0_160, %c0_161] : memref<112x256xf32, #tpu.memory_space<vmem>>, vector<48x128xf32>
    %cst_162 = arith.constant dense<0.000000e+00> : vector<16x128xf32>
    %140 = tpu.matmul %137, %139, %cst_162 {dimension_numbers = #tpu.dot_dimension_numbers<[1], [0], [0], [1], [0, 0, 1, 1], [], []>} : vector<16x48xf32>, vector<48x128xf32>, vector<16x128xf32> -> vector<16x128xf32>
    %141 = vector.broadcast %138 : vector<16x1xf32> to vector<16x128xf32>
    %142 = arith.addf %140, %141 : vector<16x128xf32>
    %cst_163 = arith.constant 0.000000e+00 : f32
    %143 = vector.broadcast %cst_163 : f32 to vector<16x128xf32>
    %144 = arith.cmpf oge, %142, %143 : vector<16x128xf32>
    %cst_164 = arith.constant 1.000000e-01 : f32
    %145 = vector.broadcast %cst_164 : f32 to vector<16x128xf32>
    %146 = arith.mulf %145, %142 : vector<16x128xf32>
    %147 = arith.select %144, %142, %146 : vector<16x128xi1>, vector<16x128xf32>
    %148 = vector.extract_strided_slice %147 {offsets = [0, 0], sizes = [16, 64], strides = [1, 1]} : vector<16x128xf32> to vector<16x64xf32>
    %c0_165 = arith.constant 0 : index
    %c32_166 = arith.constant 32 : index
    %149 = vector.load %arg4[%c0_165, %c32_166] : memref<32x512xf32, #tpu.memory_space<vmem>>, vector<16x64xf32>
    tpu.vector_store %arg4[%c0_165, %c32_166], %148 {strides = array<i32>} : memref<32x512xf32, #tpu.memory_space<vmem>>, vector<16x64xf32>,
    %150 = vector.extract_strided_slice %147 {offsets = [0, 64], sizes = [16, 64], strides = [1, 1]} : vector<16x128xf32> to vector<16x64xf32>
    %c0_167 = arith.constant 0 : index
    %c160_168 = arith.constant 160 : index
    %151 = vector.load %arg4[%c0_167, %c160_168] : memref<32x512xf32, #tpu.memory_space<vmem>>, vector<16x64xf32>
    tpu.vector_store %arg4[%c0_167, %c160_168], %150 {strides = array<i32>} : memref<32x512xf32, #tpu.memory_space<vmem>>, vector<16x64xf32>,
    %c0_169 = arith.constant 0 : index
    %c159_170 = arith.constant 159 : index
    %152 = vector.load %arg4[%c0_169, %c159_170] : memref<32x512xf32, #tpu.memory_space<vmem>>, vector<16x64xf32>
    %c0_171 = arith.constant 0 : index
    %c0_172 = arith.constant 0 : index
    %153 = vector.load %arg5[%c0_171, %c0_172] : memref<112x256xf32, #tpu.memory_space<vmem>>, vector<16x64xf32>
    tpu.vector_store %arg5[%c0_171, %c0_172], %152 {strides = array<i32>} : memref<112x256xf32, #tpu.memory_space<vmem>>, vector<16x64xf32>,
    %c0_173 = arith.constant 0 : index
    %c32_174 = arith.constant 32 : index
    %154 = vector.load %arg4[%c0_173, %c32_174] : memref<32x512xf32, #tpu.memory_space<vmem>>, vector<16x64xf32>
    %c16_175 = arith.constant 16 : index
    %c0_176 = arith.constant 0 : index
    %155 = vector.load %arg5[%c16_175, %c0_176] : memref<112x256xf32, #tpu.memory_space<vmem>>, vector<16x64xf32>
    tpu.vector_store %arg5[%c16_175, %c0_176], %154 {strides = array<i32>} : memref<112x256xf32, #tpu.memory_space<vmem>>, vector<16x64xf32>,
    %c0_177 = arith.constant 0 : index
    %c160_178 = arith.constant 160 : index
    %156 = vector.load %arg4[%c0_177, %c160_178] : memref<32x512xf32, #tpu.memory_space<vmem>>, vector<16x64xf32>
    %c32_179 = arith.constant 32 : index
    %c0_180 = arith.constant 0 : index
    %157 = vector.load %arg5[%c32_179, %c0_180] : memref<112x256xf32, #tpu.memory_space<vmem>>, vector<16x64xf32>
    tpu.vector_store %arg5[%c32_179, %c0_180], %156 {strides = array<i32>} : memref<112x256xf32, #tpu.memory_space<vmem>>, vector<16x64xf32>,
    %c0_181 = arith.constant 0 : index
    %c32_182 = arith.constant 32 : index
    %158 = vector.load %arg4[%c0_181, %c32_182] : memref<32x512xf32, #tpu.memory_space<vmem>>, vector<16x64xf32>
    %c0_183 = arith.constant 0 : index
    %c64_184 = arith.constant 64 : index
    %159 = vector.load %arg5[%c0_183, %c64_184] : memref<112x256xf32, #tpu.memory_space<vmem>>, vector<16x64xf32>
    tpu.vector_store %arg5[%c0_183, %c64_184], %158 {strides = array<i32>} : memref<112x256xf32, #tpu.memory_space<vmem>>, vector<16x64xf32>,
    %c0_185 = arith.constant 0 : index
    %c160_186 = arith.constant 160 : index
    %160 = vector.load %arg4[%c0_185, %c160_186] : memref<32x512xf32, #tpu.memory_space<vmem>>, vector<16x64xf32>
    %c16_187 = arith.constant 16 : index
    %c64_188 = arith.constant 64 : index
    %161 = vector.load %arg5[%c16_187, %c64_188] : memref<112x256xf32, #tpu.memory_space<vmem>>, vector<16x64xf32>
    tpu.vector_store %arg5[%c16_187, %c64_188], %160 {strides = array<i32>} : memref<112x256xf32, #tpu.memory_space<vmem>>, vector<16x64xf32>,
    %c0_189 = arith.constant 0 : index
    %c33_190 = arith.constant 33 : index
    %162 = vector.load %arg4[%c0_189, %c33_190] : memref<32x512xf32, #tpu.memory_space<vmem>>, vector<16x64xf32>
    %c32_191 = arith.constant 32 : index
    %c64_192 = arith.constant 64 : index
    %163 = vector.load %arg5[%c32_191, %c64_192] : memref<112x256xf32, #tpu.memory_space<vmem>>, vector<16x64xf32>
    tpu.vector_store %arg5[%c32_191, %c64_192], %162 {strides = array<i32>} : memref<112x256xf32, #tpu.memory_space<vmem>>, vector<16x64xf32>,
    %c208 = arith.constant 208 : index
    %c0_193 = arith.constant 0 : index
    %164 = vector.load %arg2[%c208, %c0_193] : memref<296x128xf32, #tpu.memory_space<vmem>>, vector<16x48xf32>
    %c208_194 = arith.constant 208 : index
    %c48_195 = arith.constant 48 : index
    %165 = vector.load %arg2[%c208_194, %c48_195] : memref<296x128xf32, #tpu.memory_space<vmem>>, vector<16x1xf32>
    %c0_196 = arith.constant 0 : index
    %c0_197 = arith.constant 0 : index
    %166 = vector.load %arg5[%c0_196, %c0_197] : memref<112x256xf32, #tpu.memory_space<vmem>>, vector<48x128xf32>
    %cst_198 = arith.constant dense<0.000000e+00> : vector<16x128xf32>
    %167 = tpu.matmul %164, %166, %cst_198 {dimension_numbers = #tpu.dot_dimension_numbers<[1], [0], [0], [1], [0, 0, 1, 1], [], []>} : vector<16x48xf32>, vector<48x128xf32>, vector<16x128xf32> -> vector<16x128xf32>
    %168 = vector.broadcast %165 : vector<16x1xf32> to vector<16x128xf32>
    %169 = arith.addf %167, %168 : vector<16x128xf32>
    %170 = arith.addf %115, %169 : vector<16x128xf32>
    %cst_199 = arith.constant 0.000000e+00 : f32
    %171 = vector.broadcast %cst_199 : f32 to vector<16x128xf32>
    %172 = arith.cmpf oge, %170, %171 : vector<16x128xf32>
    %cst_200 = arith.constant 1.000000e-01 : f32
    %173 = vector.broadcast %cst_200 : f32 to vector<16x128xf32>
    %174 = arith.mulf %173, %170 : vector<16x128xf32>
    %175 = arith.select %172, %170, %174 : vector<16x128xi1>, vector<16x128xf32>
    %176 = vector.extract_strided_slice %175 {offsets = [0, 0], sizes = [16, 64], strides = [1, 1]} : vector<16x128xf32> to vector<16x64xf32>
    %c0_201 = arith.constant 0 : index
    %c32_202 = arith.constant 32 : index
    %177 = vector.load %arg4[%c0_201, %c32_202] : memref<32x512xf32, #tpu.memory_space<vmem>>, vector<16x64xf32>
    tpu.vector_store %arg4[%c0_201, %c32_202], %176 {strides = array<i32>} : memref<32x512xf32, #tpu.memory_space<vmem>>, vector<16x64xf32>,
    %178 = vector.extract_strided_slice %175 {offsets = [0, 64], sizes = [16, 64], strides = [1, 1]} : vector<16x128xf32> to vector<16x64xf32>
    %c0_203 = arith.constant 0 : index
    %c160_204 = arith.constant 160 : index
    %179 = vector.load %arg4[%c0_203, %c160_204] : memref<32x512xf32, #tpu.memory_space<vmem>>, vector<16x64xf32>
    tpu.vector_store %arg4[%c0_203, %c160_204], %178 {strides = array<i32>} : memref<32x512xf32, #tpu.memory_space<vmem>>, vector<16x64xf32>,
    %c0_205 = arith.constant 0 : index
    %c159_206 = arith.constant 159 : index
    %180 = vector.load %arg4[%c0_205, %c159_206] : memref<32x512xf32, #tpu.memory_space<vmem>>, vector<16x64xf32>
    %c0_207 = arith.constant 0 : index
    %c0_208 = arith.constant 0 : index
    %181 = vector.load %arg5[%c0_207, %c0_208] : memref<112x256xf32, #tpu.memory_space<vmem>>, vector<16x64xf32>
    tpu.vector_store %arg5[%c0_207, %c0_208], %180 {strides = array<i32>} : memref<112x256xf32, #tpu.memory_space<vmem>>, vector<16x64xf32>,
    %c0_209 = arith.constant 0 : index
    %c32_210 = arith.constant 32 : index
    %182 = vector.load %arg4[%c0_209, %c32_210] : memref<32x512xf32, #tpu.memory_space<vmem>>, vector<16x64xf32>
    %c16_211 = arith.constant 16 : index
    %c0_212 = arith.constant 0 : index
    %183 = vector.load %arg5[%c16_211, %c0_212] : memref<112x256xf32, #tpu.memory_space<vmem>>, vector<16x64xf32>
    tpu.vector_store %arg5[%c16_211, %c0_212], %182 {strides = array<i32>} : memref<112x256xf32, #tpu.memory_space<vmem>>, vector<16x64xf32>,
    %c0_213 = arith.constant 0 : index
    %c160_214 = arith.constant 160 : index
    %184 = vector.load %arg4[%c0_213, %c160_214] : memref<32x512xf32, #tpu.memory_space<vmem>>, vector<16x64xf32>
    %c32_215 = arith.constant 32 : index
    %c0_216 = arith.constant 0 : index
    %185 = vector.load %arg5[%c32_215, %c0_216] : memref<112x256xf32, #tpu.memory_space<vmem>>, vector<16x64xf32>
    tpu.vector_store %arg5[%c32_215, %c0_216], %184 {strides = array<i32>} : memref<112x256xf32, #tpu.memory_space<vmem>>, vector<16x64xf32>,
    %c0_217 = arith.constant 0 : index
    %c33_218 = arith.constant 33 : index
    %186 = vector.load %arg4[%c0_217, %c33_218] : memref<32x512xf32, #tpu.memory_space<vmem>>, vector<16x64xf32>
    %c48_219 = arith.constant 48 : index
    %c0_220 = arith.constant 0 : index
    %187 = vector.load %arg5[%c48_219, %c0_220] : memref<112x256xf32, #tpu.memory_space<vmem>>, vector<16x64xf32>
    tpu.vector_store %arg5[%c48_219, %c0_220], %186 {strides = array<i32>} : memref<112x256xf32, #tpu.memory_space<vmem>>, vector<16x64xf32>,
    %c224 = arith.constant 224 : index
    %c0_221 = arith.constant 0 : index
    %188 = vector.load %arg2[%c224, %c0_221] : memref<296x128xf32, #tpu.memory_space<vmem>>, vector<32x64xf32>
    %c224_222 = arith.constant 224 : index
    %c64_223 = arith.constant 64 : index
    %189 = vector.load %arg2[%c224_222, %c64_223] : memref<296x128xf32, #tpu.memory_space<vmem>>, vector<32x1xf32>
    %c0_224 = arith.constant 0 : index
    %c0_225 = arith.constant 0 : index
    %190 = vector.load %arg5[%c0_224, %c0_225] : memref<112x256xf32, #tpu.memory_space<vmem>>, vector<64x64xf32>
    %cst_226 = arith.constant dense<0.000000e+00> : vector<32x64xf32>
    %191 = tpu.matmul %188, %190, %cst_226 {dimension_numbers = #tpu.dot_dimension_numbers<[1], [0], [0], [1], [0, 0, 1, 1], [], []>} : vector<32x64xf32>, vector<64x64xf32>, vector<32x64xf32> -> vector<32x64xf32>
    %192 = vector.broadcast %189 : vector<32x1xf32> to vector<32x64xf32>
    %193 = arith.addf %191, %192 : vector<32x64xf32>
    %194 = vector.extract_strided_slice %193 {offsets = [0, 0], sizes = [8, 64], strides = [1, 1]} : vector<32x64xf32> to vector<8x64xf32>
    %195 = vector.extract_strided_slice %193 {offsets = [8, 0], sizes = [8, 64], strides = [1, 1]} : vector<32x64xf32> to vector<8x64xf32>
    %196 = vector.extract_strided_slice %193 {offsets = [16, 0], sizes = [8, 64], strides = [1, 1]} : vector<32x64xf32> to vector<8x64xf32>
    %197 = vector.extract_strided_slice %193 {offsets = [24, 0], sizes = [8, 64], strides = [1, 1]} : vector<32x64xf32> to vector<8x64xf32>
    %198 = tpu.concatenate %194, %195, %196, %197 in 1 : vector<8x64xf32>, vector<8x64xf32>, vector<8x64xf32>, vector<8x64xf32> -> vector<8x256xf32>
    %cst_227 = arith.constant 0.000000e+00 : f32
    %199 = vector.broadcast %cst_227 : f32 to vector<8x256xf32>
    %200 = arith.cmpf oge, %198, %199 : vector<8x256xf32>
    %cst_228 = arith.constant 1.000000e-01 : f32
    %201 = vector.broadcast %cst_228 : f32 to vector<8x256xf32>
    %202 = arith.mulf %201, %198 : vector<8x256xf32>
    %203 = arith.select %200, %198, %202 : vector<8x256xi1>, vector<8x256xf32>
    %204 = vector.extract_strided_slice %203 {offsets = [0, 0], sizes = [8, 64], strides = [1, 1]} : vector<8x256xf32> to vector<8x64xf32>
    %c0_229 = arith.constant 0 : index
    %c32_230 = arith.constant 32 : index
    %205 = vector.load %arg4[%c0_229, %c32_230] : memref<32x512xf32, #tpu.memory_space<vmem>>, vector<8x64xf32>
    tpu.vector_store %arg4[%c0_229, %c32_230], %204 {strides = array<i32>} : memref<32x512xf32, #tpu.memory_space<vmem>>, vector<8x64xf32>,
    %206 = vector.extract_strided_slice %203 {offsets = [0, 64], sizes = [8, 64], strides = [1, 1]} : vector<8x256xf32> to vector<8x64xf32>
    %c0_231 = arith.constant 0 : index
    %c160_232 = arith.constant 160 : index
    %207 = vector.load %arg4[%c0_231, %c160_232] : memref<32x512xf32, #tpu.memory_space<vmem>>, vector<8x64xf32>
    tpu.vector_store %arg4[%c0_231, %c160_232], %206 {strides = array<i32>} : memref<32x512xf32, #tpu.memory_space<vmem>>, vector<8x64xf32>,
    %208 = vector.extract_strided_slice %203 {offsets = [0, 128], sizes = [8, 64], strides = [1, 1]} : vector<8x256xf32> to vector<8x64xf32>
    %c0_233 = arith.constant 0 : index
    %c288 = arith.constant 288 : index
    %209 = vector.load %arg4[%c0_233, %c288] : memref<32x512xf32, #tpu.memory_space<vmem>>, vector<8x64xf32>
    tpu.vector_store %arg4[%c0_233, %c288], %208 {strides = array<i32>} : memref<32x512xf32, #tpu.memory_space<vmem>>, vector<8x64xf32>,
    %210 = vector.extract_strided_slice %203 {offsets = [0, 192], sizes = [8, 64], strides = [1, 1]} : vector<8x256xf32> to vector<8x64xf32>
    %c0_234 = arith.constant 0 : index
    %c416 = arith.constant 416 : index
    %211 = vector.load %arg4[%c0_234, %c416] : memref<32x512xf32, #tpu.memory_space<vmem>>, vector<8x64xf32>
    tpu.vector_store %arg4[%c0_234, %c416], %210 {strides = array<i32>} : memref<32x512xf32, #tpu.memory_space<vmem>>, vector<8x64xf32>,
    %c0_235 = arith.constant 0 : index
    %c415 = arith.constant 415 : index
    %212 = vector.load %arg4[%c0_235, %c415] : memref<32x512xf32, #tpu.memory_space<vmem>>, vector<8x64xf32>
    %c0_236 = arith.constant 0 : index
    %c0_237 = arith.constant 0 : index
    %213 = vector.load %arg5[%c0_236, %c0_237] : memref<112x256xf32, #tpu.memory_space<vmem>>, vector<8x64xf32>
    tpu.vector_store %arg5[%c0_236, %c0_237], %212 {strides = array<i32>} : memref<112x256xf32, #tpu.memory_space<vmem>>, vector<8x64xf32>,
    %c0_238 = arith.constant 0 : index
    %c32_239 = arith.constant 32 : index
    %214 = vector.load %arg4[%c0_238, %c32_239] : memref<32x512xf32, #tpu.memory_space<vmem>>, vector<8x64xf32>
    %c8 = arith.constant 8 : index
    %c0_240 = arith.constant 0 : index
    %215 = vector.load %arg5[%c8, %c0_240] : memref<112x256xf32, #tpu.memory_space<vmem>>, vector<8x64xf32>
    tpu.vector_store %arg5[%c8, %c0_240], %214 {strides = array<i32>} : memref<112x256xf32, #tpu.memory_space<vmem>>, vector<8x64xf32>,
    %c0_241 = arith.constant 0 : index
    %c160_242 = arith.constant 160 : index
    %216 = vector.load %arg4[%c0_241, %c160_242] : memref<32x512xf32, #tpu.memory_space<vmem>>, vector<8x64xf32>
    %c16_243 = arith.constant 16 : index
    %c0_244 = arith.constant 0 : index
    %217 = vector.load %arg5[%c16_243, %c0_244] : memref<112x256xf32, #tpu.memory_space<vmem>>, vector<8x64xf32>
    tpu.vector_store %arg5[%c16_243, %c0_244], %216 {strides = array<i32>} : memref<112x256xf32, #tpu.memory_space<vmem>>, vector<8x64xf32>,
    %c0_245 = arith.constant 0 : index
    %c32_246 = arith.constant 32 : index
    %218 = vector.load %arg4[%c0_245, %c32_246] : memref<32x512xf32, #tpu.memory_space<vmem>>, vector<8x64xf32>
    %c0_247 = arith.constant 0 : index
    %c64_248 = arith.constant 64 : index
    %219 = vector.load %arg5[%c0_247, %c64_248] : memref<112x256xf32, #tpu.memory_space<vmem>>, vector<8x64xf32>
    tpu.vector_store %arg5[%c0_247, %c64_248], %218 {strides = array<i32>} : memref<112x256xf32, #tpu.memory_space<vmem>>, vector<8x64xf32>,
    %c0_249 = arith.constant 0 : index
    %c160_250 = arith.constant 160 : index
    %220 = vector.load %arg4[%c0_249, %c160_250] : memref<32x512xf32, #tpu.memory_space<vmem>>, vector<8x64xf32>
    %c8_251 = arith.constant 8 : index
    %c64_252 = arith.constant 64 : index
    %221 = vector.load %arg5[%c8_251, %c64_252] : memref<112x256xf32, #tpu.memory_space<vmem>>, vector<8x64xf32>
    tpu.vector_store %arg5[%c8_251, %c64_252], %220 {strides = array<i32>} : memref<112x256xf32, #tpu.memory_space<vmem>>, vector<8x64xf32>,
    %c0_253 = arith.constant 0 : index
    %c288_254 = arith.constant 288 : index
    %222 = vector.load %arg4[%c0_253, %c288_254] : memref<32x512xf32, #tpu.memory_space<vmem>>, vector<8x64xf32>
    %c16_255 = arith.constant 16 : index
    %c64_256 = arith.constant 64 : index
    %223 = vector.load %arg5[%c16_255, %c64_256] : memref<112x256xf32, #tpu.memory_space<vmem>>, vector<8x64xf32>
    tpu.vector_store %arg5[%c16_255, %c64_256], %222 {strides = array<i32>} : memref<112x256xf32, #tpu.memory_space<vmem>>, vector<8x64xf32>,
    %c0_257 = arith.constant 0 : index
    %c160_258 = arith.constant 160 : index
    %224 = vector.load %arg4[%c0_257, %c160_258] : memref<32x512xf32, #tpu.memory_space<vmem>>, vector<8x64xf32>
    %c0_259 = arith.constant 0 : index
    %c128_260 = arith.constant 128 : index
    %225 = vector.load %arg5[%c0_259, %c128_260] : memref<112x256xf32, #tpu.memory_space<vmem>>, vector<8x64xf32>
    tpu.vector_store %arg5[%c0_259, %c128_260], %224 {strides = array<i32>} : memref<112x256xf32, #tpu.memory_space<vmem>>, vector<8x64xf32>,
    %c0_261 = arith.constant 0 : index
    %c288_262 = arith.constant 288 : index
    %226 = vector.load %arg4[%c0_261, %c288_262] : memref<32x512xf32, #tpu.memory_space<vmem>>, vector<8x64xf32>
    %c8_263 = arith.constant 8 : index
    %c128_264 = arith.constant 128 : index
    %227 = vector.load %arg5[%c8_263, %c128_264] : memref<112x256xf32, #tpu.memory_space<vmem>>, vector<8x64xf32>
    tpu.vector_store %arg5[%c8_263, %c128_264], %226 {strides = array<i32>} : memref<112x256xf32, #tpu.memory_space<vmem>>, vector<8x64xf32>,
    %c0_265 = arith.constant 0 : index
    %c416_266 = arith.constant 416 : index
    %228 = vector.load %arg4[%c0_265, %c416_266] : memref<32x512xf32, #tpu.memory_space<vmem>>, vector<8x64xf32>
    %c16_267 = arith.constant 16 : index
    %c128_268 = arith.constant 128 : index
    %229 = vector.load %arg5[%c16_267, %c128_268] : memref<112x256xf32, #tpu.memory_space<vmem>>, vector<8x64xf32>
    tpu.vector_store %arg5[%c16_267, %c128_268], %228 {strides = array<i32>} : memref<112x256xf32, #tpu.memory_space<vmem>>, vector<8x64xf32>,
    %c0_269 = arith.constant 0 : index
    %c288_270 = arith.constant 288 : index
    %230 = vector.load %arg4[%c0_269, %c288_270] : memref<32x512xf32, #tpu.memory_space<vmem>>, vector<8x64xf32>
    %c0_271 = arith.constant 0 : index
    %c192_272 = arith.constant 192 : index
    %231 = vector.load %arg5[%c0_271, %c192_272] : memref<112x256xf32, #tpu.memory_space<vmem>>, vector<8x64xf32>
    tpu.vector_store %arg5[%c0_271, %c192_272], %230 {strides = array<i32>} : memref<112x256xf32, #tpu.memory_space<vmem>>, vector<8x64xf32>,
    %c0_273 = arith.constant 0 : index
    %c416_274 = arith.constant 416 : index
    %232 = vector.load %arg4[%c0_273, %c416_274] : memref<32x512xf32, #tpu.memory_space<vmem>>, vector<8x64xf32>
    %c8_275 = arith.constant 8 : index
    %c192_276 = arith.constant 192 : index
    %233 = vector.load %arg5[%c8_275, %c192_276] : memref<112x256xf32, #tpu.memory_space<vmem>>, vector<8x64xf32>
    tpu.vector_store %arg5[%c8_275, %c192_276], %232 {strides = array<i32>} : memref<112x256xf32, #tpu.memory_space<vmem>>, vector<8x64xf32>,
    %c0_277 = arith.constant 0 : index
    %c33_278 = arith.constant 33 : index
    %234 = vector.load %arg4[%c0_277, %c33_278] : memref<32x512xf32, #tpu.memory_space<vmem>>, vector<8x64xf32>
    %c16_279 = arith.constant 16 : index
    %c192_280 = arith.constant 192 : index
    %235 = vector.load %arg5[%c16_279, %c192_280] : memref<112x256xf32, #tpu.memory_space<vmem>>, vector<8x64xf32>
    tpu.vector_store %arg5[%c16_279, %c192_280], %234 {strides = array<i32>} : memref<112x256xf32, #tpu.memory_space<vmem>>, vector<8x64xf32>,
    %c256 = arith.constant 256 : index
    %c0_281 = arith.constant 0 : index
    %236 = vector.load %arg2[%c256, %c0_281] : memref<296x128xf32, #tpu.memory_space<vmem>>, vector<8x24xf32>
    %c256_282 = arith.constant 256 : index
    %c24 = arith.constant 24 : index
    %237 = vector.load %arg2[%c256_282, %c24] : memref<296x128xf32, #tpu.memory_space<vmem>>, vector<8x1xf32>
    %c0_283 = arith.constant 0 : index
    %c0_284 = arith.constant 0 : index
    %238 = vector.load %arg5[%c0_283, %c0_284] : memref<112x256xf32, #tpu.memory_space<vmem>>, vector<24x256xf32>
    %cst_285 = arith.constant dense<0.000000e+00> : vector<8x256xf32>
    %239 = tpu.matmul %236, %238, %cst_285 {dimension_numbers = #tpu.dot_dimension_numbers<[1], [0], [0], [1], [0, 0, 1, 1], [], []>} : vector<8x24xf32>, vector<24x256xf32>, vector<8x256xf32> -> vector<8x256xf32>
    %240 = vector.broadcast %237 : vector<8x1xf32> to vector<8x256xf32>
    %241 = arith.addf %239, %240 : vector<8x256xf32>
    %cst_286 = arith.constant 0.000000e+00 : f32
    %242 = vector.broadcast %cst_286 : f32 to vector<8x256xf32>
    %243 = arith.cmpf oge, %241, %242 : vector<8x256xf32>
    %cst_287 = arith.constant 1.000000e-01 : f32
    %244 = vector.broadcast %cst_287 : f32 to vector<8x256xf32>
    %245 = arith.mulf %244, %241 : vector<8x256xf32>
    %246 = arith.select %243, %241, %245 : vector<8x256xi1>, vector<8x256xf32>
    %247 = vector.extract_strided_slice %246 {offsets = [0, 0], sizes = [8, 64], strides = [1, 1]} : vector<8x256xf32> to vector<8x64xf32>
    %c0_288 = arith.constant 0 : index
    %c32_289 = arith.constant 32 : index
    %248 = vector.load %arg4[%c0_288, %c32_289] : memref<32x512xf32, #tpu.memory_space<vmem>>, vector<8x64xf32>
    tpu.vector_store %arg4[%c0_288, %c32_289], %247 {strides = array<i32>} : memref<32x512xf32, #tpu.memory_space<vmem>>, vector<8x64xf32>,
    %249 = vector.extract_strided_slice %246 {offsets = [0, 64], sizes = [8, 64], strides = [1, 1]} : vector<8x256xf32> to vector<8x64xf32>
    %c0_290 = arith.constant 0 : index
    %c160_291 = arith.constant 160 : index
    %250 = vector.load %arg4[%c0_290, %c160_291] : memref<32x512xf32, #tpu.memory_space<vmem>>, vector<8x64xf32>
    tpu.vector_store %arg4[%c0_290, %c160_291], %249 {strides = array<i32>} : memref<32x512xf32, #tpu.memory_space<vmem>>, vector<8x64xf32>,
    %251 = vector.extract_strided_slice %246 {offsets = [0, 128], sizes = [8, 64], strides = [1, 1]} : vector<8x256xf32> to vector<8x64xf32>
    %c0_292 = arith.constant 0 : index
    %c288_293 = arith.constant 288 : index
    %252 = vector.load %arg4[%c0_292, %c288_293] : memref<32x512xf32, #tpu.memory_space<vmem>>, vector<8x64xf32>
    tpu.vector_store %arg4[%c0_292, %c288_293], %251 {strides = array<i32>} : memref<32x512xf32, #tpu.memory_space<vmem>>, vector<8x64xf32>,
    %253 = vector.extract_strided_slice %246 {offsets = [0, 192], sizes = [8, 64], strides = [1, 1]} : vector<8x256xf32> to vector<8x64xf32>
    %c0_294 = arith.constant 0 : index
    %c416_295 = arith.constant 416 : index
    %254 = vector.load %arg4[%c0_294, %c416_295] : memref<32x512xf32, #tpu.memory_space<vmem>>, vector<8x64xf32>
    tpu.vector_store %arg4[%c0_294, %c416_295], %253 {strides = array<i32>} : memref<32x512xf32, #tpu.memory_space<vmem>>, vector<8x64xf32>,
    %c0_296 = arith.constant 0 : index
    %c415_297 = arith.constant 415 : index
    %255 = vector.load %arg4[%c0_296, %c415_297] : memref<32x512xf32, #tpu.memory_space<vmem>>, vector<8x64xf32>
    %c0_298 = arith.constant 0 : index
    %c0_299 = arith.constant 0 : index
    %256 = vector.load %arg5[%c0_298, %c0_299] : memref<112x256xf32, #tpu.memory_space<vmem>>, vector<8x64xf32>
    tpu.vector_store %arg5[%c0_298, %c0_299], %255 {strides = array<i32>} : memref<112x256xf32, #tpu.memory_space<vmem>>, vector<8x64xf32>,
    %c0_300 = arith.constant 0 : index
    %c32_301 = arith.constant 32 : index
    %257 = vector.load %arg4[%c0_300, %c32_301] : memref<32x512xf32, #tpu.memory_space<vmem>>, vector<8x64xf32>
    %c8_302 = arith.constant 8 : index
    %c0_303 = arith.constant 0 : index
    %258 = vector.load %arg5[%c8_302, %c0_303] : memref<112x256xf32, #tpu.memory_space<vmem>>, vector<8x64xf32>
    tpu.vector_store %arg5[%c8_302, %c0_303], %257 {strides = array<i32>} : memref<112x256xf32, #tpu.memory_space<vmem>>, vector<8x64xf32>,
    %c0_304 = arith.constant 0 : index
    %c160_305 = arith.constant 160 : index
    %259 = vector.load %arg4[%c0_304, %c160_305] : memref<32x512xf32, #tpu.memory_space<vmem>>, vector<8x64xf32>
    %c16_306 = arith.constant 16 : index
    %c0_307 = arith.constant 0 : index
    %260 = vector.load %arg5[%c16_306, %c0_307] : memref<112x256xf32, #tpu.memory_space<vmem>>, vector<8x64xf32>
    tpu.vector_store %arg5[%c16_306, %c0_307], %259 {strides = array<i32>} : memref<112x256xf32, #tpu.memory_space<vmem>>, vector<8x64xf32>,
    %c0_308 = arith.constant 0 : index
    %c32_309 = arith.constant 32 : index
    %261 = vector.load %arg4[%c0_308, %c32_309] : memref<32x512xf32, #tpu.memory_space<vmem>>, vector<8x64xf32>
    %c0_310 = arith.constant 0 : index
    %c64_311 = arith.constant 64 : index
    %262 = vector.load %arg5[%c0_310, %c64_311] : memref<112x256xf32, #tpu.memory_space<vmem>>, vector<8x64xf32>
    tpu.vector_store %arg5[%c0_310, %c64_311], %261 {strides = array<i32>} : memref<112x256xf32, #tpu.memory_space<vmem>>, vector<8x64xf32>,
    %c0_312 = arith.constant 0 : index
    %c160_313 = arith.constant 160 : index
    %263 = vector.load %arg4[%c0_312, %c160_313] : memref<32x512xf32, #tpu.memory_space<vmem>>, vector<8x64xf32>
    %c8_314 = arith.constant 8 : index
    %c64_315 = arith.constant 64 : index
    %264 = vector.load %arg5[%c8_314, %c64_315] : memref<112x256xf32, #tpu.memory_space<vmem>>, vector<8x64xf32>
    tpu.vector_store %arg5[%c8_314, %c64_315], %263 {strides = array<i32>} : memref<112x256xf32, #tpu.memory_space<vmem>>, vector<8x64xf32>,
    %c0_316 = arith.constant 0 : index
    %c288_317 = arith.constant 288 : index
    %265 = vector.load %arg4[%c0_316, %c288_317] : memref<32x512xf32, #tpu.memory_space<vmem>>, vector<8x64xf32>
    %c16_318 = arith.constant 16 : index
    %c64_319 = arith.constant 64 : index
    %266 = vector.load %arg5[%c16_318, %c64_319] : memref<112x256xf32, #tpu.memory_space<vmem>>, vector<8x64xf32>
    tpu.vector_store %arg5[%c16_318, %c64_319], %265 {strides = array<i32>} : memref<112x256xf32, #tpu.memory_space<vmem>>, vector<8x64xf32>,
    %c0_320 = arith.constant 0 : index
    %c160_321 = arith.constant 160 : index
    %267 = vector.load %arg4[%c0_320, %c160_321] : memref<32x512xf32, #tpu.memory_space<vmem>>, vector<8x64xf32>
    %c0_322 = arith.constant 0 : index
    %c128_323 = arith.constant 128 : index
    %268 = vector.load %arg5[%c0_322, %c128_323] : memref<112x256xf32, #tpu.memory_space<vmem>>, vector<8x64xf32>
    tpu.vector_store %arg5[%c0_322, %c128_323], %267 {strides = array<i32>} : memref<112x256xf32, #tpu.memory_space<vmem>>, vector<8x64xf32>,
    %c0_324 = arith.constant 0 : index
    %c288_325 = arith.constant 288 : index
    %269 = vector.load %arg4[%c0_324, %c288_325] : memref<32x512xf32, #tpu.memory_space<vmem>>, vector<8x64xf32>
    %c8_326 = arith.constant 8 : index
    %c128_327 = arith.constant 128 : index
    %270 = vector.load %arg5[%c8_326, %c128_327] : memref<112x256xf32, #tpu.memory_space<vmem>>, vector<8x64xf32>
    tpu.vector_store %arg5[%c8_326, %c128_327], %269 {strides = array<i32>} : memref<112x256xf32, #tpu.memory_space<vmem>>, vector<8x64xf32>,
    %c0_328 = arith.constant 0 : index
    %c416_329 = arith.constant 416 : index
    %271 = vector.load %arg4[%c0_328, %c416_329] : memref<32x512xf32, #tpu.memory_space<vmem>>, vector<8x64xf32>
    %c16_330 = arith.constant 16 : index
    %c128_331 = arith.constant 128 : index
    %272 = vector.load %arg5[%c16_330, %c128_331] : memref<112x256xf32, #tpu.memory_space<vmem>>, vector<8x64xf32>
    tpu.vector_store %arg5[%c16_330, %c128_331], %271 {strides = array<i32>} : memref<112x256xf32, #tpu.memory_space<vmem>>, vector<8x64xf32>,
    %c0_332 = arith.constant 0 : index
    %c288_333 = arith.constant 288 : index
    %273 = vector.load %arg4[%c0_332, %c288_333] : memref<32x512xf32, #tpu.memory_space<vmem>>, vector<8x64xf32>
    %c0_334 = arith.constant 0 : index
    %c192_335 = arith.constant 192 : index
    %274 = vector.load %arg5[%c0_334, %c192_335] : memref<112x256xf32, #tpu.memory_space<vmem>>, vector<8x64xf32>
    tpu.vector_store %arg5[%c0_334, %c192_335], %273 {strides = array<i32>} : memref<112x256xf32, #tpu.memory_space<vmem>>, vector<8x64xf32>,
    %c0_336 = arith.constant 0 : index
    %c416_337 = arith.constant 416 : index
    %275 = vector.load %arg4[%c0_336, %c416_337] : memref<32x512xf32, #tpu.memory_space<vmem>>, vector<8x64xf32>
    %c8_338 = arith.constant 8 : index
    %c192_339 = arith.constant 192 : index
    %276 = vector.load %arg5[%c8_338, %c192_339] : memref<112x256xf32, #tpu.memory_space<vmem>>, vector<8x64xf32>
    tpu.vector_store %arg5[%c8_338, %c192_339], %275 {strides = array<i32>} : memref<112x256xf32, #tpu.memory_space<vmem>>, vector<8x64xf32>,
    %c0_340 = arith.constant 0 : index
    %c33_341 = arith.constant 33 : index
    %277 = vector.load %arg4[%c0_340, %c33_341] : memref<32x512xf32, #tpu.memory_space<vmem>>, vector<8x64xf32>
    %c16_342 = arith.constant 16 : index
    %c192_343 = arith.constant 192 : index
    %278 = vector.load %arg5[%c16_342, %c192_343] : memref<112x256xf32, #tpu.memory_space<vmem>>, vector<8x64xf32>
    tpu.vector_store %arg5[%c16_342, %c192_343], %277 {strides = array<i32>} : memref<112x256xf32, #tpu.memory_space<vmem>>, vector<8x64xf32>,
    %c264 = arith.constant 264 : index
    %c0_344 = arith.constant 0 : index
    %279 = vector.load %arg2[%c264, %c0_344] : memref<296x128xf32, #tpu.memory_space<vmem>>, vector<8x24xf32>
    %c264_345 = arith.constant 264 : index
    %c24_346 = arith.constant 24 : index
    %280 = vector.load %arg2[%c264_345, %c24_346] : memref<296x128xf32, #tpu.memory_space<vmem>>, vector<8x1xf32>
    %c0_347 = arith.constant 0 : index
    %c0_348 = arith.constant 0 : index
    %281 = vector.load %arg5[%c0_347, %c0_348] : memref<112x256xf32, #tpu.memory_space<vmem>>, vector<24x256xf32>
    %cst_349 = arith.constant dense<0.000000e+00> : vector<8x256xf32>
    %282 = tpu.matmul %279, %281, %cst_349 {dimension_numbers = #tpu.dot_dimension_numbers<[1], [0], [0], [1], [0, 0, 1, 1], [], []>} : vector<8x24xf32>, vector<24x256xf32>, vector<8x256xf32> -> vector<8x256xf32>
    %283 = vector.broadcast %280 : vector<8x1xf32> to vector<8x256xf32>
    %284 = arith.addf %282, %283 : vector<8x256xf32>
    %285 = arith.addf %198, %284 : vector<8x256xf32>
    %cst_350 = arith.constant 0.000000e+00 : f32
    %286 = vector.broadcast %cst_350 : f32 to vector<8x256xf32>
    %287 = arith.cmpf oge, %285, %286 : vector<8x256xf32>
    %cst_351 = arith.constant 1.000000e-01 : f32
    %288 = vector.broadcast %cst_351 : f32 to vector<8x256xf32>
    %289 = arith.mulf %288, %285 : vector<8x256xf32>
    %290 = arith.select %287, %285, %289 : vector<8x256xi1>, vector<8x256xf32>
    %291 = vector.extract_strided_slice %290 {offsets = [0, 0], sizes = [8, 64], strides = [1, 1]} : vector<8x256xf32> to vector<8x64xf32>
    %c0_352 = arith.constant 0 : index
    %c32_353 = arith.constant 32 : index
    %292 = vector.load %arg4[%c0_352, %c32_353] : memref<32x512xf32, #tpu.memory_space<vmem>>, vector<8x64xf32>
    tpu.vector_store %arg4[%c0_352, %c32_353], %291 {strides = array<i32>} : memref<32x512xf32, #tpu.memory_space<vmem>>, vector<8x64xf32>,
    %293 = vector.extract_strided_slice %290 {offsets = [0, 64], sizes = [8, 64], strides = [1, 1]} : vector<8x256xf32> to vector<8x64xf32>
    %c0_354 = arith.constant 0 : index
    %c160_355 = arith.constant 160 : index
    %294 = vector.load %arg4[%c0_354, %c160_355] : memref<32x512xf32, #tpu.memory_space<vmem>>, vector<8x64xf32>
    tpu.vector_store %arg4[%c0_354, %c160_355], %293 {strides = array<i32>} : memref<32x512xf32, #tpu.memory_space<vmem>>, vector<8x64xf32>,
    %295 = vector.extract_strided_slice %290 {offsets = [0, 128], sizes = [8, 64], strides = [1, 1]} : vector<8x256xf32> to vector<8x64xf32>
    %c0_356 = arith.constant 0 : index
    %c288_357 = arith.constant 288 : index
    %296 = vector.load %arg4[%c0_356, %c288_357] : memref<32x512xf32, #tpu.memory_space<vmem>>, vector<8x64xf32>
    tpu.vector_store %arg4[%c0_356, %c288_357], %295 {strides = array<i32>} : memref<32x512xf32, #tpu.memory_space<vmem>>, vector<8x64xf32>,
    %297 = vector.extract_strided_slice %290 {offsets = [0, 192], sizes = [8, 64], strides = [1, 1]} : vector<8x256xf32> to vector<8x64xf32>
    %c0_358 = arith.constant 0 : index
    %c416_359 = arith.constant 416 : index
    %298 = vector.load %arg4[%c0_358, %c416_359] : memref<32x512xf32, #tpu.memory_space<vmem>>, vector<8x64xf32>
    tpu.vector_store %arg4[%c0_358, %c416_359], %297 {strides = array<i32>} : memref<32x512xf32, #tpu.memory_space<vmem>>, vector<8x64xf32>,
    %c0_360 = arith.constant 0 : index
    %c159_361 = arith.constant 159 : index
    %299 = vector.load %arg4[%c0_360, %c159_361] : memref<32x512xf32, #tpu.memory_space<vmem>>, vector<8x64xf32>
    %c0_362 = arith.constant 0 : index
    %c0_363 = arith.constant 0 : index
    %300 = vector.load %arg5[%c0_362, %c0_363] : memref<112x256xf32, #tpu.memory_space<vmem>>, vector<8x64xf32>
    tpu.vector_store %arg5[%c0_362, %c0_363], %299 {strides = array<i32>} : memref<112x256xf32, #tpu.memory_space<vmem>>, vector<8x64xf32>,
    %c0_364 = arith.constant 0 : index
    %c32_365 = arith.constant 32 : index
    %301 = vector.load %arg4[%c0_364, %c32_365] : memref<32x512xf32, #tpu.memory_space<vmem>>, vector<8x64xf32>
    %c8_366 = arith.constant 8 : index
    %c0_367 = arith.constant 0 : index
    %302 = vector.load %arg5[%c8_366, %c0_367] : memref<112x256xf32, #tpu.memory_space<vmem>>, vector<8x64xf32>
    tpu.vector_store %arg5[%c8_366, %c0_367], %301 {strides = array<i32>} : memref<112x256xf32, #tpu.memory_space<vmem>>, vector<8x64xf32>,
    %c0_368 = arith.constant 0 : index
    %c416_369 = arith.constant 416 : index
    %303 = vector.load %arg4[%c0_368, %c416_369] : memref<32x512xf32, #tpu.memory_space<vmem>>, vector<8x64xf32>
    %c16_370 = arith.constant 16 : index
    %c0_371 = arith.constant 0 : index
    %304 = vector.load %arg5[%c16_370, %c0_371] : memref<112x256xf32, #tpu.memory_space<vmem>>, vector<8x64xf32>
    tpu.vector_store %arg5[%c16_370, %c0_371], %303 {strides = array<i32>} : memref<112x256xf32, #tpu.memory_space<vmem>>, vector<8x64xf32>,
    %c0_372 = arith.constant 0 : index
    %c287 = arith.constant 287 : index
    %305 = vector.load %arg4[%c0_372, %c287] : memref<32x512xf32, #tpu.memory_space<vmem>>, vector<8x64xf32>
    %c0_373 = arith.constant 0 : index
    %c64_374 = arith.constant 64 : index
    %306 = vector.load %arg5[%c0_373, %c64_374] : memref<112x256xf32, #tpu.memory_space<vmem>>, vector<8x64xf32>
    tpu.vector_store %arg5[%c0_373, %c64_374], %305 {strides = array<i32>} : memref<112x256xf32, #tpu.memory_space<vmem>>, vector<8x64xf32>,
    %c0_375 = arith.constant 0 : index
    %c160_376 = arith.constant 160 : index
    %307 = vector.load %arg4[%c0_375, %c160_376] : memref<32x512xf32, #tpu.memory_space<vmem>>, vector<8x64xf32>
    %c8_377 = arith.constant 8 : index
    %c64_378 = arith.constant 64 : index
    %308 = vector.load %arg5[%c8_377, %c64_378] : memref<112x256xf32, #tpu.memory_space<vmem>>, vector<8x64xf32>
    tpu.vector_store %arg5[%c8_377, %c64_378], %307 {strides = array<i32>} : memref<112x256xf32, #tpu.memory_space<vmem>>, vector<8x64xf32>,
    %c0_379 = arith.constant 0 : index
    %c33_380 = arith.constant 33 : index
    %309 = vector.load %arg4[%c0_379, %c33_380] : memref<32x512xf32, #tpu.memory_space<vmem>>, vector<8x64xf32>
    %c16_381 = arith.constant 16 : index
    %c64_382 = arith.constant 64 : index
    %310 = vector.load %arg5[%c16_381, %c64_382] : memref<112x256xf32, #tpu.memory_space<vmem>>, vector<8x64xf32>
    tpu.vector_store %arg5[%c16_381, %c64_382], %309 {strides = array<i32>} : memref<112x256xf32, #tpu.memory_space<vmem>>, vector<8x64xf32>,
    %c0_383 = arith.constant 0 : index
    %c415_384 = arith.constant 415 : index
    %311 = vector.load %arg4[%c0_383, %c415_384] : memref<32x512xf32, #tpu.memory_space<vmem>>, vector<8x64xf32>
    %c0_385 = arith.constant 0 : index
    %c128_386 = arith.constant 128 : index
    %312 = vector.load %arg5[%c0_385, %c128_386] : memref<112x256xf32, #tpu.memory_space<vmem>>, vector<8x64xf32>
    tpu.vector_store %arg5[%c0_385, %c128_386], %311 {strides = array<i32>} : memref<112x256xf32, #tpu.memory_space<vmem>>, vector<8x64xf32>,
    %c0_387 = arith.constant 0 : index
    %c288_388 = arith.constant 288 : index
    %313 = vector.load %arg4[%c0_387, %c288_388] : memref<32x512xf32, #tpu.memory_space<vmem>>, vector<8x64xf32>
    %c8_389 = arith.constant 8 : index
    %c128_390 = arith.constant 128 : index
    %314 = vector.load %arg5[%c8_389, %c128_390] : memref<112x256xf32, #tpu.memory_space<vmem>>, vector<8x64xf32>
    tpu.vector_store %arg5[%c8_389, %c128_390], %313 {strides = array<i32>} : memref<112x256xf32, #tpu.memory_space<vmem>>, vector<8x64xf32>,
    %c0_391 = arith.constant 0 : index
    %c161_392 = arith.constant 161 : index
    %315 = vector.load %arg4[%c0_391, %c161_392] : memref<32x512xf32, #tpu.memory_space<vmem>>, vector<8x64xf32>
    %c16_393 = arith.constant 16 : index
    %c128_394 = arith.constant 128 : index
    %316 = vector.load %arg5[%c16_393, %c128_394] : memref<112x256xf32, #tpu.memory_space<vmem>>, vector<8x64xf32>
    tpu.vector_store %arg5[%c16_393, %c128_394], %315 {strides = array<i32>} : memref<112x256xf32, #tpu.memory_space<vmem>>, vector<8x64xf32>,
    %c0_395 = arith.constant 0 : index
    %c32_396 = arith.constant 32 : index
    %317 = vector.load %arg4[%c0_395, %c32_396] : memref<32x512xf32, #tpu.memory_space<vmem>>, vector<8x64xf32>
    %c0_397 = arith.constant 0 : index
    %c192_398 = arith.constant 192 : index
    %318 = vector.load %arg5[%c0_397, %c192_398] : memref<112x256xf32, #tpu.memory_space<vmem>>, vector<8x64xf32>
    tpu.vector_store %arg5[%c0_397, %c192_398], %317 {strides = array<i32>} : memref<112x256xf32, #tpu.memory_space<vmem>>, vector<8x64xf32>,
    %c0_399 = arith.constant 0 : index
    %c416_400 = arith.constant 416 : index
    %319 = vector.load %arg4[%c0_399, %c416_400] : memref<32x512xf32, #tpu.memory_space<vmem>>, vector<8x64xf32>
    %c8_401 = arith.constant 8 : index
    %c192_402 = arith.constant 192 : index
    %320 = vector.load %arg5[%c8_401, %c192_402] : memref<112x256xf32, #tpu.memory_space<vmem>>, vector<8x64xf32>
    tpu.vector_store %arg5[%c8_401, %c192_402], %319 {strides = array<i32>} : memref<112x256xf32, #tpu.memory_space<vmem>>, vector<8x64xf32>,
    %c0_403 = arith.constant 0 : index
    %c289 = arith.constant 289 : index
    %321 = vector.load %arg4[%c0_403, %c289] : memref<32x512xf32, #tpu.memory_space<vmem>>, vector<8x64xf32>
    %c16_404 = arith.constant 16 : index
    %c192_405 = arith.constant 192 : index
    %322 = vector.load %arg5[%c16_404, %c192_405] : memref<112x256xf32, #tpu.memory_space<vmem>>, vector<8x64xf32>
    tpu.vector_store %arg5[%c16_404, %c192_405], %321 {strides = array<i32>} : memref<112x256xf32, #tpu.memory_space<vmem>>, vector<8x64xf32>,
    %c272 = arith.constant 272 : index
    %c0_406 = arith.constant 0 : index
    %323 = vector.load %arg2[%c272, %c0_406] : memref<296x128xf32, #tpu.memory_space<vmem>>, vector<8x24xf32>
    %c272_407 = arith.constant 272 : index
    %c24_408 = arith.constant 24 : index
    %324 = vector.load %arg2[%c272_407, %c24_408] : memref<296x128xf32, #tpu.memory_space<vmem>>, vector<8x1xf32>
    %c0_409 = arith.constant 0 : index
    %c0_410 = arith.constant 0 : index
    %325 = vector.load %arg5[%c0_409, %c0_410] : memref<112x256xf32, #tpu.memory_space<vmem>>, vector<24x256xf32>
    %cst_411 = arith.constant dense<0.000000e+00> : vector<8x256xf32>
    %326 = tpu.matmul %323, %325, %cst_411 {dimension_numbers = #tpu.dot_dimension_numbers<[1], [0], [0], [1], [0, 0, 1, 1], [], []>} : vector<8x24xf32>, vector<24x256xf32>, vector<8x256xf32> -> vector<8x256xf32>
    %327 = vector.broadcast %324 : vector<8x1xf32> to vector<8x256xf32>
    %328 = arith.addf %326, %327 : vector<8x256xf32>
    %cst_412 = arith.constant 0.000000e+00 : f32
    %329 = vector.broadcast %cst_412 : f32 to vector<8x256xf32>
    %330 = arith.cmpf oge, %328, %329 : vector<8x256xf32>
    %cst_413 = arith.constant 1.000000e-01 : f32
    %331 = vector.broadcast %cst_413 : f32 to vector<8x256xf32>
    %332 = arith.mulf %331, %328 : vector<8x256xf32>
    %333 = arith.select %330, %328, %332 : vector<8x256xi1>, vector<8x256xf32>
    %334 = vector.extract_strided_slice %333 {offsets = [0, 0], sizes = [8, 64], strides = [1, 1]} : vector<8x256xf32> to vector<8x64xf32>
    %c0_414 = arith.constant 0 : index
    %c32_415 = arith.constant 32 : index
    %335 = vector.load %arg4[%c0_414, %c32_415] : memref<32x512xf32, #tpu.memory_space<vmem>>, vector<8x64xf32>
    tpu.vector_store %arg4[%c0_414, %c32_415], %334 {strides = array<i32>} : memref<32x512xf32, #tpu.memory_space<vmem>>, vector<8x64xf32>,
    %336 = vector.extract_strided_slice %333 {offsets = [0, 64], sizes = [8, 64], strides = [1, 1]} : vector<8x256xf32> to vector<8x64xf32>
    %c0_416 = arith.constant 0 : index
    %c160_417 = arith.constant 160 : index
    %337 = vector.load %arg4[%c0_416, %c160_417] : memref<32x512xf32, #tpu.memory_space<vmem>>, vector<8x64xf32>
    tpu.vector_store %arg4[%c0_416, %c160_417], %336 {strides = array<i32>} : memref<32x512xf32, #tpu.memory_space<vmem>>, vector<8x64xf32>,
    %338 = vector.extract_strided_slice %333 {offsets = [0, 128], sizes = [8, 64], strides = [1, 1]} : vector<8x256xf32> to vector<8x64xf32>
    %c0_418 = arith.constant 0 : index
    %c288_419 = arith.constant 288 : index
    %339 = vector.load %arg4[%c0_418, %c288_419] : memref<32x512xf32, #tpu.memory_space<vmem>>, vector<8x64xf32>
    tpu.vector_store %arg4[%c0_418, %c288_419], %338 {strides = array<i32>} : memref<32x512xf32, #tpu.memory_space<vmem>>, vector<8x64xf32>,
    %340 = vector.extract_strided_slice %333 {offsets = [0, 192], sizes = [8, 64], strides = [1, 1]} : vector<8x256xf32> to vector<8x64xf32>
    %c0_420 = arith.constant 0 : index
    %c416_421 = arith.constant 416 : index
    %341 = vector.load %arg4[%c0_420, %c416_421] : memref<32x512xf32, #tpu.memory_space<vmem>>, vector<8x64xf32>
    tpu.vector_store %arg4[%c0_420, %c416_421], %340 {strides = array<i32>} : memref<32x512xf32, #tpu.memory_space<vmem>>, vector<8x64xf32>,
    %c0_422 = arith.constant 0 : index
    %c415_423 = arith.constant 415 : index
    %342 = vector.load %arg4[%c0_422, %c415_423] : memref<32x512xf32, #tpu.memory_space<vmem>>, vector<8x64xf32>
    %c0_424 = arith.constant 0 : index
    %c0_425 = arith.constant 0 : index
    %343 = vector.load %arg5[%c0_424, %c0_425] : memref<112x256xf32, #tpu.memory_space<vmem>>, vector<8x64xf32>
    tpu.vector_store %arg5[%c0_424, %c0_425], %342 {strides = array<i32>} : memref<112x256xf32, #tpu.memory_space<vmem>>, vector<8x64xf32>,
    %c0_426 = arith.constant 0 : index
    %c32_427 = arith.constant 32 : index
    %344 = vector.load %arg4[%c0_426, %c32_427] : memref<32x512xf32, #tpu.memory_space<vmem>>, vector<8x64xf32>
    %c8_428 = arith.constant 8 : index
    %c0_429 = arith.constant 0 : index
    %345 = vector.load %arg5[%c8_428, %c0_429] : memref<112x256xf32, #tpu.memory_space<vmem>>, vector<8x64xf32>
    tpu.vector_store %arg5[%c8_428, %c0_429], %344 {strides = array<i32>} : memref<112x256xf32, #tpu.memory_space<vmem>>, vector<8x64xf32>,
    %c0_430 = arith.constant 0 : index
    %c160_431 = arith.constant 160 : index
    %346 = vector.load %arg4[%c0_430, %c160_431] : memref<32x512xf32, #tpu.memory_space<vmem>>, vector<8x64xf32>
    %c16_432 = arith.constant 16 : index
    %c0_433 = arith.constant 0 : index
    %347 = vector.load %arg5[%c16_432, %c0_433] : memref<112x256xf32, #tpu.memory_space<vmem>>, vector<8x64xf32>
    tpu.vector_store %arg5[%c16_432, %c0_433], %346 {strides = array<i32>} : memref<112x256xf32, #tpu.memory_space<vmem>>, vector<8x64xf32>,
    %c0_434 = arith.constant 0 : index
    %c32_435 = arith.constant 32 : index
    %348 = vector.load %arg4[%c0_434, %c32_435] : memref<32x512xf32, #tpu.memory_space<vmem>>, vector<8x64xf32>
    %c0_436 = arith.constant 0 : index
    %c64_437 = arith.constant 64 : index
    %349 = vector.load %arg5[%c0_436, %c64_437] : memref<112x256xf32, #tpu.memory_space<vmem>>, vector<8x64xf32>
    tpu.vector_store %arg5[%c0_436, %c64_437], %348 {strides = array<i32>} : memref<112x256xf32, #tpu.memory_space<vmem>>, vector<8x64xf32>,
    %c0_438 = arith.constant 0 : index
    %c160_439 = arith.constant 160 : index
    %350 = vector.load %arg4[%c0_438, %c160_439] : memref<32x512xf32, #tpu.memory_space<vmem>>, vector<8x64xf32>
    %c8_440 = arith.constant 8 : index
    %c64_441 = arith.constant 64 : index
    %351 = vector.load %arg5[%c8_440, %c64_441] : memref<112x256xf32, #tpu.memory_space<vmem>>, vector<8x64xf32>
    tpu.vector_store %arg5[%c8_440, %c64_441], %350 {strides = array<i32>} : memref<112x256xf32, #tpu.memory_space<vmem>>, vector<8x64xf32>,
    %c0_442 = arith.constant 0 : index
    %c288_443 = arith.constant 288 : index
    %352 = vector.load %arg4[%c0_442, %c288_443] : memref<32x512xf32, #tpu.memory_space<vmem>>, vector<8x64xf32>
    %c16_444 = arith.constant 16 : index
    %c64_445 = arith.constant 64 : index
    %353 = vector.load %arg5[%c16_444, %c64_445] : memref<112x256xf32, #tpu.memory_space<vmem>>, vector<8x64xf32>
    tpu.vector_store %arg5[%c16_444, %c64_445], %352 {strides = array<i32>} : memref<112x256xf32, #tpu.memory_space<vmem>>, vector<8x64xf32>,
    %c0_446 = arith.constant 0 : index
    %c160_447 = arith.constant 160 : index
    %354 = vector.load %arg4[%c0_446, %c160_447] : memref<32x512xf32, #tpu.memory_space<vmem>>, vector<8x64xf32>
    %c0_448 = arith.constant 0 : index
    %c128_449 = arith.constant 128 : index
    %355 = vector.load %arg5[%c0_448, %c128_449] : memref<112x256xf32, #tpu.memory_space<vmem>>, vector<8x64xf32>
    tpu.vector_store %arg5[%c0_448, %c128_449], %354 {strides = array<i32>} : memref<112x256xf32, #tpu.memory_space<vmem>>, vector<8x64xf32>,
    %c0_450 = arith.constant 0 : index
    %c288_451 = arith.constant 288 : index
    %356 = vector.load %arg4[%c0_450, %c288_451] : memref<32x512xf32, #tpu.memory_space<vmem>>, vector<8x64xf32>
    %c8_452 = arith.constant 8 : index
    %c128_453 = arith.constant 128 : index
    %357 = vector.load %arg5[%c8_452, %c128_453] : memref<112x256xf32, #tpu.memory_space<vmem>>, vector<8x64xf32>
    tpu.vector_store %arg5[%c8_452, %c128_453], %356 {strides = array<i32>} : memref<112x256xf32, #tpu.memory_space<vmem>>, vector<8x64xf32>,
    %c0_454 = arith.constant 0 : index
    %c416_455 = arith.constant 416 : index
    %358 = vector.load %arg4[%c0_454, %c416_455] : memref<32x512xf32, #tpu.memory_space<vmem>>, vector<8x64xf32>
    %c16_456 = arith.constant 16 : index
    %c128_457 = arith.constant 128 : index
    %359 = vector.load %arg5[%c16_456, %c128_457] : memref<112x256xf32, #tpu.memory_space<vmem>>, vector<8x64xf32>
    tpu.vector_store %arg5[%c16_456, %c128_457], %358 {strides = array<i32>} : memref<112x256xf32, #tpu.memory_space<vmem>>, vector<8x64xf32>,
    %c0_458 = arith.constant 0 : index
    %c288_459 = arith.constant 288 : index
    %360 = vector.load %arg4[%c0_458, %c288_459] : memref<32x512xf32, #tpu.memory_space<vmem>>, vector<8x64xf32>
    %c0_460 = arith.constant 0 : index
    %c192_461 = arith.constant 192 : index
    %361 = vector.load %arg5[%c0_460, %c192_461] : memref<112x256xf32, #tpu.memory_space<vmem>>, vector<8x64xf32>
    tpu.vector_store %arg5[%c0_460, %c192_461], %360 {strides = array<i32>} : memref<112x256xf32, #tpu.memory_space<vmem>>, vector<8x64xf32>,
    %c0_462 = arith.constant 0 : index
    %c416_463 = arith.constant 416 : index
    %362 = vector.load %arg4[%c0_462, %c416_463] : memref<32x512xf32, #tpu.memory_space<vmem>>, vector<8x64xf32>
    %c8_464 = arith.constant 8 : index
    %c192_465 = arith.constant 192 : index
    %363 = vector.load %arg5[%c8_464, %c192_465] : memref<112x256xf32, #tpu.memory_space<vmem>>, vector<8x64xf32>
    tpu.vector_store %arg5[%c8_464, %c192_465], %362 {strides = array<i32>} : memref<112x256xf32, #tpu.memory_space<vmem>>, vector<8x64xf32>,
    %c0_466 = arith.constant 0 : index
    %c33_467 = arith.constant 33 : index
    %364 = vector.load %arg4[%c0_466, %c33_467] : memref<32x512xf32, #tpu.memory_space<vmem>>, vector<8x64xf32>
    %c16_468 = arith.constant 16 : index
    %c192_469 = arith.constant 192 : index
    %365 = vector.load %arg5[%c16_468, %c192_469] : memref<112x256xf32, #tpu.memory_space<vmem>>, vector<8x64xf32>
    tpu.vector_store %arg5[%c16_468, %c192_469], %364 {strides = array<i32>} : memref<112x256xf32, #tpu.memory_space<vmem>>, vector<8x64xf32>,
    %c280 = arith.constant 280 : index
    %c0_470 = arith.constant 0 : index
    %366 = vector.load %arg2[%c280, %c0_470] : memref<296x128xf32, #tpu.memory_space<vmem>>, vector<8x24xf32>
    %c280_471 = arith.constant 280 : index
    %c24_472 = arith.constant 24 : index
    %367 = vector.load %arg2[%c280_471, %c24_472] : memref<296x128xf32, #tpu.memory_space<vmem>>, vector<8x1xf32>
    %c0_473 = arith.constant 0 : index
    %c0_474 = arith.constant 0 : index
    %368 = vector.load %arg5[%c0_473, %c0_474] : memref<112x256xf32, #tpu.memory_space<vmem>>, vector<24x256xf32>
    %cst_475 = arith.constant dense<0.000000e+00> : vector<8x256xf32>
    %369 = tpu.matmul %366, %368, %cst_475 {dimension_numbers = #tpu.dot_dimension_numbers<[1], [0], [0], [1], [0, 0, 1, 1], [], []>} : vector<8x24xf32>, vector<24x256xf32>, vector<8x256xf32> -> vector<8x256xf32>
    %370 = vector.broadcast %367 : vector<8x1xf32> to vector<8x256xf32>
    %371 = arith.addf %369, %370 : vector<8x256xf32>
    %372 = arith.addf %285, %371 : vector<8x256xf32>
    %cst_476 = arith.constant 0.000000e+00 : f32
    %373 = vector.broadcast %cst_476 : f32 to vector<8x256xf32>
    %374 = arith.cmpf oge, %372, %373 : vector<8x256xf32>
    %cst_477 = arith.constant 1.000000e-01 : f32
    %375 = vector.broadcast %cst_477 : f32 to vector<8x256xf32>
    %376 = arith.mulf %375, %372 : vector<8x256xf32>
    %377 = arith.select %374, %372, %376 : vector<8x256xi1>, vector<8x256xf32>
    %378 = vector.extract_strided_slice %377 {offsets = [0, 0], sizes = [8, 64], strides = [1, 1]} : vector<8x256xf32> to vector<8x64xf32>
    %c0_478 = arith.constant 0 : index
    %c32_479 = arith.constant 32 : index
    %379 = vector.load %arg4[%c0_478, %c32_479] : memref<32x512xf32, #tpu.memory_space<vmem>>, vector<8x64xf32>
    tpu.vector_store %arg4[%c0_478, %c32_479], %378 {strides = array<i32>} : memref<32x512xf32, #tpu.memory_space<vmem>>, vector<8x64xf32>,
    %380 = vector.extract_strided_slice %377 {offsets = [0, 64], sizes = [8, 64], strides = [1, 1]} : vector<8x256xf32> to vector<8x64xf32>
    %c0_480 = arith.constant 0 : index
    %c160_481 = arith.constant 160 : index
    %381 = vector.load %arg4[%c0_480, %c160_481] : memref<32x512xf32, #tpu.memory_space<vmem>>, vector<8x64xf32>
    tpu.vector_store %arg4[%c0_480, %c160_481], %380 {strides = array<i32>} : memref<32x512xf32, #tpu.memory_space<vmem>>, vector<8x64xf32>,
    %382 = vector.extract_strided_slice %377 {offsets = [0, 128], sizes = [8, 64], strides = [1, 1]} : vector<8x256xf32> to vector<8x64xf32>
    %c0_482 = arith.constant 0 : index
    %c288_483 = arith.constant 288 : index
    %383 = vector.load %arg4[%c0_482, %c288_483] : memref<32x512xf32, #tpu.memory_space<vmem>>, vector<8x64xf32>
    tpu.vector_store %arg4[%c0_482, %c288_483], %382 {strides = array<i32>} : memref<32x512xf32, #tpu.memory_space<vmem>>, vector<8x64xf32>,
    %384 = vector.extract_strided_slice %377 {offsets = [0, 192], sizes = [8, 64], strides = [1, 1]} : vector<8x256xf32> to vector<8x64xf32>
    %c0_484 = arith.constant 0 : index
    %c416_485 = arith.constant 416 : index
    %385 = vector.load %arg4[%c0_484, %c416_485] : memref<32x512xf32, #tpu.memory_space<vmem>>, vector<8x64xf32>
    tpu.vector_store %arg4[%c0_484, %c416_485], %384 {strides = array<i32>} : memref<32x512xf32, #tpu.memory_space<vmem>>, vector<8x64xf32>,
    %c0_486 = arith.constant 0 : index
    %c159_487 = arith.constant 159 : index
    %386 = vector.load %arg4[%c0_486, %c159_487] : memref<32x512xf32, #tpu.memory_space<vmem>>, vector<8x64xf32>
    %c0_488 = arith.constant 0 : index
    %c0_489 = arith.constant 0 : index
    %387 = vector.load %arg5[%c0_488, %c0_489] : memref<112x256xf32, #tpu.memory_space<vmem>>, vector<8x64xf32>
    tpu.vector_store %arg5[%c0_488, %c0_489], %386 {strides = array<i32>} : memref<112x256xf32, #tpu.memory_space<vmem>>, vector<8x64xf32>,
    %c0_490 = arith.constant 0 : index
    %c287_491 = arith.constant 287 : index
    %388 = vector.load %arg4[%c0_490, %c287_491] : memref<32x512xf32, #tpu.memory_space<vmem>>, vector<8x64xf32>
    %c8_492 = arith.constant 8 : index
    %c0_493 = arith.constant 0 : index
    %389 = vector.load %arg5[%c8_492, %c0_493] : memref<112x256xf32, #tpu.memory_space<vmem>>, vector<8x64xf32>
    tpu.vector_store %arg5[%c8_492, %c0_493], %388 {strides = array<i32>} : memref<112x256xf32, #tpu.memory_space<vmem>>, vector<8x64xf32>,
    %c0_494 = arith.constant 0 : index
    %c415_495 = arith.constant 415 : index
    %390 = vector.load %arg4[%c0_494, %c415_495] : memref<32x512xf32, #tpu.memory_space<vmem>>, vector<8x64xf32>
    %c16_496 = arith.constant 16 : index
    %c0_497 = arith.constant 0 : index
    %391 = vector.load %arg5[%c16_496, %c0_497] : memref<112x256xf32, #tpu.memory_space<vmem>>, vector<8x64xf32>
    tpu.vector_store %arg5[%c16_496, %c0_497], %390 {strides = array<i32>} : memref<112x256xf32, #tpu.memory_space<vmem>>, vector<8x64xf32>,
    %c0_498 = arith.constant 0 : index
    %c32_499 = arith.constant 32 : index
    %392 = vector.load %arg4[%c0_498, %c32_499] : memref<32x512xf32, #tpu.memory_space<vmem>>, vector<8x64xf32>
    %c24_500 = arith.constant 24 : index
    %c0_501 = arith.constant 0 : index
    %393 = vector.load %arg5[%c24_500, %c0_501] : memref<112x256xf32, #tpu.memory_space<vmem>>, vector<8x64xf32>
    tpu.vector_store %arg5[%c24_500, %c0_501], %392 {strides = array<i32>} : memref<112x256xf32, #tpu.memory_space<vmem>>, vector<8x64xf32>,
    %c0_502 = arith.constant 0 : index
    %c160_503 = arith.constant 160 : index
    %394 = vector.load %arg4[%c0_502, %c160_503] : memref<32x512xf32, #tpu.memory_space<vmem>>, vector<8x64xf32>
    %c32_504 = arith.constant 32 : index
    %c0_505 = arith.constant 0 : index
    %395 = vector.load %arg5[%c32_504, %c0_505] : memref<112x256xf32, #tpu.memory_space<vmem>>, vector<8x64xf32>
    tpu.vector_store %arg5[%c32_504, %c0_505], %394 {strides = array<i32>} : memref<112x256xf32, #tpu.memory_space<vmem>>, vector<8x64xf32>,
    %c0_506 = arith.constant 0 : index
    %c288_507 = arith.constant 288 : index
    %396 = vector.load %arg4[%c0_506, %c288_507] : memref<32x512xf32, #tpu.memory_space<vmem>>, vector<8x64xf32>
    %c40 = arith.constant 40 : index
    %c0_508 = arith.constant 0 : index
    %397 = vector.load %arg5[%c40, %c0_508] : memref<112x256xf32, #tpu.memory_space<vmem>>, vector<8x64xf32>
    tpu.vector_store %arg5[%c40, %c0_508], %396 {strides = array<i32>} : memref<112x256xf32, #tpu.memory_space<vmem>>, vector<8x64xf32>,
    %c0_509 = arith.constant 0 : index
    %c416_510 = arith.constant 416 : index
    %398 = vector.load %arg4[%c0_509, %c416_510] : memref<32x512xf32, #tpu.memory_space<vmem>>, vector<8x64xf32>
    %c48_511 = arith.constant 48 : index
    %c0_512 = arith.constant 0 : index
    %399 = vector.load %arg5[%c48_511, %c0_512] : memref<112x256xf32, #tpu.memory_space<vmem>>, vector<8x64xf32>
    tpu.vector_store %arg5[%c48_511, %c0_512], %398 {strides = array<i32>} : memref<112x256xf32, #tpu.memory_space<vmem>>, vector<8x64xf32>,
    %c0_513 = arith.constant 0 : index
    %c287_514 = arith.constant 287 : index
    %400 = vector.load %arg4[%c0_513, %c287_514] : memref<32x512xf32, #tpu.memory_space<vmem>>, vector<8x64xf32>
    %c0_515 = arith.constant 0 : index
    %c64_516 = arith.constant 64 : index
    %401 = vector.load %arg5[%c0_515, %c64_516] : memref<112x256xf32, #tpu.memory_space<vmem>>, vector<8x64xf32>
    tpu.vector_store %arg5[%c0_515, %c64_516], %400 {strides = array<i32>} : memref<112x256xf32, #tpu.memory_space<vmem>>, vector<8x64xf32>,
    %c0_517 = arith.constant 0 : index
    %c415_518 = arith.constant 415 : index
    %402 = vector.load %arg4[%c0_517, %c415_518] : memref<32x512xf32, #tpu.memory_space<vmem>>, vector<8x64xf32>
    %c8_519 = arith.constant 8 : index
    %c64_520 = arith.constant 64 : index
    %403 = vector.load %arg5[%c8_519, %c64_520] : memref<112x256xf32, #tpu.memory_space<vmem>>, vector<8x64xf32>
    tpu.vector_store %arg5[%c8_519, %c64_520], %402 {strides = array<i32>} : memref<112x256xf32, #tpu.memory_space<vmem>>, vector<8x64xf32>,
    %c0_521 = arith.constant 0 : index
    %c32_522 = arith.constant 32 : index
    %404 = vector.load %arg4[%c0_521, %c32_522] : memref<32x512xf32, #tpu.memory_space<vmem>>, vector<8x64xf32>
    %c16_523 = arith.constant 16 : index
    %c64_524 = arith.constant 64 : index
    %405 = vector.load %arg5[%c16_523, %c64_524] : memref<112x256xf32, #tpu.memory_space<vmem>>, vector<8x64xf32>
    tpu.vector_store %arg5[%c16_523, %c64_524], %404 {strides = array<i32>} : memref<112x256xf32, #tpu.memory_space<vmem>>, vector<8x64xf32>,
    %c0_525 = arith.constant 0 : index
    %c160_526 = arith.constant 160 : index
    %406 = vector.load %arg4[%c0_525, %c160_526] : memref<32x512xf32, #tpu.memory_space<vmem>>, vector<8x64xf32>
    %c24_527 = arith.constant 24 : index
    %c64_528 = arith.constant 64 : index
    %407 = vector.load %arg5[%c24_527, %c64_528] : memref<112x256xf32, #tpu.memory_space<vmem>>, vector<8x64xf32>
    tpu.vector_store %arg5[%c24_527, %c64_528], %406 {strides = array<i32>} : memref<112x256xf32, #tpu.memory_space<vmem>>, vector<8x64xf32>,
    %c0_529 = arith.constant 0 : index
    %c288_530 = arith.constant 288 : index
    %408 = vector.load %arg4[%c0_529, %c288_530] : memref<32x512xf32, #tpu.memory_space<vmem>>, vector<8x64xf32>
    %c32_531 = arith.constant 32 : index
    %c64_532 = arith.constant 64 : index
    %409 = vector.load %arg5[%c32_531, %c64_532] : memref<112x256xf32, #tpu.memory_space<vmem>>, vector<8x64xf32>
    tpu.vector_store %arg5[%c32_531, %c64_532], %408 {strides = array<i32>} : memref<112x256xf32, #tpu.memory_space<vmem>>, vector<8x64xf32>,
    %c0_533 = arith.constant 0 : index
    %c416_534 = arith.constant 416 : index
    %410 = vector.load %arg4[%c0_533, %c416_534] : memref<32x512xf32, #tpu.memory_space<vmem>>, vector<8x64xf32>
    %c40_535 = arith.constant 40 : index
    %c64_536 = arith.constant 64 : index
    %411 = vector.load %arg5[%c40_535, %c64_536] : memref<112x256xf32, #tpu.memory_space<vmem>>, vector<8x64xf32>
    tpu.vector_store %arg5[%c40_535, %c64_536], %410 {strides = array<i32>} : memref<112x256xf32, #tpu.memory_space<vmem>>, vector<8x64xf32>,
    %c0_537 = arith.constant 0 : index
    %c33_538 = arith.constant 33 : index
    %412 = vector.load %arg4[%c0_537, %c33_538] : memref<32x512xf32, #tpu.memory_space<vmem>>, vector<8x64xf32>
    %c48_539 = arith.constant 48 : index
    %c64_540 = arith.constant 64 : index
    %413 = vector.load %arg5[%c48_539, %c64_540] : memref<112x256xf32, #tpu.memory_space<vmem>>, vector<8x64xf32>
    tpu.vector_store %arg5[%c48_539, %c64_540], %412 {strides = array<i32>} : memref<112x256xf32, #tpu.memory_space<vmem>>, vector<8x64xf32>,
    %c0_541 = arith.constant 0 : index
    %c415_542 = arith.constant 415 : index
    %414 = vector.load %arg4[%c0_541, %c415_542] : memref<32x512xf32, #tpu.memory_space<vmem>>, vector<8x64xf32>
    %c0_543 = arith.constant 0 : index
    %c128_544 = arith.constant 128 : index
    %415 = vector.load %arg5[%c0_543, %c128_544] : memref<112x256xf32, #tpu.memory_space<vmem>>, vector<8x64xf32>
    tpu.vector_store %arg5[%c0_543, %c128_544], %414 {strides = array<i32>} : memref<112x256xf32, #tpu.memory_space<vmem>>, vector<8x64xf32>,
    %c0_545 = arith.constant 0 : index
    %c32_546 = arith.constant 32 : index
    %416 = vector.load %arg4[%c0_545, %c32_546] : memref<32x512xf32, #tpu.memory_space<vmem>>, vector<8x64xf32>
    %c8_547 = arith.constant 8 : index
    %c128_548 = arith.constant 128 : index
    %417 = vector.load %arg5[%c8_547, %c128_548] : memref<112x256xf32, #tpu.memory_space<vmem>>, vector<8x64xf32>
    tpu.vector_store %arg5[%c8_547, %c128_548], %416 {strides = array<i32>} : memref<112x256xf32, #tpu.memory_space<vmem>>, vector<8x64xf32>,
    %c0_549 = arith.constant 0 : index
    %c160_550 = arith.constant 160 : index
    %418 = vector.load %arg4[%c0_549, %c160_550] : memref<32x512xf32, #tpu.memory_space<vmem>>, vector<8x64xf32>
    %c16_551 = arith.constant 16 : index
    %c128_552 = arith.constant 128 : index
    %419 = vector.load %arg5[%c16_551, %c128_552] : memref<112x256xf32, #tpu.memory_space<vmem>>, vector<8x64xf32>
    tpu.vector_store %arg5[%c16_551, %c128_552], %418 {strides = array<i32>} : memref<112x256xf32, #tpu.memory_space<vmem>>, vector<8x64xf32>,
    %c0_553 = arith.constant 0 : index
    %c288_554 = arith.constant 288 : index
    %420 = vector.load %arg4[%c0_553, %c288_554] : memref<32x512xf32, #tpu.memory_space<vmem>>, vector<8x64xf32>
    %c24_555 = arith.constant 24 : index
    %c128_556 = arith.constant 128 : index
    %421 = vector.load %arg5[%c24_555, %c128_556] : memref<112x256xf32, #tpu.memory_space<vmem>>, vector<8x64xf32>
    tpu.vector_store %arg5[%c24_555, %c128_556], %420 {strides = array<i32>} : memref<112x256xf32, #tpu.memory_space<vmem>>, vector<8x64xf32>,
    %c0_557 = arith.constant 0 : index
    %c416_558 = arith.constant 416 : index
    %422 = vector.load %arg4[%c0_557, %c416_558] : memref<32x512xf32, #tpu.memory_space<vmem>>, vector<8x64xf32>
    %c32_559 = arith.constant 32 : index
    %c128_560 = arith.constant 128 : index
    %423 = vector.load %arg5[%c32_559, %c128_560] : memref<112x256xf32, #tpu.memory_space<vmem>>, vector<8x64xf32>
    tpu.vector_store %arg5[%c32_559, %c128_560], %422 {strides = array<i32>} : memref<112x256xf32, #tpu.memory_space<vmem>>, vector<8x64xf32>,
    %c0_561 = arith.constant 0 : index
    %c33_562 = arith.constant 33 : index
    %424 = vector.load %arg4[%c0_561, %c33_562] : memref<32x512xf32, #tpu.memory_space<vmem>>, vector<8x64xf32>
    %c40_563 = arith.constant 40 : index
    %c128_564 = arith.constant 128 : index
    %425 = vector.load %arg5[%c40_563, %c128_564] : memref<112x256xf32, #tpu.memory_space<vmem>>, vector<8x64xf32>
    tpu.vector_store %arg5[%c40_563, %c128_564], %424 {strides = array<i32>} : memref<112x256xf32, #tpu.memory_space<vmem>>, vector<8x64xf32>,
    %c0_565 = arith.constant 0 : index
    %c161_566 = arith.constant 161 : index
    %426 = vector.load %arg4[%c0_565, %c161_566] : memref<32x512xf32, #tpu.memory_space<vmem>>, vector<8x64xf32>
    %c48_567 = arith.constant 48 : index
    %c128_568 = arith.constant 128 : index
    %427 = vector.load %arg5[%c48_567, %c128_568] : memref<112x256xf32, #tpu.memory_space<vmem>>, vector<8x64xf32>
    tpu.vector_store %arg5[%c48_567, %c128_568], %426 {strides = array<i32>} : memref<112x256xf32, #tpu.memory_space<vmem>>, vector<8x64xf32>,
    %c0_569 = arith.constant 0 : index
    %c32_570 = arith.constant 32 : index
    %428 = vector.load %arg4[%c0_569, %c32_570] : memref<32x512xf32, #tpu.memory_space<vmem>>, vector<8x64xf32>
    %c0_571 = arith.constant 0 : index
    %c192_572 = arith.constant 192 : index
    %429 = vector.load %arg5[%c0_571, %c192_572] : memref<112x256xf32, #tpu.memory_space<vmem>>, vector<8x64xf32>
    tpu.vector_store %arg5[%c0_571, %c192_572], %428 {strides = array<i32>} : memref<112x256xf32, #tpu.memory_space<vmem>>, vector<8x64xf32>,
    %c0_573 = arith.constant 0 : index
    %c160_574 = arith.constant 160 : index
    %430 = vector.load %arg4[%c0_573, %c160_574] : memref<32x512xf32, #tpu.memory_space<vmem>>, vector<8x64xf32>
    %c8_575 = arith.constant 8 : index
    %c192_576 = arith.constant 192 : index
    %431 = vector.load %arg5[%c8_575, %c192_576] : memref<112x256xf32, #tpu.memory_space<vmem>>, vector<8x64xf32>
    tpu.vector_store %arg5[%c8_575, %c192_576], %430 {strides = array<i32>} : memref<112x256xf32, #tpu.memory_space<vmem>>, vector<8x64xf32>,
    %c0_577 = arith.constant 0 : index
    %c288_578 = arith.constant 288 : index
    %432 = vector.load %arg4[%c0_577, %c288_578] : memref<32x512xf32, #tpu.memory_space<vmem>>, vector<8x64xf32>
    %c16_579 = arith.constant 16 : index
    %c192_580 = arith.constant 192 : index
    %433 = vector.load %arg5[%c16_579, %c192_580] : memref<112x256xf32, #tpu.memory_space<vmem>>, vector<8x64xf32>
    tpu.vector_store %arg5[%c16_579, %c192_580], %432 {strides = array<i32>} : memref<112x256xf32, #tpu.memory_space<vmem>>, vector<8x64xf32>,
    %c0_581 = arith.constant 0 : index
    %c416_582 = arith.constant 416 : index
    %434 = vector.load %arg4[%c0_581, %c416_582] : memref<32x512xf32, #tpu.memory_space<vmem>>, vector<8x64xf32>
    %c24_583 = arith.constant 24 : index
    %c192_584 = arith.constant 192 : index
    %435 = vector.load %arg5[%c24_583, %c192_584] : memref<112x256xf32, #tpu.memory_space<vmem>>, vector<8x64xf32>
    tpu.vector_store %arg5[%c24_583, %c192_584], %434 {strides = array<i32>} : memref<112x256xf32, #tpu.memory_space<vmem>>, vector<8x64xf32>,
    %c0_585 = arith.constant 0 : index
    %c33_586 = arith.constant 33 : index
    %436 = vector.load %arg4[%c0_585, %c33_586] : memref<32x512xf32, #tpu.memory_space<vmem>>, vector<8x64xf32>
    %c32_587 = arith.constant 32 : index
    %c192_588 = arith.constant 192 : index
    %437 = vector.load %arg5[%c32_587, %c192_588] : memref<112x256xf32, #tpu.memory_space<vmem>>, vector<8x64xf32>
    tpu.vector_store %arg5[%c32_587, %c192_588], %436 {strides = array<i32>} : memref<112x256xf32, #tpu.memory_space<vmem>>, vector<8x64xf32>,
    %c0_589 = arith.constant 0 : index
    %c161_590 = arith.constant 161 : index
    %438 = vector.load %arg4[%c0_589, %c161_590] : memref<32x512xf32, #tpu.memory_space<vmem>>, vector<8x64xf32>
    %c40_591 = arith.constant 40 : index
    %c192_592 = arith.constant 192 : index
    %439 = vector.load %arg5[%c40_591, %c192_592] : memref<112x256xf32, #tpu.memory_space<vmem>>, vector<8x64xf32>
    tpu.vector_store %arg5[%c40_591, %c192_592], %438 {strides = array<i32>} : memref<112x256xf32, #tpu.memory_space<vmem>>, vector<8x64xf32>,
    %c0_593 = arith.constant 0 : index
    %c289_594 = arith.constant 289 : index
    %440 = vector.load %arg4[%c0_593, %c289_594] : memref<32x512xf32, #tpu.memory_space<vmem>>, vector<8x64xf32>
    %c48_595 = arith.constant 48 : index
    %c192_596 = arith.constant 192 : index
    %441 = vector.load %arg5[%c48_595, %c192_596] : memref<112x256xf32, #tpu.memory_space<vmem>>, vector<8x64xf32>
    tpu.vector_store %arg5[%c48_595, %c192_596], %440 {strides = array<i32>} : memref<112x256xf32, #tpu.memory_space<vmem>>, vector<8x64xf32>,
    %c288_597 = arith.constant 288 : index
    %c0_598 = arith.constant 0 : index
    %442 = vector.load %arg2[%c288_597, %c0_598] : memref<296x128xf32, #tpu.memory_space<vmem>>, vector<1x56xf32>
    %c288_599 = arith.constant 288 : index
    %c56 = arith.constant 56 : index
    %443 = vector.load %arg2[%c288_599, %c56] : memref<296x128xf32, #tpu.memory_space<vmem>>, vector<1x1xf32>
    %c0_600 = arith.constant 0 : index
    %c0_601 = arith.constant 0 : index
    %444 = vector.load %arg5[%c0_600, %c0_601] : memref<112x256xf32, #tpu.memory_space<vmem>>, vector<56x256xf32>
    %cst_602 = arith.constant dense<0.000000e+00> : vector<1x256xf32>
    %445 = tpu.matmul %442, %444, %cst_602 {dimension_numbers = #tpu.dot_dimension_numbers<[1], [0], [0], [1], [0, 0, 1, 1], [], []>} : vector<1x56xf32>, vector<56x256xf32>, vector<1x256xf32> -> vector<1x256xf32>
    %446 = vector.broadcast %443 : vector<1x1xf32> to vector<1x256xf32>
    %447 = arith.addf %445, %446 : vector<1x256xf32>
    %448 = math.tanh %447 : vector<1x256xf32>
    %c0_603 = arith.constant 0 : index
    %c0_604 = arith.constant 0 : index
    %c0_605 = arith.constant 0 : index
    %449 = vector.load %arg3[%c0_603, %c0_604, %c0_605] : memref<1x1x256xf32, #tpu.memory_space<vmem>>, vector<1x1x256xf32>
    %450 = vector.shape_cast %449 : vector<1x1x256xf32> to vector<1x256xf32>
    %451 = vector.shape_cast %448 : vector<1x256xf32> to vector<1x1x256xf32>
    tpu.vector_store %arg3[%c0_603, %c0_604, %c0_605], %451 {strides = array<i32>} : memref<1x1x256xf32, #tpu.memory_space<vmem>>, vector<1x1x256xf32>,
    return
  }
  func.func @transform_0(%arg0: i32) -> (i32, i32, i32) {
    %c0_i32 = arith.constant 0 : i32
    %c0_i32_0 = arith.constant 0 : i32
    %c0_i32_1 = arith.constant 0 : i32
    return %arg0, %c0_i32, %c0_i32_0 : i32, i32, i32
  }
  func.func @transform_1(%arg0: i32) -> (i32, i32) {
    %c0_i32 = arith.constant 0 : i32
    %c0_i32_0 = arith.constant 0 : i32
    %c0_i32_1 = arith.constant 0 : i32
    return %c0_i32, %c0_i32_0 : i32, i32
  }
  func.func @transform_2(%arg0: i32) -> (i32, i32, i32) {
    %c0_i32 = arith.constant 0 : i32
    %c0_i32_0 = arith.constant 0 : i32
    %c0_i32_1 = arith.constant 0 : i32
    return %arg0, %c0_i32, %c0_i32_0 : i32, i32, i32
  }
}

</mosaic_0001>

<bundles_post_ra>
// kernel: forward.1
= control target key start
LH: loop header
LB: loop body
LE: loop exit
PB: predicated region body
PF: predicated region fallthrough
CT: control target
= control target key end

     0   :  { %s3464_s9 = smov 0   ;;  %s4123_s0 = inlined_call_operand.vmem [shape: f32[2,64,64], index: 0, kind: input, shape index: {}]   ;;  %s4124_s1 = inlined_call_operand.vmem [shape: f32[296,128], index: 1, kind: input, shape index: {}]   ;;  %s4125_s2 = inlined_call_operand.vmem [shape: f32[2,1,256], index: 2, kind: output, shape index: {}]  }
   0x1 LB: > { %s3020_s10 = sadd.s32 4294967295, %s3427_s9   ;;  %p3024_p0 = scmp.ge.s32.totalorder %s3427_s9, 1  ;;  %s3427_s9 = sphi %s3464_s9, %s12_s9  }
   0x2   : > { %p112_p1 = scmp.lt.s32.totalorder %s3427_s9, 3 }
   0x4   : > { %p113_p2 = pnand %p3024_p0, %p112_p1 }
   0x5   : > { %p133_p3 = scmp.lt.s32.totalorder (!%p113_p2), %s3020_s10, 1  ;;  %s3431_s14 = smov (!%p113_p2), 93  }
   0x6   : > { %116 = sbr.rel (%p113_p2) target bundleno = 6407 (0x1907), region = 28  ;;  %s3432_s15 = smov (!%p113_p2), 94  }
   0x7   : > { %s3434_s17 = smov (!%p113_p2), 96   ;;  %s3435_s18 = smov (!%p113_p2), 97  }
   0x8   : > { %s3436_s19 = smov (!%p113_p2), 98   ;;  %s3437_s20 = smov (!%p113_p2), 99  }
   0x9   : > { %s3440_s11 = smov (!%p113_p2), 64   ;;  %s3441_s12 = smov (!%p113_p2), 31  }
   0xa   : > { %s3443_s28 = smov (!%p113_p2), 30   ;;  %s3444_s29 = smov (!%p113_p2), 33  }
   0xb   : > { %v166_v0 = vld [vmem:[%s4124_s1] sm:$0xff]  ;;  %vm176_vm0 = vcmask 523264   ;;  %s4127_s10 = smov (!%p133_p3, %s3020_s10), 1  ;;  %v167_v9 = vld [vmem:[%s4124_s1 + $0x8] sm:$0xff]  ;;  %v168_v10 = vld [vmem:[%s4124_s1 + $0x10] sm:$0xff]  ;;  %vm379_vm1 = vcmask 269312  }
   0xc   : > { %3188 = vmatprep.mubr.msk.f32.mxu0 %vm176_vm0, %v166_v0  ;;  %s3068_s13 = sshll.u32 %s4127_s10, 6  ;;  %v169_v11 = vld [vmem:[%s4124_s1 + $0x18] sm:$0xff]  ;;  %v170_v12 = vld [vmem:[%s4124_s1 + $0x20] sm:$0xff]  ;;  %v171_v13 = vld [vmem:[%s4124_s1 + $0x28] sm:$0xff]  ;;  %vm386_vm3 = vcmask 1040384   ;;  %vm479_vm13 = vcmask 785664  }
   0xd   : > { %s137_s16 = scalar_lea.vmem %s4123_s0, %s3068_s13  ;;  %v172_v14 = vld [vmem:[%s4124_s1 + $0x30] sm:$0xff]  ;;  %v173_v15 = vld [vmem:[%s4124_s1 + $0x38] sm:$0xff]  ;;  %v174_v16 = vld [vmem:[%s4124_s1 + $0x40] sm:$0xff]  ;;  %s3430_s13 = smov 32   ;;  %vm604_vm14 = vcmask 916480  }
   0xe   : > { %v165_v1 = vld [vmem:[%s137_s16 + $0x38] sm:$0xff]  ;;  %v164_v2 = vld [vmem:[%s137_s16 + $0x30] sm:$0xff]  ;;  %v163_v3 = vld [vmem:[%s137_s16 + $0x28] sm:$0xff] }
   0xf   : > { %3172 = vmatprep.subr.mxu0 %v165_v1  ;;  %v162_v4 = vld [vmem:[%s137_s16 + $0x20] sm:$0xff]  ;;  %v161_v5 = vld [vmem:[%s137_s16 + $0x18] sm:$0xff]  ;;  %v160_v6 = vld [vmem:[%s137_s16 + $0x10] sm:$0xff] }
  0x10   : > { %3173 = vmatpush3.msra.mxu0 %v165_v1  ;;  %v159_v7 = vld [vmem:[%s137_s16 + $0x8] sm:$0xff]  ;;  %v158_v8 = vld [vmem:[%s137_s16] sm:$0xff]  ;;  %v377_v18 = vld [vmem:[%s4124_s1 + $0x50] sm:$0xff]  ;;  %s3433_s16 = smov 95  }
  0x11   : > { %3174 = vmatprep.subr.mxu0 %v164_v2  ;;  %v175_v17 = vld [vmem:[%s4124_s1 + $0x48] sm:$0xff]  ;;  %3213 = vmatprep.mubr.msk.f32.mxu1 %vm379_vm1, %v377_v18 }
  0x12   : > { %3175 = vmatpush3.msra.mxu0 %v164_v2 }
  0x13   : > { %3176 = vmatprep.subr.mxu0 %v163_v3 }
  0x14   : > { %3177 = vmatpush3.msra.mxu0 %v163_v3 }
  0x15   : > { %3178 = vmatprep.subr.mxu0 %v162_v4 }
  0x16   : > { %3179 = vmatpush3.msra.mxu0 %v162_v4 }
  0x17   : > { %3180 = vmatprep.subr.mxu0 %v161_v5 }
  0x18   : > { %3181 = vmatpush3.msra.mxu0 %v161_v5 }
  0x19   : > { %3182 = vmatprep.subr.mxu0 %v160_v6 }
  0x1a   : > { %3183 = vmatpush3.msra.mxu0 %v160_v6 }
  0x1b   : > { %3184 = vmatprep.subr.mxu0 %v159_v7 }
  0x1c   : > { %3185 = vmatpush3.msra.mxu0 %v159_v7 }
  0x1d   : > { %3186 = vmatprep.subr.mxu0 %v158_v8 }
  0x1e   : > { %3187 = vmatpush3.msra.mxu0 %v158_v8 }
  0x1f   : > { %3189 = vmatmul.mubr.msk.f32.vlgmr.msra.gmra.mxu0 %vm176_vm0, %v167_v9 }
  0x20   : > { %3191 = vmatprep.mubr.msk.f32.mxu0 %vm176_vm0, %v168_v10  ;;  %v378_v10 = vld [vmem:[%s4124_s1 + $0x58] sm:$0xff] }
  0x23   : > { %3192 = vmatmul.mubr.msk.f32.gmra.mxu0 %vm176_vm0, %v169_v11  ;;  %v3429_v11 = vmov 0.0  }
  0x24   : > { %3194 = vmatprep.mubr.msk.f32.mxu0 %vm176_vm0, %v170_v12  ;;  %146 = vst [vmem:[#allocation2 + $0x20] sm:$0xff] %v3429_v11  ;;  %148 = vst [vmem:[#allocation2 + $0x30] sm:$0xff] %v3429_v11 }
  0x25   : > { %142 = vst [vmem:[#allocation2] sm:$0xff] %v3429_v11  ;;  %143 = vst [vmem:[#allocation2 + $0x8] sm:$0xff] %v3429_v11 }
  0x26   : > { %144 = vst [vmem:[#allocation2 + $0x10] sm:$0xff] %v3429_v11  ;;  %145 = vst [vmem:[#allocation2 + $0x18] sm:$0xff] %v3429_v11 }
  0x27   : > { %3195 = vmatmul.mubr.msk.f32.gmra.mxu0 %vm176_vm0, %v171_v13  ;;  %147 = vst [vmem:[#allocation2 + $0x28] sm:$0xff] %v3429_v11  ;;  %150 = vst [vmem:[#allocation2 + $0x40] sm:$0xff] %v3429_v11 }
  0x28   : > { %3197 = vmatprep.mubr.msk.f32.mxu0 %vm176_vm0, %v172_v14  ;;  %154 = vst [vmem:[#allocation2 + $0x60] sm:$0xff] %v3429_v11 }
  0x2b   : > { %3198 = vmatmul.mubr.msk.f32.gmra.mxu0 %vm176_vm0, %v173_v15 }
  0x2c   : > { %3200 = vmatprep.mubr.msk.f32.mxu0 %vm176_vm0, %v174_v16 }
  0x2f   : > { %3201 = vmatmul.mubr.msk.f32.gmra.mxu0 %vm176_vm0, %v175_v17 }
  0xdf   : > { %v3190_v19 = vpop.f32.mrf.mxu0 }
  0xe0   : > { %v323_v31 = vmul.f32 %v3190_v19, %v3190_v19 }
  0xe1   : > { %v273_v20 = vpop.f32.mrf.mxu0 }
  0xe2   : > { %v322_v29 = vmul.f32 %v273_v20, %v273_v20 }
  0xe3   : > { %v3193_v21 = vpop.f32.mrf.mxu0 }
  0xe4   : > { %v325_v41 = vmul.f32 %v3193_v21, %v3193_v21 }
  0xe5   : > { %v283_v22 = vpop.f32.mrf.mxu0 }
  0xe6   : > { %v324_v27 = vmul.f32 %v283_v22, %v283_v22 }
  0xe7   : > { %v3196_v23 = vpop.f32.mrf.mxu0 }
  0xe8   : > { %v327_v25 = vmul.f32 %v3196_v23, %v3196_v23 }
  0xe9   : > { %v293_v24 = vpop.f32.mrf.mxu0 }
  0xea   : > { %v332_v34 = vadd.f32 %v327_v25, %v322_v29  ;;  %v326_v36 = vmul.f32 %v293_v24, %v293_v24  ;;  %v566_v24 = vld [vmem:[%s4124_s1 + $0x60] sm:$0xff]  ;;  %v3545_v25 = vld [vmem:[%s4124_s1 + $0x78] sm:$0xff] }
  0xeb   : > { %v3199_v26 = vpop.f32.mrf.mxu0 }
  0xec   : > { %v329_v28 = vmul.f32 %v3199_v26, %v3199_v26  ;;  %v337_v45 = vadd.f32 1e-09, %v332_v34  ;;  %v3438_v26 = vmov 112  }
  0xed   : > { %v303_v30 = vpop.f32.mrf.mxu0  ;;  %3391 = vset.pattern.permute.xlu1 %v3438_v26  ;;  %3390 = vset.pattern.permute.xlu0 %v3438_v26 }
  0xee   : > { %v334_v32 = vadd.f32 %v329_v28, %v324_v27  ;;  %v328_v33 = vmul.f32 %v303_v30, %v303_v30  ;;  %vm344_vm10 = vcmp.eq.f32.partialorder %v337_v45, inf  ;;  %v347_v8 = vand.u32 2147483648, %v337_v45  ;;  %v3550_v27 = vld [vmem:[%s4124_s1 + $0x70] sm:$0xff]  ;;  %v3557_v28 = vld [vmem:[%s4124_s1 + $0x68] sm:$0xff] }
  0xef   : > { %v3202_v35 = vpop.f32.mrf.mxu0  ;;  %vm346_vm12 = vcmp.eq.f32.partialorder %v337_v45, 0.0 }
  0xf0   : > { %v339_v37 = vadd.f32 1e-09, %v334_v32  ;;  %v333_v38 = vadd.f32 %v328_v33, %v323_v31  ;;  %v331_v39 = vmul.f32 %v3202_v35, %v3202_v35 }
  0xf1   : > { %v313_v40 = vpop.f32.mrf.mxu0 }
  0xf2   : > { %v338_v42 = vadd.f32 1e-09, %v333_v38  ;;  %v336_v43 = vadd.f32 %v331_v39, %v326_v36  ;;  %v330_v44 = vmul.f32 %v313_v40, %v313_v40  ;;  %3402 = vrsqrt.f32 %v339_v37 }
  0xf3   : > { %vm358_vm6 = vcmp.eq.f32.partialorder %v339_v37, inf  ;;  %v361_v2 = vand.u32 2147483648, %v339_v37  ;;  %vm360_vm9 = vcmp.eq.f32.partialorder %v339_v37, 0.0 }
  0xf4   : > { %v341_v46 = vadd.f32 1e-09, %v336_v43  ;;  %v335_v47 = vadd.f32 %v330_v44, %v325_v41  ;;  %3404 = vrsqrt.f32 %v338_v42  ;;  %vm351_vm8 = vcmp.eq.f32.partialorder %v338_v42, inf }
  0xf5   : > { %v354_v5 = vand.u32 2147483648, %v338_v42  ;;  %vm353_vm11 = vcmp.eq.f32.partialorder %v338_v42, 0.0 }
  0xf6   : > { %3406 = vrsqrt.f32 %v341_v46  ;;  %v340_v48 = vadd.f32 1e-09, %v335_v47  ;;  %vm372_vm2 = vcmp.eq.f32.partialorder %v341_v46, inf  ;;  %v375_v56 = vand.u32 2147483648, %v341_v46 }
  0xf7   : > { %3408 = vrsqrt.f32 %v337_v45  ;;  %vm374_vm4 = vcmp.eq.f32.partialorder %v341_v46, 0.0 }
  0xf8   : > { %3410 = vrsqrt.f32 %v340_v48  ;;  %vm365_vm5 = vcmp.eq.f32.partialorder %v340_v48, inf  ;;  %v368_v61 = vand.u32 2147483648, %v340_v48  ;;  %vm367_vm7 = vcmp.eq.f32.partialorder %v340_v48, 0.0 }
  0xff   : > { %v3403_v49 = vpop.eup %3402 }
 0x100   : > { %v357_v54 = vmul.f32 %v3403_v49, %v339_v37 }
 0x101   : > { %v3405_v50 = vpop.eup %3404 }
 0x102   : > { %v350_v59 = vmul.f32 %v3405_v50, %v338_v42  ;;  %v359_v63 = vsel %vm358_vm6, %v339_v37, %v357_v54 }
 0x103   : > { %v3407_v51 = vpop.eup %3406  ;;  %v362_v4 = vsel %vm360_vm9, %v361_v2, %v359_v63 }
 0x104   : > { %v3409_v52 = vpop.eup %3408  ;;  %v371_v53 = vmul.f32 %v3407_v51, %v341_v46  ;;  %v352_v3 = vsel %vm351_vm8, %v338_v42, %v350_v59  ;;  %vm1012_vm8 = vcmask 1048064  }
 0x105   : > { %v3411_v55 = vpop.eup %3410  ;;  %v343_v0 = vmul.f32 %v3409_v52, %v337_v45  ;;  %v355_v7 = vsel %vm353_vm11, %v354_v5, %v352_v3 }
 0x106   : > { %v373_v57 = vsel %vm372_vm2, %v341_v46, %v371_v53  ;;  %v364_v58 = vmul.f32 %v3411_v55, %v340_v48 }
 0x107   : > { %v376_v60 = vsel %vm374_vm4, %v375_v56, %v373_v57  ;;  %v345_v6 = vsel %vm344_vm10, %v337_v45, %v343_v0  ;;  %vm838_vm4 = vcmask 785408  }
 0x108   : > { %3203 = vmatprep.subr.msk.mxu1 %vm386_vm3, %v376_v60  ;;  %v366_v62 = vsel %vm365_vm5, %v340_v48, %v364_v58  ;;  %v348_v9 = vsel %vm346_vm12, %v347_v8, %v345_v6 }
 0x109   : > { %3204 = vmatpush3.msk.msra.mxu1 %vm386_vm3, %v376_v60  ;;  %v369_v1 = vsel %vm367_vm7, %v368_v61, %v366_v62  ;;  %vm1057_vm7 = vcmask 392192  }
 0x10a   : > { %3205 = vmatprep.subr.mxu1 %v369_v1 }
 0x10b   : > { %3206 = vmatpush3.msra.mxu1 %v369_v1 }
 0x10c   : > { %3207 = vmatprep.subr.mxu1 %v362_v4 }
 0x10d   : > { %3208 = vmatpush3.msra.mxu1 %v362_v4 }
 0x10e   : > { %3209 = vmatprep.subr.mxu1 %v355_v7 }
 0x10f   : > { %3210 = vmatpush3.msra.mxu1 %v355_v7 }
 0x110   : > { %3211 = vmatprep.subr.mxu1 %v348_v9 }
 0x111   : > { %3212 = vmatpush3.msra.mxu1 %v348_v9 }
 0x112   : > { %3214 = vmatmul.mubr.msk.f32.vlgmr.msra.gmra.mxu1 %vm379_vm1, %v378_v10 }
 0x113   : > { %3244 = vmatprep.mubr.msk.f32.mxu1 %vm604_vm14, %v566_v24 }
 0x1d2   : > { %v3215_v12 = vpop.f32.mrf.mxu1 }
 0x1d3   : > { %v466_v13 = vmax.f32 %v3215_v12, 1e-05 }
 0x1d4   : > { %v456_v14 = vpop.f32.mrf.mxu1 }
 0x1d5   : > { %3412 = vlog2.f32 %v466_v13  ;;  %v465_v15 = vmax.f32 %v456_v14, 1e-05 }
 0x1d7   : > { %3414 = vlog2.f32 %v465_v15 }
 0x1e2   : > { %v3413_v16 = vpop.eup %3412 }
 0x1e3   : > { %v470_v17 = vmul.f32 0.6931472, %v3413_v16 }
 0x1e4   : > { %v3415_v18 = vpop.eup %3414 }
 0x1e5   : > { %475 = vrot.lane.b32.xlu0 %v470_v17, %s3430_s13  ;;  %v468_v19 = vmul.f32 0.6931472, %v3415_v18 }
 0x1e9   : > { %473 = vrot.lane.b32.xlu0 %v468_v19, %s3430_s13 }
 0x257   : > { %v476_v20 = vpop.permute.xlu0 %475 }
 0x258   : > { %481 = vst.msk [vmem:[#allocation2 + $0x20] sm:$0xff] %vm479_vm13, %v476_v20 }
 0x25b   : > { %v474_v21 = vpop.permute.xlu0 %473 }
 0x25c   : > { %480 = vst.msk [vmem:[#allocation2] sm:$0xff] %vm479_vm13, %v474_v21  ;;  %v802_v21 = vld [vmem:[%s4124_s1 + $0x80] sm:$0xff] }
 0x25d   : > { %3274 = vmatprep.mubr.msk.f32.mxu0 %vm838_vm4, %v802_v21 }
 0x25f   : > { %v555_v22 = vld [vmem:[#allocation2 + $0x20] sm:$0xff] }
 0x260   : > { %560 = vrot.lane.b32.xlu1 %v555_v22, %s3431_s14  ;;  %548 = vrot.lane.b32.xlu0 %v555_v22, %s3432_s15 }
 0x263   : > { %v554_v23 = vld [vmem:[#allocation2] sm:$0xff] }
 0x264   : > { %536 = vrot.lane.b32.xlu0 %v555_v22, %s3433_s16  ;;  %558 = vrot.lane.b32.xlu1 %v554_v23, %s3431_s14 }
 0x268   : > { %524 = vrot.lane.b32.xlu0 %v555_v22, %s3434_s17  ;;  %546 = vrot.lane.b32.xlu1 %v554_v23, %s3432_s15 }
 0x26c   : > { %512 = vrot.lane.b32.xlu0 %v555_v22, %s3435_s18  ;;  %534 = vrot.lane.b32.xlu1 %v554_v23, %s3433_s16 }
 0x270   : > { %500 = vrot.lane.b32.xlu0 %v555_v22, %s3436_s19  ;;  %522 = vrot.lane.b32.xlu1 %v554_v23, %s3434_s17 }
 0x274   : > { %488 = vrot.lane.b32.xlu0 %v555_v22, %s3437_s20  ;;  %510 = vrot.lane.b32.xlu1 %v554_v23, %s3435_s18  ;;  %v3607_v22 = vld [vmem:[%s4124_s1 + $0x98] sm:$0xff] }
 0x278   : > { %498 = vrot.lane.b32.xlu1 %v554_v23, %s3436_s19  ;;  %601 = vperm.xlu0 %3390, %v3545_v25  }
 0x27c   : > { %486 = vrot.lane.b32.xlu1 %v554_v23, %s3437_s20  ;;  %586 = vperm.xlu0 %3390, %v566_v24   ;;  %v3439_v23 = vmov 96   ;;  %v3612_v24 = vld [vmem:[%s4124_s1 + $0x90] sm:$0xff] }
 0x280   : > { %596 = vperm.xlu1 %3391, %v3550_v27   ;;  %3393 = vset.pattern.permute.xlu0 %v3439_v23 }
 0x284   : > { %591 = vperm.xlu1 %3391, %v3557_v28  }
 0x288   : > { %3392 = vset.pattern.permute.xlu1 %v3439_v23 }
 0x2d2   : > { %v561_v29 = vpop.permute.xlu1 %560  ;;  %v549_v30 = vpop.permute.xlu0 %548 }
 0x2d3   : > { %565 = vst.msk [vmem:[#allocation3 + $0xd0] sm:$0xff] %vm176_vm0, %v561_v29  ;;  %553 = vst.msk [vmem:[#allocation3 + $0xb0] sm:$0xff] %vm176_vm0, %v549_v30 }
 0x2d6   : > { %v559_v31 = vpop.permute.xlu1 %558  ;;  %v537_v32 = vpop.permute.xlu0 %536 }
 0x2d7   : > { %564 = vst.msk [vmem:[#allocation3 + $0xc0] sm:$0xff] %vm176_vm0, %v559_v31  ;;  %541 = vst.msk [vmem:[#allocation3 + $0x90] sm:$0xff] %vm176_vm0, %v537_v32 }
 0x2da   : > { %v547_v33 = vpop.permute.xlu1 %546  ;;  %v525_v34 = vpop.permute.xlu0 %524  ;;  %v583_v35 = vld [vmem:[#allocation3 + $0xd0] sm:$0xff] }
 0x2db   : > { %552 = vst.msk [vmem:[#allocation3 + $0xa0] sm:$0xff] %vm176_vm0, %v547_v33  ;;  %529 = vst.msk [vmem:[#allocation3 + $0x70] sm:$0xff] %vm176_vm0, %v525_v34  ;;  %3216 = vmatprep.subr.mxu1 %v583_v35  ;;  %v581_v39 = vld [vmem:[#allocation3 + $0xb0] sm:$0xff] }
 0x2dc   : > { %3217 = vmatpush3.msra.mxu1 %v583_v35 }
 0x2de   : > { %v535_v36 = vpop.permute.xlu1 %534  ;;  %v513_v37 = vpop.permute.xlu0 %512  ;;  %v582_v38 = vld [vmem:[#allocation3 + $0xc0] sm:$0xff]  ;;  %v579_v43 = vld [vmem:[#allocation3 + $0x90] sm:$0xff] }
 0x2df   : > { %540 = vst.msk [vmem:[#allocation3 + $0x80] sm:$0xff] %vm176_vm0, %v535_v36  ;;  %517 = vst.msk [vmem:[#allocation3 + $0x50] sm:$0xff] %vm176_vm0, %v513_v37  ;;  %3218 = vmatprep.subr.mxu1 %v582_v38 }
 0x2e0   : > { %3219 = vmatpush3.msra.mxu1 %v582_v38 }
 0x2e1   : > { %3220 = vmatprep.subr.mxu1 %v581_v39 }
 0x2e2   : > { %v523_v40 = vpop.permute.xlu1 %522  ;;  %3221 = vmatpush3.msra.mxu1 %v581_v39  ;;  %v501_v41 = vpop.permute.xlu0 %500  ;;  %v580_v42 = vld [vmem:[#allocation3 + $0xa0] sm:$0xff]  ;;  %v577_v47 = vld [vmem:[#allocation3 + $0x70] sm:$0xff] }
 0x2e3   : > { %528 = vst.msk [vmem:[#allocation3 + $0x60] sm:$0xff] %vm176_vm0, %v523_v40  ;;  %505 = vst.msk [vmem:[#allocation3 + $0x30] sm:$0xff] %vm176_vm0, %v501_v41  ;;  %3222 = vmatprep.subr.mxu1 %v580_v42 }
 0x2e4   : > { %3223 = vmatpush3.msra.mxu1 %v580_v42 }
 0x2e5   : > { %3224 = vmatprep.subr.mxu1 %v579_v43 }
 0x2e6   : > { %v511_v44 = vpop.permute.xlu1 %510  ;;  %3225 = vmatpush3.msra.mxu1 %v579_v43  ;;  %v489_v45 = vpop.permute.xlu0 %488  ;;  %v578_v46 = vld [vmem:[#allocation3 + $0x80] sm:$0xff]  ;;  %v575_v50 = vld [vmem:[#allocation3 + $0x50] sm:$0xff] }
 0x2e7   : > { %516 = vst.msk [vmem:[#allocation3 + $0x40] sm:$0xff] %vm176_vm0, %v511_v44  ;;  %493 = vst.msk [vmem:[#allocation3 + $0x10] sm:$0xff] %vm176_vm0, %v489_v45  ;;  %3226 = vmatprep.subr.mxu1 %v578_v46 }
 0x2e8   : > { %3227 = vmatpush3.msra.mxu1 %v578_v46 }
 0x2e9   : > { %3228 = vmatprep.subr.mxu1 %v577_v47 }
 0x2ea   : > { %v499_v48 = vpop.permute.xlu1 %498  ;;  %3229 = vmatpush3.msra.mxu1 %v577_v47  ;;  %v576_v49 = vld [vmem:[#allocation3 + $0x60] sm:$0xff]  ;;  %v573_v53 = vld [vmem:[#allocation3 + $0x30] sm:$0xff] }
 0x2eb   : > { %504 = vst.msk [vmem:[#allocation3 + $0x20] sm:$0xff] %vm176_vm0, %v499_v48  ;;  %3230 = vmatprep.subr.mxu1 %v576_v49 }
 0x2ec   : > { %3231 = vmatpush3.msra.mxu1 %v576_v49 }
 0x2ed   : > { %3232 = vmatprep.subr.mxu1 %v575_v50 }
 0x2ee   : > { %v487_v51 = vpop.permute.xlu1 %486  ;;  %3233 = vmatpush3.msra.mxu1 %v575_v50  ;;  %v574_v52 = vld [vmem:[#allocation3 + $0x40] sm:$0xff]  ;;  %v571_v55 = vld [vmem:[#allocation3 + $0x10] sm:$0xff] }
 0x2ef   : > { %492 = vst.msk [vmem:[#allocation3] sm:$0xff] %vm176_vm0, %v487_v51  ;;  %3234 = vmatprep.subr.mxu1 %v574_v52 }
 0x2f0   : > { %3235 = vmatpush3.msra.mxu1 %v574_v52 }
 0x2f1   : > { %3236 = vmatprep.subr.mxu1 %v573_v53 }
 0x2f2   : > { %3237 = vmatpush3.msra.mxu1 %v573_v53  ;;  %v572_v54 = vld [vmem:[#allocation3 + $0x20] sm:$0xff] }
 0x2f3   : > { %3238 = vmatprep.subr.mxu1 %v572_v54  ;;  %v602_v58 = vpop.permute.xlu0 %601 }
 0x2f4   : > { %3239 = vmatpush3.msra.mxu1 %v572_v54 }
 0x2f5   : > { %3240 = vmatprep.subr.mxu1 %v571_v55 }
 0x2f6   : > { %3241 = vmatpush3.msra.mxu1 %v571_v55  ;;  %v570_v56 = vld [vmem:[#allocation3] sm:$0xff] }
 0x2f7   : > { %3242 = vmatprep.subr.mxu1 %v570_v56  ;;  %v587_v62 = vpop.permute.xlu0 %586 }
 0x2f8   : > { %3243 = vmatpush3.msra.mxu1 %v570_v56 }
 0x2f9   : > { %3245 = vmatmul.mubr.msk.f32.vlgmr.msra.gmra.mxu1 %vm604_vm14, %v3557_v28 }
 0x2fa   : > { %3247 = vmatprep.mubr.msk.f32.mxu1 %vm604_vm14, %v3550_v27 }
 0x2fb   : > { %v597_v57 = vpop.permute.xlu1 %596 }
 0x2fd   : > { %3248 = vmatmul.mubr.msk.f32.gmra.mxu1 %vm604_vm14, %v3545_v25  ;;  %v3619_v25 = vld [vmem:[%s4124_s1 + $0x88] sm:$0xff] }
 0x2ff   : > { %v592_v60 = vpop.permute.xlu1 %591 }
 0x3b9   : > { %v3246_v59 = vpop.f32.mrf.mxu1 }
 0x3ba   : > { %v685_v0 = vadd.f32 %v3246_v59, %v592_v60 }
 0x3bb   : > { %v679_v61 = vpop.f32.mrf.mxu1 }
 0x3bc   : > { %v680_v3 = vadd.f32 %v679_v61, %v587_v62  ;;  %v703_v6 = vmul.f32 0.1, %v685_v0  ;;  %vm699_vm2 = vcmp.ge.f32.partialorder %v685_v0, 0.0 }
 0x3bd   : > { %v3249_v63 = vpop.f32.mrf.mxu1 }
 0x3be   : > { %v695_v1 = vadd.f32 %v3249_v63, %v602_v58  ;;  %v702_v10 = vmul.f32 0.1, %v680_v3  ;;  %vm698_vm3 = vcmp.ge.f32.partialorder %v680_v3, 0.0  ;;  %v707_v11 = vsel %vm699_vm2, %v685_v0, %v703_v6 }
 0x3bf   : > { %v689_v2 = vpop.f32.mrf.mxu1 }
 0x3c0   : > { %v705_v4 = vmul.f32 0.1, %v695_v1  ;;  %v690_v5 = vadd.f32 %v689_v2, %v597_v57  ;;  %vm701_vm15 = vcmp.ge.f32.partialorder %v695_v1, 0.0  ;;  %v706_v12 = vsel %vm698_vm3, %v680_v3, %v702_v10 }
 0x3c2   : > { %v704_v7 = vmul.f32 0.1, %v690_v5  ;;  %v709_v8 = vsel %vm701_vm15, %v695_v1, %v705_v4  ;;  %vm700_vm1 = vcmp.ge.f32.partialorder %v690_v5, 0.0 }
 0x3c3   : > { %720 = vrot.lane.b32.xlu1 %v709_v8, %s3430_s13 }
 0x3c4   : > { %v708_v9 = vsel %vm700_vm1, %v690_v5, %v704_v7 }
 0x3c5   : > { %718 = vrot.lane.b32.xlu0 %v708_v9, %s3430_s13 }
 0x3c7   : > { %716 = vrot.lane.b32.xlu1 %v707_v11, %s3430_s13 }
 0x3c9   : > { %714 = vrot.lane.b32.xlu0 %v706_v12, %s3430_s13 }
 0x435   : > { %v721_v13 = vpop.permute.xlu1 %720 }
 0x436   : > { %729 = vst.msk [vmem:[#allocation2 + $0x60] sm:$0xff] %vm479_vm13, %v721_v13 }
 0x437   : > { %v719_v14 = vpop.permute.xlu0 %718 }
 0x438   : > { %728 = vst.msk [vmem:[#allocation2 + $0x40] sm:$0xff] %vm479_vm13, %v719_v14  ;;  %v1039_v14 = vld [vmem:[%s4124_s1 + $0xa0] sm:$0xff] }
 0x439   : > { %v717_v15 = vpop.permute.xlu1 %716  ;;  %3292 = vmatprep.mubr.msk.f32.mxu1 %vm1057_vm7, %v1039_v14 }
 0x43a   : > { %727 = vst.msk [vmem:[#allocation2 + $0x20] sm:$0xff] %vm479_vm13, %v717_v15  ;;  %v3442_v15 = vmov 48  }
 0x43b   : > { %v715_v16 = vpop.permute.xlu0 %714 }
 0x43c   : > { %726 = vst.msk [vmem:[#allocation2] sm:$0xff] %vm479_vm13, %v715_v16  ;;  %v1040_v16 = vld [vmem:[%s4124_s1 + $0xa8] sm:$0xff] }
 0x43d   : > { %v781_v17 = vld [vmem:[#allocation2 + $0x60] sm:$0xff] }
 0x43e   : > { %792 = vrot.lane.b32.xlu1 %v781_v17, %s3433_s16 }
 0x43f   : > { %v780_v18 = vld [vmem:[#allocation2 + $0x40] sm:$0xff] }
 0x440   : > { %790 = vrot.lane.b32.xlu0 %v780_v18, %s3433_s16 }
 0x441   : > { %v779_v19 = vld [vmem:[#allocation2 + $0x20] sm:$0xff] }
 0x442   : > { %788 = vrot.lane.b32.xlu1 %v779_v19, %s3433_s16 }
 0x443   : > { %v778_v20 = vld [vmem:[#allocation2] sm:$0xff] }
 0x444   : > { %786 = vrot.lane.b32.xlu0 %v778_v20, %s3433_s16 }
 0x446   : > { %768 = vrot.lane.b32.xlu1 %v781_v17, %s3434_s17 }
 0x448   : > { %766 = vrot.lane.b32.xlu0 %v780_v18, %s3434_s17 }
 0x44a   : > { %764 = vrot.lane.b32.xlu1 %v779_v19, %s3434_s17 }
 0x44c   : > { %762 = vrot.lane.b32.xlu0 %v778_v20, %s3434_s17 }
 0x44e   : > { %744 = vrot.lane.b32.xlu1 %v781_v17, %s3435_s18 }
 0x450   : > { %742 = vrot.lane.b32.xlu0 %v780_v18, %s3435_s18 }
 0x452   : > { %740 = vrot.lane.b32.xlu1 %v779_v19, %s3435_s18 }
 0x454   : > { %738 = vrot.lane.b32.xlu0 %v778_v20, %s3435_s18 }
 0x456   : > { %835 = vperm.xlu1 %3392, %v3607_v22  }
 0x458   : > { %830 = vperm.xlu0 %3393, %v3612_v24  }
 0x45a   : > { %825 = vperm.xlu1 %3392, %v3619_v25  }
 0x45c   : > { %3394 = vset.pattern.permute.xlu0 %v3442_v15 }
 0x45e   : > { %820 = vperm.xlu1 %3392, %v802_v21  }
 0x462   : > { %3395 = vset.pattern.permute.xlu1 %v3442_v15 }
 0x4b0   : > { %v793_v26 = vpop.permute.xlu1 %792 }
 0x4b1   : > { %801 = vst.msk [vmem:[#allocation3 + $0xb0] sm:$0xff] %vm176_vm0, %v793_v26 }
 0x4b2   : > { %v791_v27 = vpop.permute.xlu0 %790 }
 0x4b3   : > { %800 = vst.msk [vmem:[#allocation3 + $0xa0] sm:$0xff] %vm176_vm0, %v791_v27 }
 0x4b4   : > { %v789_v28 = vpop.permute.xlu1 %788 }
 0x4b5   : > { %799 = vst.msk [vmem:[#allocation3 + $0x90] sm:$0xff] %vm176_vm0, %v789_v28 }
 0x4b6   : > { %v787_v29 = vpop.permute.xlu0 %786 }
 0x4b7   : > { %798 = vst.msk [vmem:[#allocation3 + $0x80] sm:$0xff] %vm176_vm0, %v787_v29 }
 0x4b8   : > { %v769_v30 = vpop.permute.xlu1 %768  ;;  %v817_v31 = vld [vmem:[#allocation3 + $0xb0] sm:$0xff] }
 0x4b9   : > { %777 = vst.msk [vmem:[#allocation3 + $0x70] sm:$0xff] %vm176_vm0, %v769_v30  ;;  %3250 = vmatprep.subr.mxu0 %v817_v31 }
 0x4ba   : > { %3251 = vmatpush3.msra.mxu0 %v817_v31  ;;  %v767_v32 = vpop.permute.xlu0 %766  ;;  %v816_v33 = vld [vmem:[#allocation3 + $0xa0] sm:$0xff] }
 0x4bb   : > { %776 = vst.msk [vmem:[#allocation3 + $0x60] sm:$0xff] %vm176_vm0, %v767_v32  ;;  %3252 = vmatprep.subr.mxu0 %v816_v33 }
 0x4bc   : > { %v765_v34 = vpop.permute.xlu1 %764  ;;  %3253 = vmatpush3.msra.mxu0 %v816_v33  ;;  %v815_v35 = vld [vmem:[#allocation3 + $0x90] sm:$0xff] }
 0x4bd   : > { %775 = vst.msk [vmem:[#allocation3 + $0x50] sm:$0xff] %vm176_vm0, %v765_v34  ;;  %3254 = vmatprep.subr.mxu0 %v815_v35 }
 0x4be   : > { %3255 = vmatpush3.msra.mxu0 %v815_v35  ;;  %v763_v36 = vpop.permute.xlu0 %762  ;;  %v814_v37 = vld [vmem:[#allocation3 + $0x80] sm:$0xff] }
 0x4bf   : > { %774 = vst.msk [vmem:[#allocation3 + $0x40] sm:$0xff] %vm176_vm0, %v763_v36  ;;  %3256 = vmatprep.subr.mxu0 %v814_v37 }
 0x4c0   : > { %v745_v38 = vpop.permute.xlu1 %744  ;;  %3257 = vmatpush3.msra.mxu0 %v814_v37  ;;  %v813_v39 = vld [vmem:[#allocation3 + $0x70] sm:$0xff] }
 0x4c1   : > { %753 = vst.msk [vmem:[#allocation3 + $0x30] sm:$0xff] %vm176_vm0, %v745_v38  ;;  %3258 = vmatprep.subr.mxu0 %v813_v39 }
 0x4c2   : > { %3259 = vmatpush3.msra.mxu0 %v813_v39  ;;  %v743_v40 = vpop.permute.xlu0 %742  ;;  %v812_v41 = vld [vmem:[#allocation3 + $0x60] sm:$0xff] }
 0x4c3   : > { %752 = vst.msk [vmem:[#allocation3 + $0x20] sm:$0xff] %vm176_vm0, %v743_v40  ;;  %3260 = vmatprep.subr.mxu0 %v812_v41 }
 0x4c4   : > { %v741_v42 = vpop.permute.xlu1 %740  ;;  %3261 = vmatpush3.msra.mxu0 %v812_v41  ;;  %v811_v43 = vld [vmem:[#allocation3 + $0x50] sm:$0xff] }
 0x4c5   : > { %751 = vst.msk [vmem:[#allocation3 + $0x10] sm:$0xff] %vm176_vm0, %v741_v42  ;;  %3262 = vmatprep.subr.mxu0 %v811_v43 }
 0x4c6   : > { %3263 = vmatpush3.msra.mxu0 %v811_v43  ;;  %v739_v44 = vpop.permute.xlu0 %738  ;;  %v810_v45 = vld [vmem:[#allocation3 + $0x40] sm:$0xff] }
 0x4c7   : > { %750 = vst.msk [vmem:[#allocation3] sm:$0xff] %vm176_vm0, %v739_v44  ;;  %3264 = vmatprep.subr.mxu0 %v810_v45 }
 0x4c8   : > { %3265 = vmatpush3.msra.mxu0 %v810_v45  ;;  %v809_v46 = vld [vmem:[#allocation3 + $0x30] sm:$0xff] }
 0x4c9   : > { %3266 = vmatprep.subr.mxu0 %v809_v46  ;;  %v1233_v45 = vld [vmem:[%s4124_s1 + $0xb0] sm:$0xff] }
 0x4ca   : > { %3267 = vmatpush3.msra.mxu0 %v809_v46  ;;  %v808_v47 = vld [vmem:[#allocation3 + $0x20] sm:$0xff] }
 0x4cb   : > { %3268 = vmatprep.subr.mxu0 %v808_v47 }
 0x4cc   : > { %3269 = vmatpush3.msra.mxu0 %v808_v47  ;;  %v807_v48 = vld [vmem:[#allocation3 + $0x10] sm:$0xff] }
 0x4cd   : > { %3270 = vmatprep.subr.mxu0 %v807_v48 }
 0x4ce   : > { %3271 = vmatpush3.msra.mxu0 %v807_v48  ;;  %v806_v49 = vld [vmem:[#allocation3] sm:$0xff] }
 0x4cf   : > { %3272 = vmatprep.subr.mxu0 %v806_v49 }
 0x4d0   : > { %3273 = vmatpush3.msra.mxu0 %v806_v49 }
 0x4d1   : > { %3275 = vmatmul.mubr.msk.f32.vlgmr.msra.gmra.mxu0 %vm838_vm4, %v3619_v25  ;;  %v836_v52 = vpop.permute.xlu1 %835 }
 0x4d2   : > { %3277 = vmatprep.mubr.msk.f32.mxu0 %vm838_vm4, %v3612_v24 }
 0x4d3   : > { %v831_v54 = vpop.permute.xlu0 %830 }
 0x4d5   : > { %3278 = vmatmul.mubr.msk.f32.gmra.mxu0 %vm838_vm4, %v3607_v22  ;;  %v826_v58 = vpop.permute.xlu1 %825 }
 0x4d6   : > { %3307 = vmatprep.mubr.msk.f32.mxu0 %vm1057_vm7, %v1233_v45 }
 0x4d9   : > { %v821_v59 = vpop.permute.xlu1 %820 }
 0x591   : > { %v3276_v50 = vpop.f32.mrf.mxu0 }
 0x592   : > { %v919_v60 = vadd.f32 %v3276_v50, %v826_v58 }
 0x593   : > { %v913_v51 = vpop.f32.mrf.mxu0 }
 0x594   : > { %v914_v62 = vadd.f32 %v913_v51, %v821_v59 }
 0x595   : > { %v3279_v53 = vpop.f32.mrf.mxu0 }
 0x596   : > { %v929_v55 = vadd.f32 %v3279_v53, %v836_v52 }
 0x597   : > { %v923_v56 = vpop.f32.mrf.mxu0 }
 0x598   : > { %v924_v57 = vadd.f32 %v923_v56, %v831_v54  ;;  %936 = vrot.lane.b32.xlu0 %v929_v55, %s3440_s11  ;;  %v1234_v54 = vld [vmem:[%s4124_s1 + $0xb8] sm:$0xff] }
 0x59a   : > { %934 = vrot.lane.b32.xlu1 %v924_v57, %s3440_s11 }
 0x60a   : > { %v937_v61 = vpop.permute.xlu0 %936 }
 0x60b   : > { %v3643_v63 = vsel %vm176_vm0, %v919_v60, %v937_v61 }
 0x60c   : > { %v945_v0 = vmul.f32 0.1, %v3643_v63  ;;  %v935_v1 = vpop.permute.xlu1 %934  ;;  %vm943_vm5 = vcmp.ge.f32.partialorder %v3643_v63, 0.0 }
 0x60d   : > { %v3648_v2 = vsel %vm176_vm0, %v914_v62, %v935_v1 }
 0x60e   : > { %v944_v3 = vmul.f32 0.1, %v3648_v2  ;;  %v947_v4 = vsel %vm943_vm5, %v3643_v63, %v945_v0  ;;  %vm942_vm6 = vcmp.ge.f32.partialorder %v3648_v2, 0.0  ;;  %vm2035_vm5 = vcmask 195584  }
 0x60f   : > { %952 = vrot.lane.b32.xlu1 %v947_v4, %s3430_s13  ;;  %960 = vrot.lane.b32.xlu0 %v947_v4, %s3434_s17 }
 0x610   : > { %v946_v5 = vsel %vm942_vm6, %v3648_v2, %v944_v3 }
 0x613   : > { %950 = vrot.lane.b32.xlu1 %v946_v5, %s3430_s13  ;;  %958 = vrot.lane.b32.xlu0 %v946_v5, %s3434_s17 }
 0x681   : > { %v953_v6 = vpop.permute.xlu1 %952  ;;  %v961_v7 = vpop.permute.xlu0 %960 }
 0x682   : > { %957 = vst.msk [vmem:[#allocation2 + $0x20] sm:$0xff] %vm479_vm13, %v953_v6  ;;  %965 = vst.msk [vmem:[#allocation2 + $0x28] sm:$0xff] %vm479_vm13, %v961_v7 }
 0x685   : > { %v951_v8 = vpop.permute.xlu1 %950  ;;  %v959_v9 = vpop.permute.xlu0 %958 }
 0x686   : > { %956 = vst.msk [vmem:[#allocation2] sm:$0xff] %vm479_vm13, %v951_v8  ;;  %964 = vst.msk [vmem:[#allocation2 + $0x8] sm:$0xff] %vm479_vm13, %v959_v9 }
 0x689   : > { %v1028_v10 = vld [vmem:[#allocation2 + $0x20] sm:$0xff]  ;;  %v991_v11 = vld [vmem:[#allocation2 + $0x28] sm:$0xff] }
 0x68a   : > { %1033 = vrot.lane.b32.xlu1 %v1028_v10, %s3441_s12  ;;  %996 = vrot.lane.b32.xlu0 %v991_v11, %s3434_s17 }
 0x68d   : > { %v1027_v12 = vld [vmem:[#allocation2] sm:$0xff]  ;;  %v990_v13 = vld [vmem:[#allocation2 + $0x8] sm:$0xff] }
 0x68e   : > { %1021 = vrot.lane.b32.xlu1 %v991_v11, %s3430_s13  ;;  %984 = vrot.lane.b32.xlu0 %v1028_v10, %s3434_s17 }
 0x692   : > { %1008 = vrot.lane.b32.xlu1 %v1028_v10, %s3430_s13  ;;  %972 = vrot.lane.b32.xlu0 %v991_v11, %s3435_s18 }
 0x696   : > { %1031 = vrot.lane.b32.xlu1 %v1027_v12, %s3441_s12  ;;  %994 = vrot.lane.b32.xlu0 %v990_v13, %s3434_s17 }
 0x69a   : > { %1019 = vrot.lane.b32.xlu1 %v990_v13, %s3430_s13  ;;  %982 = vrot.lane.b32.xlu0 %v1027_v12, %s3434_s17 }
 0x69e   : > { %1006 = vrot.lane.b32.xlu1 %v1027_v12, %s3430_s13  ;;  %970 = vrot.lane.b32.xlu0 %v990_v13, %s3435_s18 }
 0x6a2   : > { %1054 = vperm.xlu0 %3394, %v1040_v16   ;;  %1049 = vperm.xlu1 %3395, %v1039_v14  }
 0x6fc   : > { %v1034_v17 = vpop.permute.xlu1 %1033  ;;  %v997_v18 = vpop.permute.xlu0 %996 }
 0x6fd   : > { %1001 = vst.msk [vmem:[#allocation3 + $0x50] sm:$0xff] %vm176_vm0, %v997_v18 }
 0x6fe   : > { %1038 = vst.msk [vmem:[#allocation3 + $0x50] sm:$0xff] %vm1012_vm8, %v1034_v17 }
 0x700   : > { %v1022_v19 = vpop.permute.xlu1 %1021  ;;  %v985_v20 = vpop.permute.xlu0 %984 }
 0x701   : > { %989 = vst.msk [vmem:[#allocation3 + $0x30] sm:$0xff] %vm176_vm0, %v985_v20 }
 0x702   : > { %1026 = vst.msk [vmem:[#allocation3 + $0x30] sm:$0xff] %vm1012_vm8, %v1022_v19 }
 0x704   : > { %v1009_v21 = vpop.permute.xlu1 %1008  ;;  %v973_v22 = vpop.permute.xlu0 %972 }
 0x705   : > { %977 = vst.msk [vmem:[#allocation3 + $0x10] sm:$0xff] %vm176_vm0, %v973_v22  ;;  %v1046_v23 = vld [vmem:[#allocation3 + $0x50] sm:$0xff] }
 0x706   : > { %1014 = vst.msk [vmem:[#allocation3 + $0x10] sm:$0xff] %vm1012_vm8, %v1009_v21  ;;  %3280 = vmatprep.subr.mxu1 %v1046_v23 }
 0x707   : > { %3281 = vmatpush3.msra.mxu1 %v1046_v23 }
 0x708   : > { %v1032_v24 = vpop.permute.xlu1 %1031  ;;  %v995_v25 = vpop.permute.xlu0 %994 }
 0x709   : > { %1000 = vst.msk [vmem:[#allocation3 + $0x40] sm:$0xff] %vm176_vm0, %v995_v25  ;;  %v1044_v31 = vld [vmem:[#allocation3 + $0x30] sm:$0xff] }
 0x70a   : > { %1037 = vst.msk [vmem:[#allocation3 + $0x40] sm:$0xff] %vm1012_vm8, %v1032_v24 }
 0x70c   : > { %v1020_v26 = vpop.permute.xlu1 %1019  ;;  %v983_v27 = vpop.permute.xlu0 %982 }
 0x70d   : > { %988 = vst.msk [vmem:[#allocation3 + $0x20] sm:$0xff] %vm176_vm0, %v983_v27  ;;  %v1042_v33 = vld [vmem:[#allocation3 + $0x10] sm:$0xff] }
 0x70e   : > { %1025 = vst.msk [vmem:[#allocation3 + $0x20] sm:$0xff] %vm1012_vm8, %v1020_v26 }
 0x710   : > { %v1007_v28 = vpop.permute.xlu1 %1006  ;;  %v971_v29 = vpop.permute.xlu0 %970 }
 0x711   : > { %976 = vst.msk [vmem:[#allocation3] sm:$0xff] %vm176_vm0, %v971_v29  ;;  %v1045_v30 = vld [vmem:[#allocation3 + $0x40] sm:$0xff] }
 0x712   : > { %1013 = vst.msk [vmem:[#allocation3] sm:$0xff] %vm1012_vm8, %v1007_v28  ;;  %3282 = vmatprep.subr.mxu1 %v1045_v30 }
 0x713   : > { %3283 = vmatpush3.msra.mxu1 %v1045_v30  ;;  %v1429_v30 = vld [vmem:[%s4124_s1 + $0xc8] sm:$0xff] }
 0x714   : > { %3284 = vmatprep.subr.mxu1 %v1044_v31 }
 0x715   : > { %3285 = vmatpush3.msra.mxu1 %v1044_v31  ;;  %v1043_v32 = vld [vmem:[#allocation3 + $0x20] sm:$0xff] }
 0x716   : > { %3286 = vmatprep.subr.mxu1 %v1043_v32 }
 0x717   : > { %3287 = vmatpush3.msra.mxu1 %v1043_v32 }
 0x718   : > { %3288 = vmatprep.subr.mxu1 %v1042_v33 }
 0x719   : > { %3289 = vmatpush3.msra.mxu1 %v1042_v33  ;;  %v1041_v34 = vld [vmem:[#allocation3] sm:$0xff] }
 0x71a   : > { %3290 = vmatprep.subr.mxu1 %v1041_v34 }
 0x71b   : > { %3291 = vmatpush3.msra.mxu1 %v1041_v34 }
 0x71c   : > { %3293 = vmatmul.mubr.msk.f32.vlgmr.msra.gmra.mxu1 %vm1057_vm7, %v1040_v16 }
 0x71d   : > { %v1055_v35 = vpop.permute.xlu0 %1054  ;;  %v1050_v37 = vpop.permute.xlu1 %1049 }
 0x7dc   : > { %v3294_v36 = vpop.f32.mrf.mxu1 }
 0x7dd   : > { %v1134_v38 = vadd.f32 %v3294_v36, %v1055_v35 }
 0x7de   : > { %v1128_v39 = vpop.f32.mrf.mxu1 }
 0x7df   : > { %v1129_v40 = vadd.f32 %v1128_v39, %v1050_v37  ;;  %vm1138_vm9 = vcmp.ge.f32.partialorder %v1134_v38, 0.0  ;;  %v1140_v41 = vmul.f32 0.1, %v1134_v38 }
 0x7e1   : > { %v1139_v42 = vmul.f32 0.1, %v1129_v40  ;;  %v1142_v43 = vsel %vm1138_vm9, %v1134_v38, %v1140_v41  ;;  %vm1137_vm10 = vcmp.ge.f32.partialorder %v1129_v40, 0.0 }
 0x7e2   : > { %1147 = vrot.lane.b32.xlu0 %v1142_v43, %s3430_s13  ;;  %1155 = vrot.lane.b32.xlu1 %v1142_v43, %s3434_s17 }
 0x7e3   : > { %v1141_v44 = vsel %vm1137_vm10, %v1129_v40, %v1139_v42 }
 0x7e6   : > { %1145 = vrot.lane.b32.xlu0 %v1141_v44, %s3430_s13  ;;  %1153 = vrot.lane.b32.xlu1 %v1141_v44, %s3434_s17 }
 0x854   : > { %v1148_v46 = vpop.permute.xlu0 %1147  ;;  %v1156_v47 = vpop.permute.xlu1 %1155 }
 0x855   : > { %1152 = vst.msk [vmem:[#allocation2 + $0x20] sm:$0xff] %vm479_vm13, %v1148_v46  ;;  %1160 = vst.msk [vmem:[#allocation2 + $0x28] sm:$0xff] %vm479_vm13, %v1156_v47 }
 0x858   : > { %v1146_v48 = vpop.permute.xlu0 %1145  ;;  %v1154_v49 = vpop.permute.xlu1 %1153 }
 0x859   : > { %1151 = vst.msk [vmem:[#allocation2] sm:$0xff] %vm479_vm13, %v1146_v48  ;;  %1159 = vst.msk [vmem:[#allocation2 + $0x8] sm:$0xff] %vm479_vm13, %v1154_v49 }
 0x85c   : > { %v1222_v50 = vld [vmem:[#allocation2 + $0x20] sm:$0xff]  ;;  %v1186_v51 = vld [vmem:[#allocation2 + $0x28] sm:$0xff] }
 0x85d   : > { %1227 = vrot.lane.b32.xlu0 %v1222_v50, %s3441_s12  ;;  %1191 = vrot.lane.b32.xlu1 %v1186_v51, %s3434_s17 }
 0x860   : > { %v1221_v52 = vld [vmem:[#allocation2] sm:$0xff]  ;;  %v1185_v53 = vld [vmem:[#allocation2 + $0x8] sm:$0xff] }
 0x861   : > { %1215 = vrot.lane.b32.xlu0 %v1186_v51, %s3430_s13  ;;  %1179 = vrot.lane.b32.xlu1 %v1222_v50, %s3434_s17 }
 0x865   : > { %1203 = vrot.lane.b32.xlu0 %v1222_v50, %s3430_s13  ;;  %1167 = vrot.lane.b32.xlu1 %v1186_v51, %s3435_s18 }
 0x869   : > { %1225 = vrot.lane.b32.xlu0 %v1221_v52, %s3441_s12  ;;  %1189 = vrot.lane.b32.xlu1 %v1185_v53, %s3434_s17 }
 0x86d   : > { %1213 = vrot.lane.b32.xlu0 %v1185_v53, %s3430_s13  ;;  %1177 = vrot.lane.b32.xlu1 %v1221_v52, %s3434_s17 }
 0x871   : > { %1201 = vrot.lane.b32.xlu0 %v1221_v52, %s3430_s13  ;;  %1165 = vrot.lane.b32.xlu1 %v1185_v53, %s3435_s18 }
 0x875   : > { %1243 = vperm.xlu0 %3394, %v1233_v45   ;;  %1248 = vperm.xlu1 %3395, %v1234_v54  }
 0x8cf   : > { %v1228_v55 = vpop.permute.xlu0 %1227  ;;  %v1192_v56 = vpop.permute.xlu1 %1191 }
 0x8d0   : > { %1196 = vst.msk [vmem:[#allocation3 + $0x50] sm:$0xff] %vm176_vm0, %v1192_v56 }
 0x8d1   : > { %1232 = vst.msk [vmem:[#allocation3 + $0x50] sm:$0xff] %vm1012_vm8, %v1228_v55 }
 0x8d3   : > { %v1216_v57 = vpop.permute.xlu0 %1215  ;;  %v1180_v58 = vpop.permute.xlu1 %1179 }
 0x8d4   : > { %1184 = vst.msk [vmem:[#allocation3 + $0x30] sm:$0xff] %vm176_vm0, %v1180_v58 }
 0x8d5   : > { %1220 = vst.msk [vmem:[#allocation3 + $0x30] sm:$0xff] %vm1012_vm8, %v1216_v57 }
 0x8d7   : > { %v1204_v59 = vpop.permute.xlu0 %1203  ;;  %v1168_v60 = vpop.permute.xlu1 %1167 }
 0x8d8   : > { %1172 = vst.msk [vmem:[#allocation3 + $0x10] sm:$0xff] %vm176_vm0, %v1168_v60  ;;  %v1240_v61 = vld [vmem:[#allocation3 + $0x50] sm:$0xff] }
 0x8d9   : > { %1208 = vst.msk [vmem:[#allocation3 + $0x10] sm:$0xff] %vm1012_vm8, %v1204_v59  ;;  %3295 = vmatprep.subr.mxu0 %v1240_v61  ;;  %v1621_v59 = vld [vmem:[%s4124_s1 + $0xd0] sm:$0xff] }
 0x8da   : > { %3296 = vmatpush3.msra.mxu0 %v1240_v61 }
 0x8db   : > { %v1226_v62 = vpop.permute.xlu0 %1225  ;;  %v1190_v0 = vpop.permute.xlu1 %1189 }
 0x8dc   : > { %1195 = vst.msk [vmem:[#allocation3 + $0x40] sm:$0xff] %vm176_vm0, %v1190_v0  ;;  %v1238_v7 = vld [vmem:[#allocation3 + $0x30] sm:$0xff] }
 0x8dd   : > { %1231 = vst.msk [vmem:[#allocation3 + $0x40] sm:$0xff] %vm1012_vm8, %v1226_v62 }
 0x8df   : > { %v1214_v1 = vpop.permute.xlu0 %1213  ;;  %v1178_v3 = vpop.permute.xlu1 %1177 }
 0x8e0   : > { %1183 = vst.msk [vmem:[#allocation3 + $0x20] sm:$0xff] %vm176_vm0, %v1178_v3  ;;  %v1236_v9 = vld [vmem:[#allocation3 + $0x10] sm:$0xff] }
 0x8e1   : > { %1219 = vst.msk [vmem:[#allocation3 + $0x20] sm:$0xff] %vm1012_vm8, %v1214_v1 }
 0x8e3   : > { %v1202_v4 = vpop.permute.xlu0 %1201  ;;  %v1166_v5 = vpop.permute.xlu1 %1165 }
 0x8e4   : > { %1171 = vst.msk [vmem:[#allocation3] sm:$0xff] %vm176_vm0, %v1166_v5  ;;  %v1239_v6 = vld [vmem:[#allocation3 + $0x40] sm:$0xff] }
 0x8e5   : > { %1207 = vst.msk [vmem:[#allocation3] sm:$0xff] %vm1012_vm8, %v1202_v4  ;;  %3297 = vmatprep.subr.mxu0 %v1239_v6 }
 0x8e6   : > { %3298 = vmatpush3.msra.mxu0 %v1239_v6  ;;  %v1622_v6 = vld [vmem:[%s4124_s1 + $0xd8] sm:$0xff] }
 0x8e7   : > { %3299 = vmatprep.subr.mxu0 %v1238_v7 }
 0x8e8   : > { %3300 = vmatpush3.msra.mxu0 %v1238_v7  ;;  %v1237_v8 = vld [vmem:[#allocation3 + $0x20] sm:$0xff] }
 0x8e9   : > { %3301 = vmatprep.subr.mxu0 %v1237_v8 }
 0x8ea   : > { %3302 = vmatpush3.msra.mxu0 %v1237_v8 }
 0x8eb   : > { %3303 = vmatprep.subr.mxu0 %v1236_v9 }
 0x8ec   : > { %3304 = vmatpush3.msra.mxu0 %v1236_v9  ;;  %v1235_v10 = vld [vmem:[#allocation3] sm:$0xff] }
 0x8ed   : > { %3305 = vmatprep.subr.mxu0 %v1235_v10 }
 0x8ee   : > { %3306 = vmatpush3.msra.mxu0 %v1235_v10 }
 0x8ef   : > { %3308 = vmatmul.mubr.msk.f32.vlgmr.msra.gmra.mxu0 %vm1057_vm7, %v1234_v54 }
 0x8f0   : > { %v1249_v11 = vpop.permute.xlu1 %1248  ;;  %v1244_v14 = vpop.permute.xlu0 %1243  ;;  %3337 = vmatprep.mubr.msk.f32.mxu0 %vm1057_vm7, %v1621_v59 }
 0x9af   : > { %v3309_v12 = vpop.f32.mrf.mxu0 }
 0x9b0   : > { %v1327_v13 = vadd.f32 %v3309_v12, %v1249_v11 }
 0x9b1   : > { %v1321_v15 = vpop.f32.mrf.mxu0 }
 0x9b2   : > { %v3735_v16 = vadd.f32 %v1327_v13, %v3643_v63  ;;  %v1322_v17 = vadd.f32 %v1321_v15, %v1244_v14 }
 0x9b4   : > { %v3738_v18 = vadd.f32 %v1322_v17, %v3648_v2  ;;  %vm1333_vm11 = vcmp.ge.f32.partialorder %v3735_v16, 0.0  ;;  %v1335_v19 = vmul.f32 0.1, %v3735_v16  ;;  %v1428_v2 = vld [vmem:[%s4124_s1 + $0xc0] sm:$0xff] }
 0x9b5   : > { %3322 = vmatprep.mubr.msk.f32.mxu1 %vm1057_vm7, %v1428_v2 }
 0x9b6   : > { %v1337_v20 = vsel %vm1333_vm11, %v3735_v16, %v1335_v19  ;;  %v1334_v21 = vmul.f32 0.1, %v3738_v18  ;;  %vm1332_vm12 = vcmp.ge.f32.partialorder %v3738_v18, 0.0 }
 0x9b7   : > { %1342 = vrot.lane.b32.xlu0 %v1337_v20, %s3430_s13  ;;  %1350 = vrot.lane.b32.xlu1 %v1337_v20, %s3434_s17 }
 0x9b8   : > { %v1336_v63 = vsel %vm1332_vm12, %v3738_v18, %v1334_v21 }
 0x9bb   : > { %1340 = vrot.lane.b32.xlu0 %v1336_v63, %s3430_s13  ;;  %1348 = vrot.lane.b32.xlu1 %v1336_v63, %s3434_s17 }
 0xa29   : > { %v1343_v22 = vpop.permute.xlu0 %1342  ;;  %v1351_v23 = vpop.permute.xlu1 %1350 }
 0xa2a   : > { %1347 = vst.msk [vmem:[#allocation2 + $0x20] sm:$0xff] %vm479_vm13, %v1343_v22  ;;  %1355 = vst.msk [vmem:[#allocation2 + $0x28] sm:$0xff] %vm479_vm13, %v1351_v23 }
 0xa2d   : > { %v1341_v24 = vpop.permute.xlu0 %1340  ;;  %v1349_v25 = vpop.permute.xlu1 %1348 }
 0xa2e   : > { %1346 = vst.msk [vmem:[#allocation2] sm:$0xff] %vm479_vm13, %v1341_v24  ;;  %1354 = vst.msk [vmem:[#allocation2 + $0x8] sm:$0xff] %vm479_vm13, %v1349_v25  ;;  %v3824_v25 = vld [vmem:[#allocation2 + $0x30] sm:$0xff] }
 0xa31   : > { %v1417_v26 = vld [vmem:[#allocation2 + $0x20] sm:$0xff]  ;;  %v1381_v27 = vld [vmem:[#allocation2 + $0x28] sm:$0xff] }
 0xa32   : > { %1422 = vrot.lane.b32.xlu0 %v1417_v26, %s3443_s28  ;;  %1386 = vrot.lane.b32.xlu1 %v1381_v27, %s3433_s16 }
 0xa35   : > { %v1416_v28 = vld [vmem:[#allocation2] sm:$0xff]  ;;  %v1380_v29 = vld [vmem:[#allocation2 + $0x8] sm:$0xff] }
 0xa36   : > { %1410 = vrot.lane.b32.xlu0 %v1381_v27, %s3430_s13  ;;  %1374 = vrot.lane.b32.xlu1 %v1417_v26, %s3434_s17 }
 0xa3a   : > { %1398 = vrot.lane.b32.xlu0 %v1417_v26, %s3444_s29  ;;  %1362 = vrot.lane.b32.xlu1 %v1381_v27, %s3436_s19 }
 0xa3e   : > { %1420 = vrot.lane.b32.xlu0 %v1416_v28, %s3443_s28  ;;  %1384 = vrot.lane.b32.xlu1 %v1380_v29, %s3433_s16 }
 0xa42   : > { %1408 = vrot.lane.b32.xlu0 %v1380_v29, %s3430_s13  ;;  %1372 = vrot.lane.b32.xlu1 %v1416_v28, %s3434_s17 }
 0xa46   : > { %1396 = vrot.lane.b32.xlu0 %v1416_v28, %s3444_s29  ;;  %1360 = vrot.lane.b32.xlu1 %v1380_v29, %s3436_s19 }
 0xa4a   : > { %1438 = vperm.xlu0 %3394, %v1428_v2   ;;  %1443 = vperm.xlu1 %3395, %v1429_v30  }
 0xaa4   : > { %v1423_v31 = vpop.permute.xlu0 %1422  ;;  %v1387_v32 = vpop.permute.xlu1 %1386 }
 0xaa5   : > { %1391 = vst.msk [vmem:[#allocation3 + $0x50] sm:$0xff] %vm176_vm0, %v1387_v32 }
 0xaa6   : > { %1427 = vst.msk [vmem:[#allocation3 + $0x50] sm:$0xff] %vm1012_vm8, %v1423_v31 }
 0xaa8   : > { %v1411_v33 = vpop.permute.xlu0 %1410  ;;  %v1375_v34 = vpop.permute.xlu1 %1374 }
 0xaa9   : > { %1379 = vst.msk [vmem:[#allocation3 + $0x30] sm:$0xff] %vm176_vm0, %v1375_v34 }
 0xaaa   : > { %1415 = vst.msk [vmem:[#allocation3 + $0x30] sm:$0xff] %vm1012_vm8, %v1411_v33 }
 0xaac   : > { %v1399_v35 = vpop.permute.xlu0 %1398  ;;  %v1363_v36 = vpop.permute.xlu1 %1362 }
 0xaad   : > { %1367 = vst.msk [vmem:[#allocation3 + $0x10] sm:$0xff] %vm176_vm0, %v1363_v36  ;;  %v1435_v37 = vld [vmem:[#allocation3 + $0x50] sm:$0xff] }
 0xaae   : > { %1403 = vst.msk [vmem:[#allocation3 + $0x10] sm:$0xff] %vm1012_vm8, %v1399_v35  ;;  %3310 = vmatprep.subr.mxu1 %v1435_v37 }
 0xaaf   : > { %3311 = vmatpush3.msra.mxu1 %v1435_v37 }
 0xab0   : > { %v1421_v38 = vpop.permute.xlu0 %1420  ;;  %v1385_v39 = vpop.permute.xlu1 %1384 }
 0xab1   : > { %1390 = vst.msk [vmem:[#allocation3 + $0x40] sm:$0xff] %vm176_vm0, %v1385_v39  ;;  %v1433_v45 = vld [vmem:[#allocation3 + $0x30] sm:$0xff] }
 0xab2   : > { %1426 = vst.msk [vmem:[#allocation3 + $0x40] sm:$0xff] %vm1012_vm8, %v1421_v38 }
 0xab4   : > { %v1409_v40 = vpop.permute.xlu0 %1408  ;;  %v1373_v41 = vpop.permute.xlu1 %1372 }
 0xab5   : > { %1378 = vst.msk [vmem:[#allocation3 + $0x20] sm:$0xff] %vm176_vm0, %v1373_v41  ;;  %v1431_v47 = vld [vmem:[#allocation3 + $0x10] sm:$0xff] }
 0xab6   : > { %1414 = vst.msk [vmem:[#allocation3 + $0x20] sm:$0xff] %vm1012_vm8, %v1409_v40 }
 0xab8   : > { %v1397_v42 = vpop.permute.xlu0 %1396  ;;  %v1361_v43 = vpop.permute.xlu1 %1360 }
 0xab9   : > { %1366 = vst.msk [vmem:[#allocation3] sm:$0xff] %vm176_vm0, %v1361_v43  ;;  %v1434_v44 = vld [vmem:[#allocation3 + $0x40] sm:$0xff] }
 0xaba   : > { %1402 = vst.msk [vmem:[#allocation3] sm:$0xff] %vm1012_vm8, %v1397_v42  ;;  %3312 = vmatprep.subr.mxu1 %v1434_v44 }
 0xabb   : > { %3313 = vmatpush3.msra.mxu1 %v1434_v44  ;;  %v1792_v44 = vld [vmem:[%s4124_s1 + $0xe0] sm:$0xff] }
 0xabc   : > { %3314 = vmatprep.subr.mxu1 %v1433_v45 }
 0xabd   : > { %3315 = vmatpush3.msra.mxu1 %v1433_v45  ;;  %v1432_v46 = vld [vmem:[#allocation3 + $0x20] sm:$0xff]  ;;  %v1795_v45 = vld [vmem:[%s4124_s1 + $0xf8] sm:$0xff] }
 0xabe   : > { %3316 = vmatprep.subr.mxu1 %v1432_v46 }
 0xabf   : > { %3317 = vmatpush3.msra.mxu1 %v1432_v46  ;;  %v3445_v46 = vmov 64  }
 0xac0   : > { %3318 = vmatprep.subr.mxu1 %v1431_v47 }
 0xac1   : > { %3319 = vmatpush3.msra.mxu1 %v1431_v47  ;;  %v1430_v48 = vld [vmem:[#allocation3] sm:$0xff]  ;;  %v1793_v47 = vld [vmem:[%s4124_s1 + $0xe8] sm:$0xff] }
 0xac2   : > { %3320 = vmatprep.subr.mxu1 %v1430_v48 }
 0xac3   : > { %3321 = vmatpush3.msra.mxu1 %v1430_v48  ;;  %v1794_v48 = vld [vmem:[%s4124_s1 + $0xf0] sm:$0xff] }
 0xac4   : > { %3323 = vmatmul.mubr.msk.f32.vlgmr.msra.gmra.mxu1 %vm1057_vm7, %v1429_v30 }
 0xac5   : > { %v1444_v49 = vpop.permute.xlu1 %1443  ;;  %v1439_v52 = vpop.permute.xlu0 %1438  ;;  %3356 = vmatprep.mubr.msk.f32.mxu1 %vm176_vm0, %v1792_v44 }
 0xb84   : > { %v3324_v50 = vpop.f32.mrf.mxu1 }
 0xb85   : > { %v1522_v51 = vadd.f32 %v3324_v50, %v1444_v49 }
 0xb86   : > { %v1516_v53 = vpop.f32.mrf.mxu1 }
 0xb87   : > { %v1528_v54 = vmul.f32 0.1, %v1522_v51  ;;  %v1517_v55 = vadd.f32 %v1516_v53, %v1439_v52  ;;  %vm1526_vm14 = vcmp.ge.f32.partialorder %v1522_v51, 0.0 }
 0xb89   : > { %v1527_v56 = vmul.f32 0.1, %v1517_v55  ;;  %v1530_v57 = vsel %vm1526_vm14, %v1522_v51, %v1528_v54  ;;  %vm1525_vm15 = vcmp.ge.f32.partialorder %v1517_v55, 0.0 }
 0xb8a   : > { %1535 = vrot.lane.b32.xlu0 %v1530_v57, %s3430_s13  ;;  %1543 = vrot.lane.b32.xlu1 %v1530_v57, %s3434_s17 }
 0xb8b   : > { %v1529_v58 = vsel %vm1525_vm15, %v1517_v55, %v1527_v56 }
 0xb8e   : > { %1533 = vrot.lane.b32.xlu0 %v1529_v58, %s3430_s13  ;;  %1541 = vrot.lane.b32.xlu1 %v1529_v58, %s3434_s17 }
 0xbfc   : > { %v1536_v60 = vpop.permute.xlu0 %1535  ;;  %v1544_v61 = vpop.permute.xlu1 %1543 }
 0xbfd   : > { %1540 = vst.msk [vmem:[#allocation2 + $0x20] sm:$0xff] %vm479_vm13, %v1536_v60  ;;  %1548 = vst.msk [vmem:[#allocation2 + $0x28] sm:$0xff] %vm479_vm13, %v1544_v61 }
 0xc00   : > { %v1534_v62 = vpop.permute.xlu0 %1533  ;;  %v1542_v0 = vpop.permute.xlu1 %1541 }
 0xc01   : > { %1539 = vst.msk [vmem:[#allocation2] sm:$0xff] %vm479_vm13, %v1534_v62  ;;  %1547 = vst.msk [vmem:[#allocation2 + $0x8] sm:$0xff] %vm479_vm13, %v1542_v0 }
 0xc04   : > { %v1610_v1 = vld [vmem:[#allocation2 + $0x20] sm:$0xff]  ;;  %v1574_v3 = vld [vmem:[#allocation2 + $0x28] sm:$0xff] }
 0xc05   : > { %1615 = vrot.lane.b32.xlu0 %v1610_v1, %s3441_s12  ;;  %1579 = vrot.lane.b32.xlu1 %v1574_v3, %s3434_s17 }
 0xc08   : > { %v1609_v4 = vld [vmem:[#allocation2] sm:$0xff]  ;;  %v1573_v5 = vld [vmem:[#allocation2 + $0x8] sm:$0xff] }
 0xc09   : > { %1603 = vrot.lane.b32.xlu0 %v1574_v3, %s3430_s13  ;;  %1567 = vrot.lane.b32.xlu1 %v1610_v1, %s3434_s17 }
 0xc0d   : > { %1591 = vrot.lane.b32.xlu0 %v1610_v1, %s3430_s13  ;;  %1555 = vrot.lane.b32.xlu1 %v1574_v3, %s3435_s18 }
 0xc11   : > { %1613 = vrot.lane.b32.xlu0 %v1609_v4, %s3441_s12  ;;  %1577 = vrot.lane.b32.xlu1 %v1573_v5, %s3434_s17 }
 0xc15   : > { %1601 = vrot.lane.b32.xlu0 %v1573_v5, %s3430_s13  ;;  %1565 = vrot.lane.b32.xlu1 %v1609_v4, %s3434_s17 }
 0xc19   : > { %1589 = vrot.lane.b32.xlu0 %v1609_v4, %s3430_s13  ;;  %1553 = vrot.lane.b32.xlu1 %v1573_v5, %s3435_s18 }
 0xc1d   : > { %1631 = vperm.xlu0 %3394, %v1621_v59   ;;  %1636 = vperm.xlu1 %3395, %v1622_v6  }
 0xc21   : > { %3396 = vset.pattern.permute.xlu1 %v3445_v46  ;;  %3397 = vset.pattern.permute.xlu0 %v3445_v46 }
 0xc77   : > { %v1616_v7 = vpop.permute.xlu0 %1615  ;;  %v1580_v8 = vpop.permute.xlu1 %1579 }
 0xc78   : > { %1584 = vst.msk [vmem:[#allocation3 + $0x50] sm:$0xff] %vm176_vm0, %v1580_v8 }
 0xc79   : > { %1620 = vst.msk [vmem:[#allocation3 + $0x50] sm:$0xff] %vm1012_vm8, %v1616_v7 }
 0xc7b   : > { %v1604_v9 = vpop.permute.xlu0 %1603  ;;  %v1568_v10 = vpop.permute.xlu1 %1567 }
 0xc7c   : > { %1572 = vst.msk [vmem:[#allocation3 + $0x30] sm:$0xff] %vm176_vm0, %v1568_v10 }
 0xc7d   : > { %1608 = vst.msk [vmem:[#allocation3 + $0x30] sm:$0xff] %vm1012_vm8, %v1604_v9 }
 0xc7f   : > { %v1592_v11 = vpop.permute.xlu0 %1591  ;;  %v1556_v12 = vpop.permute.xlu1 %1555 }
 0xc80   : > { %1560 = vst.msk [vmem:[#allocation3 + $0x10] sm:$0xff] %vm176_vm0, %v1556_v12  ;;  %v1628_v13 = vld [vmem:[#allocation3 + $0x50] sm:$0xff] }
 0xc81   : > { %1596 = vst.msk [vmem:[#allocation3 + $0x10] sm:$0xff] %vm1012_vm8, %v1592_v11  ;;  %3325 = vmatprep.subr.mxu0 %v1628_v13 }
 0xc82   : > { %3326 = vmatpush3.msra.mxu0 %v1628_v13 }
 0xc83   : > { %v1614_v14 = vpop.permute.xlu0 %1613  ;;  %v1578_v15 = vpop.permute.xlu1 %1577 }
 0xc84   : > { %1583 = vst.msk [vmem:[#allocation3 + $0x40] sm:$0xff] %vm176_vm0, %v1578_v15  ;;  %v1626_v2 = vld [vmem:[#allocation3 + $0x30] sm:$0xff] }
 0xc85   : > { %1619 = vst.msk [vmem:[#allocation3 + $0x40] sm:$0xff] %vm1012_vm8, %v1614_v14 }
 0xc87   : > { %v1602_v17 = vpop.permute.xlu0 %1601  ;;  %v1566_v19 = vpop.permute.xlu1 %1565 }
 0xc88   : > { %1571 = vst.msk [vmem:[#allocation3 + $0x20] sm:$0xff] %vm176_vm0, %v1566_v19  ;;  %v1624_v23 = vld [vmem:[#allocation3 + $0x10] sm:$0xff] }
 0xc89   : > { %1607 = vst.msk [vmem:[#allocation3 + $0x20] sm:$0xff] %vm1012_vm8, %v1602_v17 }
 0xc8b   : > { %v1590_v20 = vpop.permute.xlu0 %1589  ;;  %v1554_v21 = vpop.permute.xlu1 %1553 }
 0xc8c   : > { %1559 = vst.msk [vmem:[#allocation3] sm:$0xff] %vm176_vm0, %v1554_v21  ;;  %v1627_v63 = vld [vmem:[#allocation3 + $0x40] sm:$0xff] }
 0xc8d   : > { %1595 = vst.msk [vmem:[#allocation3] sm:$0xff] %vm1012_vm8, %v1590_v20  ;;  %3327 = vmatprep.subr.mxu0 %v1627_v63 }
 0xc8e   : > { %3328 = vmatpush3.msra.mxu0 %v1627_v63 }
 0xc8f   : > { %3329 = vmatprep.subr.mxu0 %v1626_v2 }
 0xc90   : > { %3330 = vmatpush3.msra.mxu0 %v1626_v2  ;;  %v1625_v22 = vld [vmem:[#allocation3 + $0x20] sm:$0xff] }
 0xc91   : > { %3331 = vmatprep.subr.mxu0 %v1625_v22 }
 0xc92   : > { %3332 = vmatpush3.msra.mxu0 %v1625_v22 }
 0xc93   : > { %3333 = vmatprep.subr.mxu0 %v1624_v23 }
 0xc94   : > { %3334 = vmatpush3.msra.mxu0 %v1624_v23  ;;  %v1623_v24 = vld [vmem:[#allocation3] sm:$0xff] }
 0xc95   : > { %3335 = vmatprep.subr.mxu0 %v1623_v24 }
 0xc96   : > { %3336 = vmatpush3.msra.mxu0 %v1623_v24 }
 0xc97   : > { %3338 = vmatmul.mubr.msk.f32.vlgmr.msra.gmra.mxu0 %vm1057_vm7, %v1622_v6 }
 0xc98   : > { %2283 = vmatprep.mubr.f32.mxu0 %v3824_v25  ;;  %v1637_v26 = vpop.permute.xlu1 %1636  ;;  %v1632_v29 = vpop.permute.xlu0 %1631 }
 0xd57   : > { %v3339_v27 = vpop.f32.mrf.mxu0 }
 0xd58   : > { %v1715_v28 = vadd.f32 %v3339_v27, %v1637_v26 }
 0xd59   : > { %v1709_v30 = vpop.f32.mrf.mxu0 }
 0xd5a   : > { %v1719_v31 = vadd.f32 %v1715_v28, %v3735_v16  ;;  %v1710_v32 = vadd.f32 %v1709_v30, %v1632_v29 }
 0xd5c   : > { %v1723_v33 = vmul.f32 0.1, %v1719_v31  ;;  %v1718_v34 = vadd.f32 %v1710_v32, %v3738_v18  ;;  %vm1721_vm1 = vcmp.ge.f32.partialorder %v1719_v31, 0.0  ;;  %v3446_v32 = vmov 24  }
 0xd5e   : > { %v1722_v35 = vmul.f32 0.1, %v1718_v34  ;;  %v1725_v36 = vsel %vm1721_vm1, %v1719_v31, %v1723_v33  ;;  %vm1720_vm2 = vcmp.ge.f32.partialorder %v1718_v34, 0.0  ;;  %v2023_v33 = vld [vmem:[%s4124_s1 + $0x100] sm:$0xff] }
 0xd5f   : > { %1730 = vrot.lane.b32.xlu1 %v1725_v36, %s3430_s13 }
 0xd60   : > { %v1724_v37 = vsel %vm1720_vm2, %v1718_v34, %v1722_v35 }
 0xd61   : > { %1728 = vrot.lane.b32.xlu0 %v1724_v37, %s3430_s13 }
 0xd63   : > { %1738 = vrot.lane.b32.xlu1 %v1725_v36, %s3434_s17 }
 0xd65   : > { %1736 = vrot.lane.b32.xlu0 %v1724_v37, %s3434_s17 }
 0xdd1   : > { %v1731_v38 = vpop.permute.xlu1 %1730 }
 0xdd2   : > { %1735 = vst.msk [vmem:[#allocation2 + $0x20] sm:$0xff] %vm479_vm13, %v1731_v38 }
 0xdd3   : > { %v1729_v16 = vpop.permute.xlu0 %1728 }
 0xdd4   : > { %1734 = vst.msk [vmem:[#allocation2] sm:$0xff] %vm479_vm13, %v1729_v16 }
 0xdd5   : > { %v1739_v18 = vpop.permute.xlu1 %1738 }
 0xdd6   : > { %1743 = vst.msk [vmem:[#allocation2 + $0x28] sm:$0xff] %vm479_vm13, %v1739_v18 }
 0xdd7   : > { %v1737_v39 = vpop.permute.xlu0 %1736 }
 0xdd8   : > { %1742 = vst.msk [vmem:[#allocation2 + $0x8] sm:$0xff] %vm479_vm13, %v1737_v39 }
 0xdd9   : > { %v1781_v40 = vld [vmem:[#allocation2 + $0x20] sm:$0xff] }
 0xdda   : > { %1786 = vrot.lane.b32.xlu1 %v1781_v40, %s3433_s16 }
 0xddb   : > { %v1780_v41 = vld [vmem:[#allocation2] sm:$0xff] }
 0xddc   : > { %1784 = vrot.lane.b32.xlu0 %v1780_v41, %s3433_s16 }
 0xddd   : > { %v1769_v42 = vld [vmem:[#allocation2 + $0x28] sm:$0xff] }
 0xdde   : > { %1774 = vrot.lane.b32.xlu1 %v1769_v42, %s3434_s17 }
 0xddf   : > { %v1768_v43 = vld [vmem:[#allocation2 + $0x8] sm:$0xff] }
 0xde0   : > { %1772 = vrot.lane.b32.xlu0 %v1768_v43, %s3434_s17 }
 0xde2   : > { %1762 = vrot.lane.b32.xlu1 %v1781_v40, %s3434_s17 }
 0xde4   : > { %1760 = vrot.lane.b32.xlu0 %v1780_v41, %s3434_s17 }
 0xde6   : > { %1750 = vrot.lane.b32.xlu1 %v1769_v42, %s3435_s18 }
 0xde8   : > { %1748 = vrot.lane.b32.xlu0 %v1768_v43, %s3435_s18 }
 0xdea   : > { %1821 = vperm.xlu1 %3396, %v1795_v45  }
 0xdec   : > { %1811 = vperm.xlu0 %3397, %v1793_v47  }
 0xdee   : > { %1816 = vperm.xlu1 %3396, %v1794_v48  }
 0xdf0   : > { %3398 = vset.pattern.permute.xlu0 %v3446_v32 }
 0xdf2   : > { %1806 = vperm.xlu1 %3396, %v1792_v44  }
 0xdf6   : > { %3399 = vset.pattern.permute.xlu1 %v3446_v32 }
 0xe4c   : > { %v1787_v49 = vpop.permute.xlu1 %1786 }
 0xe4d   : > { %1791 = vst.msk [vmem:[#allocation3 + $0x70] sm:$0xff] %vm176_vm0, %v1787_v49 }
 0xe4e   : > { %v1785_v50 = vpop.permute.xlu0 %1784 }
 0xe4f   : > { %1790 = vst.msk [vmem:[#allocation3 + $0x60] sm:$0xff] %vm176_vm0, %v1785_v50 }
 0xe50   : > { %v1775_v51 = vpop.permute.xlu1 %1774 }
 0xe51   : > { %1779 = vst.msk [vmem:[#allocation3 + $0x50] sm:$0xff] %vm176_vm0, %v1775_v51 }
 0xe52   : > { %v1773_v52 = vpop.permute.xlu0 %1772 }
 0xe53   : > { %1778 = vst.msk [vmem:[#allocation3 + $0x40] sm:$0xff] %vm176_vm0, %v1773_v52 }
 0xe54   : > { %v1763_v53 = vpop.permute.xlu1 %1762  ;;  %v1803_v54 = vld [vmem:[#allocation3 + $0x70] sm:$0xff] }
 0xe55   : > { %1767 = vst.msk [vmem:[#allocation3 + $0x30] sm:$0xff] %vm176_vm0, %v1763_v53  ;;  %3340 = vmatprep.subr.mxu1 %v1803_v54 }
 0xe56   : > { %v1761_v55 = vpop.permute.xlu0 %1760  ;;  %3341 = vmatpush3.msra.mxu1 %v1803_v54  ;;  %v1802_v56 = vld [vmem:[#allocation3 + $0x60] sm:$0xff] }
 0xe57   : > { %1766 = vst.msk [vmem:[#allocation3 + $0x20] sm:$0xff] %vm176_vm0, %v1761_v55  ;;  %3342 = vmatprep.subr.mxu1 %v1802_v56 }
 0xe58   : > { %3343 = vmatpush3.msra.mxu1 %v1802_v56  ;;  %v1751_v57 = vpop.permute.xlu1 %1750  ;;  %v1801_v58 = vld [vmem:[#allocation3 + $0x50] sm:$0xff] }
 0xe59   : > { %1755 = vst.msk [vmem:[#allocation3 + $0x10] sm:$0xff] %vm176_vm0, %v1751_v57  ;;  %3344 = vmatprep.subr.mxu1 %v1801_v58 }
 0xe5a   : > { %v1749_v59 = vpop.permute.xlu0 %1748  ;;  %3345 = vmatpush3.msra.mxu1 %v1801_v58  ;;  %v1800_v60 = vld [vmem:[#allocation3 + $0x40] sm:$0xff] }
 0xe5b   : > { %1754 = vst.msk [vmem:[#allocation3] sm:$0xff] %vm176_vm0, %v1749_v59  ;;  %3346 = vmatprep.subr.mxu1 %v1800_v60 }
 0xe5c   : > { %3347 = vmatpush3.msra.mxu1 %v1800_v60  ;;  %v1799_v61 = vld [vmem:[#allocation3 + $0x30] sm:$0xff] }
 0xe5d   : > { %3348 = vmatprep.subr.mxu1 %v1799_v61 }
 0xe5e   : > { %3349 = vmatpush3.msra.mxu1 %v1799_v61  ;;  %v1798_v62 = vld [vmem:[#allocation3 + $0x20] sm:$0xff] }
 0xe5f   : > { %3350 = vmatprep.subr.mxu1 %v1798_v62 }
 0xe60   : > { %3351 = vmatpush3.msra.mxu1 %v1798_v62  ;;  %v1797_v0 = vld [vmem:[#allocation3 + $0x10] sm:$0xff] }
 0xe61   : > { %3352 = vmatprep.subr.mxu1 %v1797_v0 }
 0xe62   : > { %3353 = vmatpush3.msra.mxu1 %v1797_v0  ;;  %v1796_v1 = vld [vmem:[#allocation3] sm:$0xff] }
 0xe63   : > { %3354 = vmatprep.subr.mxu1 %v1796_v1 }
 0xe64   : > { %3355 = vmatpush3.msra.mxu1 %v1796_v1 }
 0xe65   : > { %3357 = vmatmul.mubr.msk.f32.vlgmr.msra.gmra.mxu1 %vm176_vm0, %v1793_v47  ;;  %v1822_v7 = vpop.permute.xlu1 %1821 }
 0xe66   : > { %3359 = vmatprep.mubr.msk.f32.mxu1 %vm176_vm0, %v1794_v48 }
 0xe67   : > { %v1812_v3 = vpop.permute.xlu0 %1811 }
 0xe69   : > { %3360 = vmatmul.mubr.msk.f32.gmra.mxu1 %vm176_vm0, %v1795_v45  ;;  %v1817_v10 = vpop.permute.xlu1 %1816 }
 0xe6a   : > { %2102 = vmatprep.mubr.f32.mxu1 %v3824_v25 }
 0xe6d   : > { %v1807_v11 = vpop.permute.xlu1 %1806 }
 0xf25   : > { %v3358_v4 = vpop.f32.mrf.mxu1 }
 0xf26   : > { %v1904_v5 = vadd.f32 %v3358_v4, %v1812_v3 }
 0xf27   : > { %v1898_v6 = vpop.f32.mrf.mxu1 }
 0xf28   : > { %1918 = vrot.lane.b32.xlu1 %v1904_v5, %s3440_s11  ;;  %v1899_v12 = vadd.f32 %v1898_v6, %v1807_v11  ;;  %v2205_v5 = vld [vmem:[%s4124_s1 + $0x108] sm:$0xff] }
 0xf29   : > { %v3361_v8 = vpop.f32.mrf.mxu1 }
 0xf2a   : > { %v1914_v9 = vadd.f32 %v3361_v8, %v1822_v7 }
 0xf2b   : > { %v1908_v13 = vpop.f32.mrf.mxu1 }
 0xf2c   : > { %1922 = vrot.lane.b32.xlu0 %v1914_v9, %s3440_s11  ;;  %v1909_v19 = vadd.f32 %v1908_v13, %v1817_v10 }
 0xf9a   : > { %v1919_v14 = vpop.permute.xlu1 %1918 }
 0xf9b   : > { %v3873_v15 = vsel %vm176_vm0, %v1899_v12, %v1919_v14 }
 0xf9c   : > { %v1929_v17 = vmul.f32 0.1, %v3873_v15  ;;  %vm1927_vm3 = vcmp.ge.f32.partialorder %v3873_v15, 0.0 }
 0xf9e   : > { %v1923_v20 = vpop.permute.xlu0 %1922  ;;  %v1931_v21 = vsel %vm1927_vm3, %v3873_v15, %v1929_v17 }
 0xf9f   : > { %v3879_v63 = vsel %vm176_vm0, %v1909_v19, %v1923_v20  ;;  %1934 = vrot.lane.b32.xlu1 %v1931_v21, %s3430_s13 }
 0xfa0   : > { %v1930_v2 = vmul.f32 0.1, %v3879_v63  ;;  %vm1928_vm4 = vcmp.ge.f32.partialorder %v3879_v63, 0.0 }
 0xfa2   : > { %v1932_v22 = vsel %vm1928_vm4, %v3879_v63, %v1930_v2 }
 0xfa3   : > { %1947 = vrot.lane.b32.xlu0 %v1932_v22, %s3434_s17  ;;  %1943 = vrot.lane.b32.xlu1 %v1932_v22, %s3430_s13 }
 0xfa7   : > { %1938 = vrot.lane.b32.xlu0 %v1931_v21, %s3434_s17 }
0x1011   : > { %v1935_v23 = vpop.permute.xlu1 %1934 }
0x1012   : > { %1937 = vst.msk [vmem:[#allocation2] sm:$0xff] %vm479_vm13, %v1935_v23 }
0x1015   : > { %v1948_v24 = vpop.permute.xlu0 %1947  ;;  %v1944_v26 = vpop.permute.xlu1 %1943 }
0x1016   : > { %1950 = vst.msk [vmem:[#allocation2 + $0x18] sm:$0xff] %vm479_vm13, %v1948_v24  ;;  %1946 = vst.msk [vmem:[#allocation2 + $0x10] sm:$0xff] %vm479_vm13, %v1944_v26 }
0x1019   : > { %v1939_v27 = vpop.permute.xlu0 %1938  ;;  %v2017_v28 = vld [vmem:[#allocation2] sm:$0xff] }
0x101a   : > { %1941 = vst.msk [vmem:[#allocation2 + $0x8] sm:$0xff] %vm479_vm13, %v1939_v27  ;;  %2019 = vrot.lane.b32.xlu0 %v2017_v28, %s3441_s12 }
0x101d   : > { %v1999_v30 = vld [vmem:[#allocation2 + $0x18] sm:$0xff]  ;;  %v1993_v31 = vld [vmem:[#allocation2 + $0x10] sm:$0xff] }
0x1021   : > { %v1963_v29 = vld [vmem:[#allocation2 + $0x8] sm:$0xff] }
0x1022   : > { %1965 = vrot.lane.b32.xlu1 %v1963_v29, %s3434_s17  ;;  %1989 = vrot.lane.b32.xlu0 %v1963_v29, %s3434_s17 }
0x1026   : > { %2001 = vrot.lane.b32.xlu0 %v1999_v30, %s3434_s17  ;;  %1959 = vrot.lane.b32.xlu1 %v2017_v28, %s3434_s17 }
0x102a   : > { %1977 = vrot.lane.b32.xlu1 %v1963_v29, %s3430_s13  ;;  %1995 = vrot.lane.b32.xlu0 %v1993_v31, %s3434_s17 }
0x102e   : > { %2013 = vrot.lane.b32.xlu0 %v1999_v30, %s3430_s13  ;;  %1983 = vrot.lane.b32.xlu1 %v1993_v31, %s3430_s13 }
0x1032   : > { %2007 = vrot.lane.b32.xlu0 %v1993_v31, %s3430_s13  ;;  %1953 = vrot.lane.b32.xlu1 %v1999_v30, %s3435_s18 }
0x1036   : > { %1971 = vrot.lane.b32.xlu1 %v2017_v28, %s3430_s13  ;;  %2032 = vperm.xlu0 %3398, %v2023_v33  }
0x108c   : > { %v2020_v34 = vpop.permute.xlu0 %2019 }
0x1094   : > { %v1990_v35 = vpop.permute.xlu0 %1989  ;;  %v1966_v36 = vpop.permute.xlu1 %1965 }
0x1095   : > { %1992 = vst.msk [vmem:[#allocation3 + $0x8] sm:$0xff] %vm176_vm0, %v1990_v35  ;;  %1968 = vst.msk [vmem:[#allocation3 + $0x20] sm:$0xff] %vm176_vm0, %v1966_v36 }
0x1098   : > { %v2002_v37 = vpop.permute.xlu0 %2001  ;;  %v1960_v38 = vpop.permute.xlu1 %1959 }
0x1099   : > { %2004 = vst.msk [vmem:[#allocation3 + $0x28] sm:$0xff] %vm176_vm0, %v2002_v37  ;;  %1962 = vst.msk [vmem:[#allocation3 + $0x10] sm:$0xff] %vm176_vm0, %v1960_v38 }
0x109a   : > { %2022 = vst.msk [vmem:[#allocation3 + $0x28] sm:$0xff] %vm1012_vm8, %v2020_v34 }
0x109c   : > { %v1996_v16 = vpop.permute.xlu0 %1995  ;;  %v1978_v18 = vpop.permute.xlu1 %1977 }
0x109d   : > { %1998 = vst.msk [vmem:[#allocation3 + $0x18] sm:$0xff] %vm176_vm0, %v1996_v16 }
0x109e   : > { %1980 = vst.msk [vmem:[#allocation3 + $0x10] sm:$0xff] %vm1012_vm8, %v1978_v18 }
0x10a0   : > { %v2014_v39 = vpop.permute.xlu0 %2013  ;;  %v1984_v40 = vpop.permute.xlu1 %1983 }
0x10a1   : > { %2016 = vst.msk [vmem:[#allocation3 + $0x18] sm:$0xff] %vm1012_vm8, %v2014_v39  ;;  %1986 = vst.msk [vmem:[#allocation3 + $0x20] sm:$0xff] %vm1012_vm8, %v1984_v40  ;;  %v2029_v41 = vld [vmem:[#allocation3 + $0x28] sm:$0xff] }
0x10a2   : > { %2064 = vmatprep.subr.mxu1 %v2029_v41 }
0x10a4   : > { %v2008_v42 = vpop.permute.xlu0 %2007  ;;  %v1954_v43 = vpop.permute.xlu1 %1953 }
0x10a5   : > { %2010 = vst.msk [vmem:[#allocation3 + $0x8] sm:$0xff] %vm1012_vm8, %v2008_v42  ;;  %v2026_v47 = vld [vmem:[#allocation3 + $0x10] sm:$0xff] }
0x10a6   : > { %1956 = vst.msk [vmem:[#allocation3] sm:$0xff] %vm176_vm0, %v1954_v43  ;;  %v2388_v42 = vld [vmem:[%s4124_s1 + $0x110] sm:$0xff] }
0x10a8   : > { %v1972_v44 = vpop.permute.xlu1 %1971  ;;  %v2028_v45 = vld [vmem:[#allocation3 + $0x20] sm:$0xff]  ;;  %v2027_v46 = vld [vmem:[#allocation3 + $0x18] sm:$0xff] }
0x10a9   : > { %1974 = vst.msk [vmem:[#allocation3] sm:$0xff] %vm1012_vm8, %v1972_v44  ;;  %2065 = vmatpush1.msra.mxu1 %v2028_v45 }
0x10aa   : > { %2066 = vmatprep.subr.mxu1 %v2027_v46 }
0x10ab   : > { %2067 = vmatpush1.msra.mxu1 %v2026_v47 }
0x10ac   : > { %v2025_v48 = vld [vmem:[#allocation3 + $0x8] sm:$0xff] }
0x10ad   : > { %2068 = vmatprep.subr.mxu1 %v2025_v48 }
0x10b0   : > { %v2024_v49 = vld [vmem:[#allocation3] sm:$0xff] }
0x10b1   : > { %2069 = vmatpush1.msra.mxu1 %v2024_v49  ;;  %v2033_v50 = vpop.permute.xlu0 %2032 }
0x10b2   : > { %3061 = vmatmul.mubr.msk.f32.vlgmr.msra.gmra.mxu1 %vm2035_vm5, %v2023_v33 }
0x10b3   : > { %2647 = vmatprep.mubr.f32.mxu1 %v3824_v25 }
0x1172   : > { %v2104_v51 = vpop.f32.mrf.mxu1 }
0x1173   : > { %v2105_v52 = vadd.f32 %v2104_v51, %v2033_v50 }
0x1174   : > { %v2106_v53 = vpop.f32.mrf.mxu1 }
0x1175   : > { %vm2109_vm6 = vcmp.ge.f32.partialorder %v2105_v52, 0.0  ;;  %v2111_v54 = vmul.f32 0.1, %v2105_v52  ;;  %v2107_v55 = vadd.f32 %v2106_v53, %v2033_v50 }
0x1177   : > { %v2112_v56 = vmul.f32 0.1, %v2107_v55  ;;  %v2113_v57 = vsel %vm2109_vm6, %v2105_v52, %v2111_v54  ;;  %vm2110_vm7 = vcmp.ge.f32.partialorder %v2107_v55, 0.0 }
0x1178   : > { %2120 = vrot.lane.b32.xlu0 %v2113_v57, %s3434_s17  ;;  %2116 = vrot.lane.b32.xlu1 %v2113_v57, %s3430_s13 }
0x1179   : > { %v2114_v58 = vsel %vm2110_vm7, %v2107_v55, %v2112_v56 }
0x117c   : > { %2129 = vrot.lane.b32.xlu1 %v2114_v58, %s3434_s17 }
0x1180   : > { %2125 = vrot.lane.b32.xlu1 %v2114_v58, %s3430_s13 }
0x11ea   : > { %v2121_v59 = vpop.permute.xlu0 %2120  ;;  %v2117_v60 = vpop.permute.xlu1 %2116 }
0x11eb   : > { %2123 = vst.msk [vmem:[#allocation2 + $0x8] sm:$0xff] %vm479_vm13, %v2121_v59  ;;  %2119 = vst.msk [vmem:[#allocation2] sm:$0xff] %vm479_vm13, %v2117_v60 }
0x11ee   : > { %v2130_v61 = vpop.permute.xlu1 %2129 }
0x11ef   : > { %2132 = vst.msk [vmem:[#allocation2 + $0x18] sm:$0xff] %vm479_vm13, %v2130_v61 }
0x11f2   : > { %v2126_v62 = vpop.permute.xlu1 %2125  ;;  %v2145_v0 = vld [vmem:[#allocation2 + $0x8] sm:$0xff]  ;;  %v2199_v1 = vld [vmem:[#allocation2] sm:$0xff] }
0x11f3   : > { %2128 = vst.msk [vmem:[#allocation2 + $0x10] sm:$0xff] %vm479_vm13, %v2126_v62  ;;  %2147 = vrot.lane.b32.xlu1 %v2145_v0, %s3434_s17  ;;  %2201 = vrot.lane.b32.xlu0 %v2199_v1, %s3441_s12 }
0x11f6   : > { %v2181_v3 = vld [vmem:[#allocation2 + $0x18] sm:$0xff] }
0x11f7   : > { %2171 = vrot.lane.b32.xlu0 %v2145_v0, %s3434_s17  ;;  %2141 = vrot.lane.b32.xlu1 %v2199_v1, %s3434_s17 }
0x11fa   : > { %v2175_v4 = vld [vmem:[#allocation2 + $0x10] sm:$0xff] }
0x11fb   : > { %2159 = vrot.lane.b32.xlu1 %v2145_v0, %s3430_s13  ;;  %2183 = vrot.lane.b32.xlu0 %v2181_v3, %s3434_s17 }
0x11ff   : > { %2177 = vrot.lane.b32.xlu0 %v2175_v4, %s3434_s17  ;;  %2165 = vrot.lane.b32.xlu1 %v2175_v4, %s3430_s13 }
0x1203   : > { %2195 = vrot.lane.b32.xlu0 %v2181_v3, %s3430_s13  ;;  %2135 = vrot.lane.b32.xlu1 %v2181_v3, %s3435_s18 }
0x1207   : > { %2189 = vrot.lane.b32.xlu0 %v2175_v4, %s3430_s13  ;;  %2153 = vrot.lane.b32.xlu1 %v2199_v1, %s3430_s13 }
0x120b   : > { %2214 = vperm.xlu0 %3398, %v2205_v5  }
0x1265   : > { %v2202_v6 = vpop.permute.xlu0 %2201  ;;  %v2148_v7 = vpop.permute.xlu1 %2147 }
0x1266   : > { %2150 = vst.msk [vmem:[#allocation3 + $0x20] sm:$0xff] %vm176_vm0, %v2148_v7 }
0x1269   : > { %v2172_v8 = vpop.permute.xlu0 %2171  ;;  %v2142_v9 = vpop.permute.xlu1 %2141 }
0x126a   : > { %2174 = vst.msk [vmem:[#allocation3 + $0x8] sm:$0xff] %vm176_vm0, %v2172_v8  ;;  %2144 = vst.msk [vmem:[#allocation3 + $0x10] sm:$0xff] %vm176_vm0, %v2142_v9 }
0x126d   : > { %v2184_v10 = vpop.permute.xlu0 %2183  ;;  %v2160_v11 = vpop.permute.xlu1 %2159 }
0x126e   : > { %2186 = vst.msk [vmem:[#allocation3 + $0x28] sm:$0xff] %vm176_vm0, %v2184_v10 }
0x126f   : > { %2162 = vst.msk [vmem:[#allocation3 + $0x10] sm:$0xff] %vm1012_vm8, %v2160_v11  ;;  %2204 = vst.msk [vmem:[#allocation3 + $0x28] sm:$0xff] %vm1012_vm8, %v2202_v6 }
0x1271   : > { %v2178_v12 = vpop.permute.xlu0 %2177  ;;  %v2166_v13 = vpop.permute.xlu1 %2165 }
0x1272   : > { %2180 = vst.msk [vmem:[#allocation3 + $0x18] sm:$0xff] %vm176_vm0, %v2178_v12 }
0x1273   : > { %2168 = vst.msk [vmem:[#allocation3 + $0x20] sm:$0xff] %vm1012_vm8, %v2166_v13 }
0x1275   : > { %v2196_v14 = vpop.permute.xlu0 %2195  ;;  %v2136_v17 = vpop.permute.xlu1 %2135 }
0x1276   : > { %2198 = vst.msk [vmem:[#allocation3 + $0x18] sm:$0xff] %vm1012_vm8, %v2196_v14  ;;  %v2211_v19 = vld [vmem:[#allocation3 + $0x28] sm:$0xff]  ;;  %v2208_v23 = vld [vmem:[#allocation3 + $0x10] sm:$0xff] }
0x1277   : > { %2138 = vst.msk [vmem:[#allocation3] sm:$0xff] %vm176_vm0, %v2136_v17  ;;  %2245 = vmatprep.subr.mxu0 %v2211_v19  ;;  %v2569_v17 = vld [vmem:[%s4124_s1 + $0x118] sm:$0xff] }
0x1279   : > { %v2190_v20 = vpop.permute.xlu0 %2189  ;;  %v2154_v21 = vpop.permute.xlu1 %2153 }
0x127a   : > { %v2210_v2 = vld [vmem:[#allocation3 + $0x20] sm:$0xff]  ;;  %2192 = vst.msk [vmem:[#allocation3 + $0x8] sm:$0xff] %vm1012_vm8, %v2190_v20  ;;  %2156 = vst.msk [vmem:[#allocation3] sm:$0xff] %vm1012_vm8, %v2154_v21 }
0x127b   : > { %2246 = vmatpush1.msra.mxu0 %v2210_v2 }
0x127d   : > { %v2209_v22 = vld [vmem:[#allocation3 + $0x18] sm:$0xff] }
0x127e   : > { %2247 = vmatprep.subr.mxu0 %v2209_v22 }
0x127f   : > { %2248 = vmatpush1.msra.mxu0 %v2208_v23 }
0x1281   : > { %v2207_v24 = vld [vmem:[#allocation3 + $0x8] sm:$0xff]  ;;  %v2206_v26 = vld [vmem:[#allocation3] sm:$0xff] }
0x1282   : > { %2249 = vmatprep.subr.mxu0 %v2207_v24 }
0x1283   : > { %2250 = vmatpush1.msra.mxu0 %v2206_v26 }
0x1284   : > { %3062 = vmatmul.mubr.msk.f32.vlgmr.msra.gmra.mxu0 %vm2035_vm5, %v2205_v5 }
0x1285   : > { %2466 = vmatprep.mubr.f32.mxu0 %v3824_v25 }
0x1286   : > { %v2215_v27 = vpop.permute.xlu0 %2214 }
0x1344   : > { %v2285_v28 = vpop.f32.mrf.mxu0 }
0x1345   : > { %v2286_v29 = vadd.f32 %v2285_v28, %v2215_v27 }
0x1346   : > { %v2287_v30 = vpop.f32.mrf.mxu0 }
0x1347   : > { %v3959_v31 = vadd.f32 %v2286_v29, %v3873_v15  ;;  %v2288_v32 = vadd.f32 %v2287_v30, %v2215_v27 }
0x1349   : > { %v3962_v33 = vadd.f32 %v2288_v32, %v3879_v63  ;;  %vm2292_vm9 = vcmp.ge.f32.partialorder %v3959_v31, 0.0  ;;  %v2294_v34 = vmul.f32 0.1, %v3959_v31 }
0x134b   : > { %v2296_v35 = vsel %vm2292_vm9, %v3959_v31, %v2294_v34  ;;  %vm2293_vm10 = vcmp.ge.f32.partialorder %v3962_v33, 0.0  ;;  %v2295_v36 = vmul.f32 0.1, %v3962_v33 }
0x134c   : > { %2303 = vrot.lane.b32.xlu1 %v2296_v35, %s3434_s17 }
0x134d   : > { %v2297_v37 = vsel %vm2293_vm10, %v3962_v33, %v2295_v36 }
0x134e   : > { %2308 = vrot.lane.b32.xlu0 %v2297_v37, %s3430_s13 }
0x1350   : > { %2312 = vrot.lane.b32.xlu1 %v2297_v37, %s3434_s17 }
0x1352   : > { %2299 = vrot.lane.b32.xlu0 %v2296_v35, %s3430_s13 }
0x13be   : > { %v2304_v15 = vpop.permute.xlu1 %2303 }
0x13bf   : > { %2306 = vst.msk [vmem:[#allocation2 + $0x8] sm:$0xff] %vm479_vm13, %v2304_v15 }
0x13c0   : > { %v2309_v63 = vpop.permute.xlu0 %2308 }
0x13c1   : > { %2311 = vst.msk [vmem:[#allocation2 + $0x10] sm:$0xff] %vm479_vm13, %v2309_v63 }
0x13c2   : > { %v2313_v38 = vpop.permute.xlu1 %2312 }
0x13c3   : > { %2315 = vst.msk [vmem:[#allocation2 + $0x18] sm:$0xff] %vm479_vm13, %v2313_v38 }
0x13c4   : > { %v2300_v16 = vpop.permute.xlu0 %2299 }
0x13c5   : > { %2302 = vst.msk [vmem:[#allocation2] sm:$0xff] %vm479_vm13, %v2300_v16 }
0x13c6   : > { %v2364_v18 = vld [vmem:[#allocation2 + $0x8] sm:$0xff] }
0x13c7   : > { %2366 = vrot.lane.b32.xlu1 %v2364_v18, %s3433_s16 }
0x13c8   : > { %v2382_v39 = vld [vmem:[#allocation2 + $0x10] sm:$0xff] }
0x13ca   : > { %v2376_v41 = vld [vmem:[#allocation2 + $0x18] sm:$0xff] }
0x13cb   : > { %2384 = vrot.lane.b32.xlu1 %v2382_v39, %s3441_s12 }
0x13cc   : > { %v2346_v40 = vld [vmem:[#allocation2] sm:$0xff] }
0x13cd   : > { %2348 = vrot.lane.b32.xlu0 %v2346_v40, %s3441_s12 }
0x13cf   : > { %2360 = vrot.lane.b32.xlu1 %v2382_v39, %s3434_s17 }
0x13d1   : > { %2324 = vrot.lane.b32.xlu0 %v2346_v40, %s3434_s17 }
0x13d3   : > { %2378 = vrot.lane.b32.xlu1 %v2376_v41, %s3430_s13 }
0x13d5   : > { %2342 = vrot.lane.b32.xlu0 %v2364_v18, %s3430_s13 }
0x13d7   : > { %2354 = vrot.lane.b32.xlu1 %v2376_v41, %s3435_s18 }
0x13d9   : > { %2330 = vrot.lane.b32.xlu0 %v2376_v41, %s3434_s17 }
0x13db   : > { %2372 = vrot.lane.b32.xlu1 %v2346_v40, %s3430_s13 }
0x13dd   : > { %2318 = vrot.lane.b32.xlu0 %v2364_v18, %s3435_s18 }
0x13df   : > { %2397 = vperm.xlu1 %3399, %v2388_v42  }
0x13e1   : > { %2336 = vrot.lane.b32.xlu0 %v2382_v39, %s3444_s29 }
0x1439   : > { %v2367_v43 = vpop.permute.xlu1 %2366 }
0x143a   : > { %2369 = vst.msk [vmem:[#allocation3 + $0x28] sm:$0xff] %vm176_vm0, %v2367_v43 }
0x143d   : > { %v2385_v44 = vpop.permute.xlu1 %2384 }
0x143e   : > { %2387 = vst.msk [vmem:[#allocation3 + $0x28] sm:$0xff] %vm1012_vm8, %v2385_v44 }
0x143f   : > { %v2349_v45 = vpop.permute.xlu0 %2348 }
0x1441   : > { %v2361_v46 = vpop.permute.xlu1 %2360 }
0x1442   : > { %2363 = vst.msk [vmem:[#allocation3 + $0x18] sm:$0xff] %vm176_vm0, %v2361_v46 }
0x1443   : > { %v2325_v47 = vpop.permute.xlu0 %2324 }
0x1444   : > { %2327 = vst.msk [vmem:[#allocation3 + $0x10] sm:$0xff] %vm176_vm0, %v2325_v47 }
0x1445   : > { %v2379_v48 = vpop.permute.xlu1 %2378  ;;  %v2394_v49 = vld [vmem:[#allocation3 + $0x28] sm:$0xff] }
0x1446   : > { %2381 = vst.msk [vmem:[#allocation3 + $0x18] sm:$0xff] %vm1012_vm8, %v2379_v48  ;;  %2428 = vmatprep.subr.mxu0 %v2394_v49 }
0x1447   : > { %v2343_v50 = vpop.permute.xlu0 %2342 }
0x1448   : > { %2345 = vst.msk [vmem:[#allocation3 + $0x10] sm:$0xff] %vm1012_vm8, %v2343_v50 }
0x1449   : > { %v2355_v51 = vpop.permute.xlu1 %2354 }
0x144a   : > { %2357 = vst.msk [vmem:[#allocation3 + $0x8] sm:$0xff] %vm176_vm0, %v2355_v51 }
0x144b   : > { %v2331_v52 = vpop.permute.xlu0 %2330 }
0x144c   : > { %2333 = vst.msk [vmem:[#allocation3 + $0x20] sm:$0xff] %vm176_vm0, %v2331_v52  ;;  %v3447_v52 = vmov 56  }
0x144d   : > { %2351 = vst.msk [vmem:[#allocation3 + $0x20] sm:$0xff] %vm1012_vm8, %v2349_v45  ;;  %v2373_v53 = vpop.permute.xlu1 %2372  ;;  %v2392_v57 = vld [vmem:[#allocation3 + $0x18] sm:$0xff]  ;;  %3400 = vset.pattern.permute.xlu1 %v3447_v52 }
0x144e   : > { %2375 = vst.msk [vmem:[#allocation3 + $0x8] sm:$0xff] %vm1012_vm8, %v2373_v53  ;;  %v4083_v53 = vld [vmem:[%s4124_s1 + $0x120] sm:$0x1] }
0x144f   : > { %v2319_v54 = vpop.permute.xlu0 %2318  ;;  %v2391_v58 = vld [vmem:[#allocation3 + $0x10] sm:$0xff] }
0x1450   : > { %2321 = vst.msk [vmem:[#allocation3] sm:$0xff] %vm176_vm0, %v2319_v54 }
0x1453   : > { %v2337_v55 = vpop.permute.xlu0 %2336 }
0x1454   : > { %2339 = vst.msk [vmem:[#allocation3] sm:$0xff] %vm1012_vm8, %v2337_v55  ;;  %v2393_v56 = vld [vmem:[#allocation3 + $0x20] sm:$0xff] }
0x1455   : > { %2429 = vmatpush1.msra.mxu0 %v2393_v56  ;;  %v2390_v59 = vld [vmem:[#allocation3 + $0x8] sm:$0xff] }
0x1456   : > { %2430 = vmatprep.subr.mxu0 %v2392_v57 }
0x1457   : > { %2431 = vmatpush1.msra.mxu0 %v2391_v58 }
0x1458   : > { %2432 = vmatprep.subr.mxu0 %v2390_v59 }
0x145a   : > { %v2398_v61 = vpop.permute.xlu1 %2397 }
0x145b   : > { %v2389_v60 = vld [vmem:[#allocation3] sm:$0xff] }
0x145c   : > { %2433 = vmatpush1.msra.mxu0 %v2389_v60 }
0x145d   : > { %3063 = vmatmul.mubr.msk.f32.vlgmr.msra.gmra.mxu0 %vm2035_vm5, %v2388_v42 }
0x145e   : > { %2935 = vmatprep.mubr.f32.mxu0 %v3824_v25 }
0x151d   : > { %v2468_v62 = vpop.f32.mrf.mxu0 }
0x151e   : > { %v2469_v0 = vadd.f32 %v2468_v62, %v2398_v61 }
0x151f   : > { %v2470_v1 = vpop.f32.mrf.mxu0 }
0x1520   : > { %v2475_v3 = vmul.f32 0.1, %v2469_v0  ;;  %v2471_v4 = vadd.f32 %v2470_v1, %v2398_v61  ;;  %vm2473_vm11 = vcmp.ge.f32.partialorder %v2469_v0, 0.0 }
0x1522   : > { %vm2474_vm12 = vcmp.ge.f32.partialorder %v2471_v4, 0.0  ;;  %v2476_v5 = vmul.f32 0.1, %v2471_v4  ;;  %v2477_v6 = vsel %vm2473_vm11, %v2469_v0, %v2475_v3 }
0x1523   : > { %2480 = vrot.lane.b32.xlu1 %v2477_v6, %s3430_s13 }
0x1524   : > { %v2478_v7 = vsel %vm2474_vm12, %v2471_v4, %v2476_v5 }
0x1525   : > { %2493 = vrot.lane.b32.xlu0 %v2478_v7, %s3434_s17 }
0x1527   : > { %2489 = vrot.lane.b32.xlu1 %v2478_v7, %s3430_s13 }
0x1529   : > { %2484 = vrot.lane.b32.xlu0 %v2477_v6, %s3434_s17 }
0x1595   : > { %v2481_v25 = vpop.permute.xlu1 %2480 }
0x1596   : > { %2483 = vst.msk [vmem:[#allocation2] sm:$0xff] %vm479_vm13, %v2481_v25 }
0x1597   : > { %v2494_v8 = vpop.permute.xlu0 %2493 }
0x1598   : > { %2496 = vst.msk [vmem:[#allocation2 + $0x18] sm:$0xff] %vm479_vm13, %v2494_v8 }
0x1599   : > { %v2490_v9 = vpop.permute.xlu1 %2489 }
0x159a   : > { %2492 = vst.msk [vmem:[#allocation2 + $0x10] sm:$0xff] %vm479_vm13, %v2490_v9 }
0x159b   : > { %v2485_v10 = vpop.permute.xlu0 %2484 }
0x159c   : > { %2487 = vst.msk [vmem:[#allocation2 + $0x8] sm:$0xff] %vm479_vm13, %v2485_v10 }
0x159d   : > { %v2563_v11 = vld [vmem:[#allocation2] sm:$0xff] }
0x159e   : > { %2565 = vrot.lane.b32.xlu0 %v2563_v11, %s3441_s12 }
0x159f   : > { %v2545_v13 = vld [vmem:[#allocation2 + $0x18] sm:$0xff] }
0x15a1   : > { %v2539_v14 = vld [vmem:[#allocation2 + $0x10] sm:$0xff] }
0x15a3   : > { %v2509_v12 = vld [vmem:[#allocation2 + $0x8] sm:$0xff] }
0x15a4   : > { %2511 = vrot.lane.b32.xlu1 %v2509_v12, %s3434_s17  ;;  %2535 = vrot.lane.b32.xlu0 %v2509_v12, %s3434_s17 }
0x15a8   : > { %2547 = vrot.lane.b32.xlu0 %v2545_v13, %s3434_s17  ;;  %2505 = vrot.lane.b32.xlu1 %v2563_v11, %s3434_s17 }
0x15ac   : > { %2523 = vrot.lane.b32.xlu1 %v2509_v12, %s3430_s13  ;;  %2541 = vrot.lane.b32.xlu0 %v2539_v14, %s3434_s17 }
0x15b0   : > { %2559 = vrot.lane.b32.xlu0 %v2545_v13, %s3430_s13  ;;  %2529 = vrot.lane.b32.xlu1 %v2539_v14, %s3430_s13 }
0x15b4   : > { %2553 = vrot.lane.b32.xlu0 %v2539_v14, %s3430_s13  ;;  %2499 = vrot.lane.b32.xlu1 %v2545_v13, %s3435_s18 }
0x15b8   : > { %2578 = vperm.xlu0 %3398, %v2569_v17   ;;  %2517 = vrot.lane.b32.xlu1 %v2563_v11, %s3430_s13 }
0x15bc   : > { %3401 = vset.pattern.permute.xlu0 %v3447_v52 }
0x1610   : > { %v2566_v19 = vpop.permute.xlu0 %2565 }
0x1616   : > { %v2536_v20 = vpop.permute.xlu0 %2535  ;;  %v2512_v21 = vpop.permute.xlu1 %2511 }
0x1617   : > { %2538 = vst.msk [vmem:[#allocation3 + $0x8] sm:$0xff] %vm176_vm0, %v2536_v20  ;;  %2514 = vst.msk [vmem:[#allocation3 + $0x20] sm:$0xff] %vm176_vm0, %v2512_v21 }
0x161a   : > { %v2548_v2 = vpop.permute.xlu0 %2547  ;;  %v2506_v22 = vpop.permute.xlu1 %2505 }
0x161b   : > { %2550 = vst.msk [vmem:[#allocation3 + $0x28] sm:$0xff] %vm176_vm0, %v2548_v2  ;;  %2508 = vst.msk [vmem:[#allocation3 + $0x10] sm:$0xff] %vm176_vm0, %v2506_v22 }
0x161c   : > { %2568 = vst.msk [vmem:[#allocation3 + $0x28] sm:$0xff] %vm1012_vm8, %v2566_v19 }
0x161e   : > { %v2542_v23 = vpop.permute.xlu0 %2541  ;;  %v2524_v24 = vpop.permute.xlu1 %2523 }
0x161f   : > { %2544 = vst.msk [vmem:[#allocation3 + $0x18] sm:$0xff] %vm176_vm0, %v2542_v23 }
0x1620   : > { %2526 = vst.msk [vmem:[#allocation3 + $0x10] sm:$0xff] %vm1012_vm8, %v2524_v24 }
0x1622   : > { %v2560_v26 = vpop.permute.xlu0 %2559  ;;  %v2530_v27 = vpop.permute.xlu1 %2529 }
0x1623   : > { %2562 = vst.msk [vmem:[#allocation3 + $0x18] sm:$0xff] %vm1012_vm8, %v2560_v26  ;;  %2532 = vst.msk [vmem:[#allocation3 + $0x20] sm:$0xff] %vm1012_vm8, %v2530_v27  ;;  %v2575_v28 = vld [vmem:[#allocation3 + $0x28] sm:$0xff] }
0x1624   : > { %2609 = vmatprep.subr.mxu1 %v2575_v28 }
0x1626   : > { %v2554_v29 = vpop.permute.xlu0 %2553  ;;  %v2500_v30 = vpop.permute.xlu1 %2499 }
0x1627   : > { %2556 = vst.msk [vmem:[#allocation3 + $0x8] sm:$0xff] %vm1012_vm8, %v2554_v29  ;;  %v2572_v36 = vld [vmem:[#allocation3 + $0x10] sm:$0xff] }
0x1628   : > { %2502 = vst.msk [vmem:[#allocation3] sm:$0xff] %vm176_vm0, %v2500_v30 }
0x162a   : > { %v2518_v32 = vpop.permute.xlu1 %2517  ;;  %v2574_v34 = vld [vmem:[#allocation3 + $0x20] sm:$0xff]  ;;  %v2573_v35 = vld [vmem:[#allocation3 + $0x18] sm:$0xff] }
0x162b   : > { %2520 = vst.msk [vmem:[#allocation3] sm:$0xff] %vm1012_vm8, %v2518_v32  ;;  %2610 = vmatpush1.msra.mxu1 %v2574_v34 }
0x162c   : > { %2611 = vmatprep.subr.mxu1 %v2573_v35 }
0x162d   : > { %2612 = vmatpush1.msra.mxu1 %v2572_v36 }
0x162e   : > { %v2571_v37 = vld [vmem:[#allocation3 + $0x8] sm:$0xff] }
0x162f   : > { %2613 = vmatprep.subr.mxu1 %v2571_v37 }
0x1632   : > { %v2570_v15 = vld [vmem:[#allocation3] sm:$0xff] }
0x1633   : > { %2614 = vmatpush1.msra.mxu1 %v2570_v15  ;;  %v2579_v63 = vpop.permute.xlu0 %2578 }
0x1634   : > { %3064 = vmatmul.mubr.msk.f32.vlgmr.msra.gmra.mxu1 %vm2035_vm5, %v2569_v17 }
0x16f4   : > { %v2649_v38 = vpop.f32.mrf.mxu1 }
0x16f5   : > { %v2650_v16 = vadd.f32 %v2649_v38, %v2579_v63 }
0x16f6   : > { %v2651_v18 = vpop.f32.mrf.mxu1 }
0x16f7   : > { %v2654_v39 = vadd.f32 %v2650_v16, %v3959_v31  ;;  %v2652_v40 = vadd.f32 %v2651_v18, %v2579_v63 }
0x16f9   : > { %v2658_v41 = vmul.f32 0.1, %v2654_v39  ;;  %v2655_v42 = vadd.f32 %v2652_v40, %v3962_v33  ;;  %vm2656_vm14 = vcmp.ge.f32.partialorder %v2654_v39, 0.0 }
0x16fb   : > { %v2659_v43 = vmul.f32 0.1, %v2655_v42  ;;  %v2660_v44 = vsel %vm2656_vm14, %v2654_v39, %v2658_v41  ;;  %vm2657_vm15 = vcmp.ge.f32.partialorder %v2655_v42, 0.0  ;;  %v3448_v39 = vmov 1966171168  }
0x16fc   : > { %2667 = vrot.lane.b32.xlu1 %v2660_v44, %s3434_s17  ;;  %v2948_v40 = vunpack.c.l.s4 %v3448_v39  ;;  %v2950_v41 = vlaneseq }
0x16fd   : > { %v2661_v45 = vsel %vm2657_vm15, %v2655_v42, %v2659_v43 }
0x16fe   : > { %2672 = vrot.lane.b32.xlu0 %v2661_v45, %s3430_s13  ;;  %v2949_v42 = vunpack.c.0.s8 %v2948_v40  ;;  %v2951_v43 = vshrl.u32 %v2950_v41, 7 }
0x1700   : > { %2676 = vrot.lane.b32.xlu1 %v2661_v45, %s3434_s17  ;;  %v2952_v45 = vsub.s32 %v2949_v42, %v2951_v43 }
0x1702   : > { %2663 = vrot.lane.b32.xlu0 %v2660_v44, %s3430_s13 }
0x176e   : > { %v2668_v46 = vpop.permute.xlu1 %2667 }
0x176f   : > { %2670 = vst.msk [vmem:[#allocation2 + $0x8] sm:$0xff] %vm479_vm13, %v2668_v46 }
0x1770   : > { %v2673_v31 = vpop.permute.xlu0 %2672 }
0x1771   : > { %2675 = vst.msk [vmem:[#allocation2 + $0x10] sm:$0xff] %vm479_vm13, %v2673_v31 }
0x1772   : > { %v2677_v33 = vpop.permute.xlu1 %2676 }
0x1773   : > { %2679 = vst.msk [vmem:[#allocation2 + $0x18] sm:$0xff] %vm479_vm13, %v2677_v33 }
0x1774   : > { %v2664_v47 = vpop.permute.xlu0 %2663 }
0x1775   : > { %2666 = vst.msk [vmem:[#allocation2] sm:$0xff] %vm479_vm13, %v2664_v47  ;;  %vm2964_vm13 = vcmp.lt.s32.totalorder %v2950_v41, 256 }
0x1776   : > { %v2800_v48 = vld [vmem:[#allocation2 + $0x8] sm:$0xff] }
0x1777   : > { %2802 = vrot.lane.b32.xlu1 %v2800_v48, %s3433_s16 }
0x1778   : > { %v2842_v50 = vld [vmem:[#allocation2 + $0x10] sm:$0xff] }
0x177a   : > { %v2716_v51 = vld [vmem:[#allocation2 + $0x18] sm:$0xff] }
0x177c   : > { %v2758_v49 = vld [vmem:[#allocation2] sm:$0xff] }
0x177d   : > { %2760 = vrot.lane.b32.xlu0 %v2758_v49, %s3441_s12  ;;  %2796 = vrot.lane.b32.xlu1 %v2758_v49, %s3433_s16 }
0x1781   : > { %2838 = vrot.lane.b32.xlu1 %v2800_v48, %s3441_s12  ;;  %2706 = vrot.lane.b32.xlu0 %v2800_v48, %s3434_s17 }
0x1785   : > { %2832 = vrot.lane.b32.xlu1 %v2758_v49, %s3441_s12  ;;  %2700 = vrot.lane.b32.xlu0 %v2758_v49, %s3434_s17 }
0x1789   : > { %2778 = vrot.lane.b32.xlu1 %v2800_v48, %s3434_s17  ;;  %2742 = vrot.lane.b32.xlu0 %v2800_v48, %s3430_s13 }
0x178d   : > { %2772 = vrot.lane.b32.xlu1 %v2758_v49, %s3434_s17  ;;  %2736 = vrot.lane.b32.xlu0 %v2758_v49, %s3430_s13 }
0x1791   : > { %2814 = vrot.lane.b32.xlu1 %v2800_v48, %s3430_s13  ;;  %2682 = vrot.lane.b32.xlu0 %v2800_v48, %s3435_s18 }
0x1795   : > { %2844 = vrot.lane.b32.xlu1 %v2842_v50, %s3441_s12  ;;  %2718 = vrot.lane.b32.xlu0 %v2716_v51, %s3434_s17 }
0x1799   : > { %2790 = vrot.lane.b32.xlu1 %v2716_v51, %s3434_s17  ;;  %2712 = vrot.lane.b32.xlu0 %v2842_v50, %s3434_s17 }
0x179d   : > { %2784 = vrot.lane.b32.xlu1 %v2842_v50, %s3434_s17  ;;  %2754 = vrot.lane.b32.xlu0 %v2716_v51, %s3430_s13 }
0x17a1   : > { %2826 = vrot.lane.b32.xlu1 %v2716_v51, %s3430_s13  ;;  %2748 = vrot.lane.b32.xlu0 %v2842_v50, %s3430_s13 }
0x17a5   : > { %2820 = vrot.lane.b32.xlu1 %v2842_v50, %s3430_s13  ;;  %2694 = vrot.lane.b32.xlu0 %v2716_v51, %s3435_s18 }
0x17a9   : > { %2766 = vrot.lane.b32.xlu1 %v2716_v51, %s3435_s18  ;;  %2688 = vrot.lane.b32.xlu0 %v2842_v50, %s3435_s18 }
0x17ad   : > { %2808 = vrot.lane.b32.xlu1 %v2758_v49, %s3430_s13  ;;  %2730 = vrot.lane.b32.xlu0 %v2716_v51, %s3444_s29  ;;  %s3027_s13 = sshll.u32 %s4127_s10, 1 }
0x17b1   : > { %2724 = vrot.lane.b32.xlu0 %v2842_v50, %s3444_s29  ;;  %2865 = vperm.xlu1 %3400, %v4083_v53   ;;  %s141_s29 = scalar_lea.vmem %s4125_s2, %s3027_s13 }
0x17e9   : > { %v2803_v54 = vpop.permute.xlu1 %2802 }
0x17ea   : > { %2805 = vst.msk [vmem:[#allocation3 + $0x68] sm:$0xff] %vm176_vm0, %v2803_v54 }
0x17ef   : > { %v2761_v55 = vpop.permute.xlu0 %2760  ;;  %v2797_v56 = vpop.permute.xlu1 %2796 }
0x17f0   : > { %2799 = vst.msk [vmem:[#allocation3 + $0x58] sm:$0xff] %vm176_vm0, %v2797_v56 }
0x17f3   : > { %v2707_v57 = vpop.permute.xlu0 %2706  ;;  %v2839_v58 = vpop.permute.xlu1 %2838 }
0x17f4   : > { %2709 = vst.msk [vmem:[#allocation3 + $0x40] sm:$0xff] %vm176_vm0, %v2707_v57 }
0x17f5   : > { %2841 = vst.msk [vmem:[#allocation3 + $0x58] sm:$0xff] %vm1012_vm8, %v2839_v58 }
0x17f7   : > { %v2701_v59 = vpop.permute.xlu0 %2700  ;;  %v2833_v60 = vpop.permute.xlu1 %2832 }
0x17f8   : > { %2703 = vst.msk [vmem:[#allocation3 + $0x30] sm:$0xff] %vm176_vm0, %v2701_v59 }
0x17fb   : > { %v2743_v61 = vpop.permute.xlu0 %2742  ;;  %v2779_v62 = vpop.permute.xlu1 %2778 }
0x17fc   : > { %2745 = vst.msk [vmem:[#allocation3 + $0x30] sm:$0xff] %vm1012_vm8, %v2743_v61  ;;  %v2860_v12 = vld [vmem:[#allocation3 + $0x58] sm:$0xff] }
0x17fd   : > { %2781 = vst.msk [vmem:[#allocation3 + $0x28] sm:$0xff] %vm176_vm0, %v2779_v62 }
0x17ff   : > { %v2737_v0 = vpop.permute.xlu0 %2736  ;;  %v2773_v1 = vpop.permute.xlu1 %2772 }
0x1800   : > { %2775 = vst.msk [vmem:[#allocation3 + $0x18] sm:$0xff] %vm176_vm0, %v2773_v1 }
0x1803   : > { %v2683_v3 = vpop.permute.xlu0 %2682  ;;  %v2815_v4 = vpop.permute.xlu1 %2814  ;;  %v2855_v26 = vld [vmem:[#allocation3 + $0x30] sm:$0xff] }
0x1804   : > { %2685 = vst.msk [vmem:[#allocation3] sm:$0xff] %vm176_vm0, %v2683_v3 }
0x1805   : > { %2817 = vst.msk [vmem:[#allocation3 + $0x18] sm:$0xff] %vm1012_vm8, %v2815_v4 }
0x1807   : > { %v2719_v5 = vpop.permute.xlu0 %2718  ;;  %v2845_v6 = vpop.permute.xlu1 %2844 }
0x1808   : > { %2721 = vst.msk [vmem:[#allocation3 + $0x60] sm:$0xff] %vm176_vm0, %v2719_v5 }
0x1809   : > { %2847 = vst.msk [vmem:[#allocation3 + $0x68] sm:$0xff] %vm1012_vm8, %v2845_v6  ;;  %2763 = vst.msk [vmem:[#allocation3 + $0x60] sm:$0xff] %vm1012_vm8, %v2761_v55 }
0x180b   : > { %v2713_v7 = vpop.permute.xlu0 %2712  ;;  %v2791_v25 = vpop.permute.xlu1 %2790 }
0x180c   : > { %2715 = vst.msk [vmem:[#allocation3 + $0x50] sm:$0xff] %vm176_vm0, %v2713_v7  ;;  %2793 = vst.msk [vmem:[#allocation3 + $0x48] sm:$0xff] %vm176_vm0, %v2791_v25  ;;  %v2852_v32 = vld [vmem:[#allocation3 + $0x18] sm:$0xff] }
0x180d   : > { %2835 = vst.msk [vmem:[#allocation3 + $0x48] sm:$0xff] %vm1012_vm8, %v2833_v60 }
0x180f   : > { %v2755_v8 = vpop.permute.xlu0 %2754  ;;  %v2785_v9 = vpop.permute.xlu1 %2784 }
0x1810   : > { %v2862_v10 = vld [vmem:[#allocation3 + $0x68] sm:$0xff]  ;;  %2757 = vst.msk [vmem:[#allocation3 + $0x50] sm:$0xff] %vm1012_vm8, %v2755_v8  ;;  %v2861_v11 = vld [vmem:[#allocation3 + $0x60] sm:$0xff] }
0x1811   : > { %2787 = vst.msk [vmem:[#allocation3 + $0x38] sm:$0xff] %vm176_vm0, %v2785_v9  ;;  %2889 = vmatprep.subr.mxu0 %v2862_v10 }
0x1812   : > { %2890 = vmatpush1.msra.mxu0 %v2861_v11 }
0x1813   : > { %2891 = vmatprep.subr.mxu0 %v2860_v12  ;;  %v2749_v13 = vpop.permute.xlu0 %2748  ;;  %v2827_v14 = vpop.permute.xlu1 %2826 }
0x1814   : > { %2751 = vst.msk [vmem:[#allocation3 + $0x40] sm:$0xff] %vm1012_vm8, %v2749_v13  ;;  %2829 = vst.msk [vmem:[#allocation3 + $0x38] sm:$0xff] %vm1012_vm8, %v2827_v14  ;;  %v2858_v21 = vld [vmem:[#allocation3 + $0x48] sm:$0xff] }
0x1817   : > { %v2695_v17 = vpop.permute.xlu0 %2694  ;;  %v2821_v19 = vpop.permute.xlu1 %2820  ;;  %v2859_v20 = vld [vmem:[#allocation3 + $0x50] sm:$0xff] }
0x1818   : > { %2697 = vst.msk [vmem:[#allocation3 + $0x20] sm:$0xff] %vm176_vm0, %v2695_v17  ;;  %2892 = vmatpush1.msra.mxu0 %v2859_v20 }
0x1819   : > { %2823 = vst.msk [vmem:[#allocation3 + $0x28] sm:$0xff] %vm1012_vm8, %v2821_v19  ;;  %2739 = vst.msk [vmem:[#allocation3 + $0x20] sm:$0xff] %vm1012_vm8, %v2737_v0  ;;  %2893 = vmatprep.subr.mxu0 %v2858_v21 }
0x181b   : > { %v2689_v2 = vpop.permute.xlu0 %2688  ;;  %v2767_v22 = vpop.permute.xlu1 %2766  ;;  %v2857_v23 = vld [vmem:[#allocation3 + $0x40] sm:$0xff]  ;;  %v2856_v24 = vld [vmem:[#allocation3 + $0x38] sm:$0xff] }
0x181c   : > { %2691 = vst.msk [vmem:[#allocation3 + $0x10] sm:$0xff] %vm176_vm0, %v2689_v2  ;;  %2769 = vst.msk [vmem:[#allocation3 + $0x8] sm:$0xff] %vm176_vm0, %v2767_v22  ;;  %2894 = vmatpush1.msra.mxu0 %v2857_v23  ;;  %vm2868_vm0 = vcmask 457728  }
0x181d   : > { %2895 = vmatprep.subr.mxu0 %v2856_v24 }
0x181e   : > { %2896 = vmatpush1.msra.mxu0 %v2855_v26 }
0x181f   : > { %v2731_v27 = vpop.permute.xlu0 %2730  ;;  %v2809_v28 = vpop.permute.xlu1 %2808 }
0x1820   : > { %v2854_v29 = vld [vmem:[#allocation3 + $0x28] sm:$0xff]  ;;  %2733 = vst.msk [vmem:[#allocation3 + $0x10] sm:$0xff] %vm1012_vm8, %v2731_v27  ;;  %2811 = vst.msk [vmem:[#allocation3 + $0x8] sm:$0xff] %vm1012_vm8, %v2809_v28  ;;  %v2853_v30 = vld [vmem:[#allocation3 + $0x20] sm:$0xff] }
0x1821   : > { %2897 = vmatprep.subr.mxu0 %v2854_v29 }
0x1822   : > { %2898 = vmatpush1.msra.mxu0 %v2853_v30 }
0x1823   : > { %2899 = vmatprep.subr.mxu0 %v2852_v32  ;;  %v2725_v34 = vpop.permute.xlu0 %2724 }
0x1824   : > { %2727 = vst.msk [vmem:[#allocation3] sm:$0xff] %vm1012_vm8, %v2725_v34 }
0x1827   : > { %v2851_v35 = vld [vmem:[#allocation3 + $0x10] sm:$0xff]  ;;  %v2850_v36 = vld [vmem:[#allocation3 + $0x8] sm:$0xff] }
0x1828   : > { %2900 = vmatpush1.msra.mxu0 %v2851_v35 }
0x1829   : > { %2901 = vmatprep.subr.mxu0 %v2850_v36 }
0x182b   : > { %v2849_v37 = vld [vmem:[#allocation3] sm:$0xff] }
0x182c   : > { %2902 = vmatpush1.msra.mxu0 %v2849_v37  ;;  %v2866_v15 = vpop.permute.xlu1 %2865 }
0x182d   : > { %3065 = vmatmul.mubr.msk.f32.vlgmr.msra.gmra.mxu0 %vm2868_vm0, %v4083_v53 }
0x18ed   : > { %v2937_v63 = vpop.f32.mrf.mxu0 }
0x18ee   : > { %v2938_v38 = vadd.f32 %v2937_v63, %v2866_v15 }
0x18ef   : > { %v2939_v16 = vpop.f32.mrf.mxu0 }
0x18f0   : > { %v2940_v18 = vadd.f32 %v2939_v16, %v2866_v15  ;;  %3416 = vtanh.f32 %v2938_v38 }
0x18f2   : > { %3418 = vtanh.f32 %v2940_v18 }
0x18fd   : > { %v3417_v44 = vpop.eup %3416 }
0x18ff   : > { %v3419_v46 = vpop.eup %3418 }
0x1900   : > { %v2946_v31 = vcombine.low %v3417_v44, %v3419_v46 }
0x1902   : > { %v2953_v33 = vrot.slane %v2946_v31, %v2952_v45 }
0x1904   : > { %v2960_v47 = vrot.slane %v2953_v33, %v2952_v45 }
0x1906   : > { %2966 = vst.msk [vmem:[%s141_s29] sm:$0x3] %vm2964_vm13, %v2960_v47 }
0x1907 PF: > { %s12_s9 = sadd.s32 1, %s3427_s9  }
0x1908   : > { %p9_p4 = scmp.ge.s32.totalorder %s12_s9, 4  }
0x190a   :  { %11 = sbr.rel (!%p9_p4) target bundleno = 1 (0x1), region = 58 }

</bundles_post_ra>
